<compile_context>
chip_gen: v6e
topology: v6e:2x2x1
jax: 0.10.0
libtpu: 0.0.40
codegen_flags: <defaults>
</compile_context>

<pallas_src>
import jax
import jax.numpy as jnp
from jax.experimental import pallas as pl
from jax.experimental.pallas import tpu as pltpu

BN_EPS = 1e-5
_VMEM_LIMIT = 32 * 1024 * 1024  # safe on v5e/v6e/v7x


def _compiler_params(sem):
    return pltpu.CompilerParams(dimension_semantics=sem,
                                vmem_limit_bytes=_VMEM_LIMIT)


# ---------------------------------------------------------------------------
# Kernel 1: row-tiled 1x1 conv + folded BN + ReLU  (used for in5)
# ---------------------------------------------------------------------------
def _conv1x1_kernel(x_ref, w_ref, s_ref, b_ref, o_ref):
    # x_ref: (tm, Cin) f32   w_ref: (Cin, Cout) bf16   s/b: (1, Cout) f32
    x = x_ref[...].astype(jnp.bfloat16)
    acc = jnp.dot(x, w_ref[...], preferred_element_type=jnp.float32)
    o_ref[...] = jnp.maximum(acc * s_ref[...] + b_ref[...], 0.0)


def conv1x1_bn_relu(x_nhwc, w_bf16, scale, bias, *, tm_max=512):
    N, H, W, Cin = x_nhwc.shape
    Cout = w_bf16.shape[1]
    M = N * H * W
    xm = x_nhwc.reshape(M, Cin)
    tm = min(tm_max, M) if M % 8 == 0 else M
    out = pl.pallas_call(
        _conv1x1_kernel,
        out_shape=jax.ShapeDtypeStruct((M, Cout), jnp.float32),
        grid=(pl.cdiv(M, tm),),
        in_specs=[
            pl.BlockSpec((tm, Cin), lambda i: (i, 0)),
            pl.BlockSpec((Cin, Cout), lambda i: (0, 0)),
            pl.BlockSpec((1, Cout), lambda i: (0, 0)),
            pl.BlockSpec((1, Cout), lambda i: (0, 0)),
        ],
        out_specs=pl.BlockSpec((tm, Cout), lambda i: (i, 0)),
        compiler_params=_compiler_params(("parallel",)),
    )(xm, w_bf16, scale.reshape(1, Cout), bias.reshape(1, Cout))
    return out.reshape(N, H, W, Cout)


# ---------------------------------------------------------------------------
# Kernel 2: fused 1x1 conv + BN + ReLU + nearest-2x-upsampled residual add
#           (produces out4 / out3 / out2 directly)
#
# W-direction upsample is handled by a "column fold": the fine tensors are
# viewed as (N, H, W/2, 2*C) so duplicating a coarse pixel along W is a simple
# lane-dim concat, and the 1x1 conv uses a block-diagonal (2Cin, 2Cout) weight.
# ---------------------------------------------------------------------------
def _conv1x1_upadd_kernel(x_ref, r_ref, w_ref, s_ref, b_ref, o_ref):
    # x_ref: (1, th, W2, 2Cin) f32    r_ref: (1, th//2, W2, Cout) f32
    # w_ref: (2Cin, 2Cout) bf16       s/b: (1, 2Cout) f32
    # o_ref: (1, th, W2, 2Cout) f32
    th, W2, Cin2 = x_ref.shape[1], x_ref.shape[2], x_ref.shape[3]
    Cout2 = w_ref.shape[1]
    Cout = Cout2 // 2

    x = x_ref[0].reshape(th * W2, Cin2).astype(jnp.bfloat16)
    y = jnp.dot(x, w_ref[...], preferred_element_type=jnp.float32)
    y = jnp.maximum(y * s_ref[...] + b_ref[...], 0.0).reshape(th, W2, Cout2)

    r = r_ref[0]                                                # (th//2, W2, Cout)
    # upsample rows: broadcast + merge of *leading* dims (layout-safe)
    r = jnp.broadcast_to(r[:, None, :, :], (th // 2, 2, W2, Cout))
    r = r.reshape(th, W2, Cout)
    # upsample cols: both folded column copies see the same coarse pixel
    r = jnp.concatenate([r, r], axis=-1)                        # (th, W2, 2Cout)

    o_ref[0] = (y + r).astype(o_ref.dtype)


def _pick_row_tile(H, row_elems, target_elems=1 << 18):
    """Largest even divisor of H keeping one block around <=1 MiB of f32."""
    best = 2
    for th in range(2, H + 1, 2):
        if H % th == 0 and th * row_elems <= target_elems:
            best = th
    return best


def conv1x1_bn_relu_up2add(x_nhwc, res_nhwc, w_bf16, scale, bias):
    N, H, W, Cin = x_nhwc.shape
    Nr, Hr, Wr, Cout = res_nhwc.shape
    assert (Nr, Hr, Wr) == (N, H // 2, W // 2) and H % 2 == 0 and W % 2 == 0
    assert w_bf16.shape == (Cin, Cout)
    W2 = W // 2

    # fold even/odd columns into the lane dim (free row-major reshape in XLA)
    xf = x_nhwc.reshape(N, H, W2, 2 * Cin)
    # block-diagonal weight so the folded matmul computes both columns at once
    w_bd = jnp.zeros((2 * Cin, 2 * Cout), w_bf16.dtype)
    w_bd = w_bd.at[:Cin, :Cout].set(w_bf16).at[Cin:, Cout:].set(w_bf16)
    s2 = jnp.concatenate([scale, scale]).reshape(1, 2 * Cout)
    b2 = jnp.concatenate([bias, bias]).reshape(1, 2 * Cout)

    th = _pick_row_tile(H, W2 * (2 * Cin + 2 * Cout))
    grid = (N, H // th)

    out = pl.pallas_call(
        _conv1x1_upadd_kernel,
        out_shape=jax.ShapeDtypeStruct((N, H, W2, 2 * Cout), jnp.float32),
        grid=grid,
        in_specs=[
            pl.BlockSpec((1, th, W2, 2 * Cin), lambda n, r: (n, r, 0, 0)),
            pl.BlockSpec((1, th // 2, W2, Cout), lambda n, r: (n, r, 0, 0)),
            pl.BlockSpec((2 * Cin, 2 * Cout), lambda n, r: (0, 0)),
            pl.BlockSpec((1, 2 * Cout), lambda n, r: (0, 0)),
            pl.BlockSpec((1, 2 * Cout), lambda n, r: (0, 0)),
        ],
        out_specs=pl.BlockSpec((1, th, W2, 2 * Cout), lambda n, r: (n, r, 0, 0)),
        compiler_params=_compiler_params(("parallel", "parallel")),
    )(xf, res_nhwc, w_bd, s2, b2)
    return out.reshape(N, H, W, Cout)


# ---------------------------------------------------------------------------
# Kernel 3: 3x3 conv (pad=1) + BN + ReLU + fused nearest upsample (x up)
#   - im2col: single wide-K matmul (K = 9*Cin)
#   - zero padding built in a VMEM scratch (no HBM pad pass)
#   - output written W-folded as (N, h*up, w, up*Cq); wrapper reshape un-folds
# ---------------------------------------------------------------------------
def _conv3x3_up_kernel(x_ref, w_ref, s_ref, b_ref, o_ref, xp_ref):
    h, w, Cin = x_ref.shape[1], x_ref.shape[2], x_ref.shape[3]
    Cq = w_ref.shape[1]
    up = o_ref.shape[3] // Cq

    # zero-pad the tile in VMEM
    xp_ref[...] = jnp.zeros_like(xp_ref)
    xp_ref[1:h + 1, 1:w + 1, :] = x_ref[0]
    xp = xp_ref[...]

    # im2col -> one K=9*Cin matmul instead of nine K=Cin matmuls
    cols = [xp[dy:dy + h, dx:dx + w, :] for dy in range(3) for dx in range(3)]
    patch = jnp.concatenate(cols, axis=-1).reshape(h * w, 9 * Cin)
    y = jnp.dot(patch.astype(jnp.bfloat16), w_ref[...],
                preferred_element_type=jnp.float32)
    y = jnp.maximum(y * s_ref[...] + b_ref[...], 0.0).reshape(h, w, Cq)

    if up > 1:
        # rows: broadcast + merge of leading dims; cols: lane-dim fold
        y = jnp.broadcast_to(y[:, None, :, :], (h, up, w, Cq)).reshape(h * up, w, Cq)
        y = jnp.concatenate([y] * up, axis=-1)                  # (h*up, w, up*Cq)

    o_ref[0] = y.astype(o_ref.dtype)


def conv3x3_bn_relu_up(x_nhwc, w_bf16, scale, bias, *, up):
    N, h, w, Cin = x_nhwc.shape
    Cq = w_bf16.shape[-1]
    assert w_bf16.shape[0] == 9 * Cin
    H, W = h * up, w * up

    out = pl.pallas_call(
        _conv3x3_up_kernel,
        out_shape=jax.ShapeDtypeStruct((N, H, w, up * Cq), jnp.float32),
        grid=(N,),
        in_specs=[
            pl.BlockSpec((1, h, w, Cin), lambda n: (n, 0, 0, 0)),
            pl.BlockSpec((9 * Cin, Cq), lambda n: (0, 0)),
            pl.BlockSpec((1, Cq), lambda n: (0, 0)),
            pl.BlockSpec((1, Cq), lambda n: (0, 0)),
        ],
        out_specs=pl.BlockSpec((1, H, w, up * Cq), lambda n: (n, 0, 0, 0)),
        scratch_shapes=[pltpu.VMEM((h + 2, w + 2, Cin), jnp.float32)],
        compiler_params=_compiler_params(("parallel",)),
    )(x_nhwc, w_bf16, scale.reshape(1, Cq), bias.reshape(1, Cq))
    # undo the W-fold: (N, H, W/up, up*Cq) -> (N, H, W, Cq)  (free reshape)
    return out.reshape(N, H, W, Cq)


# ---------------------------------------------------------------------------
# Full forward (one jitted function)
# ---------------------------------------------------------------------------
@jax.jit
def db_head_forward(params, c2, c3, c4, c5):
    to_nhwc = lambda t: jnp.transpose(t, (0, 2, 3, 1))
    c2, c3, c4, c5 = map(to_nhwc, (c2, c3, c4, c5))

    in5 = conv1x1_bn_relu(c5, *params["in5"])
    out4 = conv1x1_bn_relu_up2add(c4, in5, *params["in4"])
    out3 = conv1x1_bn_relu_up2add(c3, out4, *params["in3"])
    out2 = conv1x1_bn_relu_up2add(c2, out3, *params["in2"])

    p5 = conv3x3_bn_relu_up(in5, *params["out5"], up=8)
    p4 = conv3x3_bn_relu_up(out4, *params["out4"], up=4)
    p3 = conv3x3_bn_relu_up(out3, *params["out3"], up=2)
    p2 = conv3x3_bn_relu_up(out2, *params["out2"], up=1)

    fuse = jnp.concatenate([p5, p4, p3, p2], axis=-1)
    return jnp.transpose(fuse, (0, 3, 1, 2))   # module contract: NCHW output


# ---------------------------------------------------------------------------
# Parameters (deterministic, mirrors the PyTorch __init__; weights in bf16)
# ---------------------------------------------------------------------------
def _kaiming_normal(key, shape, fan_in):
    std = (2.0 / fan_in) ** 0.5
    return jax.random.normal(key, shape, jnp.float32) * std


def _folded_bn(cout):
    # eval-mode BN: gamma=1, beta=1e-4, running_mean=0, running_var=1
    scale = jnp.full((cout,), 1.0 / (1.0 + BN_EPS) ** 0.5, jnp.float32)
    bias = jnp.full((cout,), 1e-4, jnp.float32)
    return scale, bias


def make_params(key, in_channels, inner_channels):
    keys = jax.random.split(key, 8)
    params = {}
    for name, cin, k in zip(
        ("in5", "in4", "in3", "in2"),
        (in_channels[-1], in_channels[-2], in_channels[-3], in_channels[-4]),
        keys[:4],
    ):
        w = _kaiming_normal(k, (cin, inner_channels), fan_in=cin).astype(jnp.bfloat16)
        s, b = _folded_bn(inner_channels)
        params[name] = (w, s, b)
    cq = inner_channels // 4
    for name, k in zip(("out5", "out4", "out3", "out2"), keys[4:]):
        w = _kaiming_normal(k, (9, inner_channels, cq), fan_in=inner_channels * 9)
        w = w.reshape(9 * inner_channels, cq).astype(jnp.bfloat16)
        s, b = _folded_bn(cq)
        params[name] = (w, s, b)
    return params


# ---------------------------------------------------------------------------
# Pure-JAX reference (same bf16 weights / bf16 matmul operands, f32 accum)
# ---------------------------------------------------------------------------
def _up_nearest(x, s):
    return jnp.repeat(jnp.repeat(x, s, axis=1), s, axis=2)


def _ref_conv_bn_relu(x, w_hwio, scale, bias, padding):
    y = jax.lax.conv_general_dilated(
        x.astype(jnp.bfloat16), w_hwio, (1, 1), padding,
        dimension_numbers=("NHWC", "HWIO", "NHWC"),
        preferred_element_type=jnp.float32)
    return jnp.maximum(y * scale + bias, 0.0)


def ref_forward(params, c2, c3, c4, c5):
    to_nhwc = lambda t: jnp.transpose(t, (0, 2, 3, 1))
    c2, c3, c4, c5 = map(to_nhwc, (c2, c3, c4, c5))

    def cbr1(x, p):
        w, s, b = p
        return _ref_conv_bn_relu(x, w[None, None], s, b, "VALID")

    def cbr3(x, p):
        w, s, b = p
        cin, cq = w.shape[0] // 9, w.shape[1]
        return _ref_conv_bn_relu(x, w.reshape(3, 3, cin, cq), s, b, "SAME")

    in5 = cbr1(c5, params["in5"])
    in4 = cbr1(c4, params["in4"])
    in3 = cbr1(c3, params["in3"])
    in2 = cbr1(c2, params["in2"])
    out4 = _up_nearest(in5, 2) + in4
    out3 = _up_nearest(out4, 2) + in3
    out2 = _up_nearest(out3, 2) + in2
    p5 = _up_nearest(cbr3(in5, params["out5"]), 8)
    p4 = _up_nearest(cbr3(out4, params["out4"]), 4)
    p3 = _up_nearest(cbr3(out3, params["out3"]), 2)
    p2 = cbr3(out2, params["out2"])
    fuse = jnp.concatenate([p5, p4, p3, p2], axis=-1)
    return jnp.transpose(fuse, (0, 3, 1, 2))


# ---------------------------------------------------------------------------
if __name__ == "__main__":
    key = jax.random.PRNGKey(0)
    in_channels = [4, 8, 16, 32]   # channels of (c2, c3, c4, c5)
    inner_channels = 32
    N, H, W = 2, 16, 16

    kp, k2, k3, k4, k5 = jax.random.split(key, 5)
    c2 = jax.random.normal(k2, (N, in_channels[0], H, W), jnp.float32)
    c3 = jax.random.normal(k3, (N, in_channels[1], H // 2, W // 2), jnp.float32)
    c4 = jax.random.normal(k4, (N, in_channels[2], H // 4, W // 4), jnp.float32)
    c5 = jax.random.normal(k5, (N, in_channels[3], H // 8, W // 8), jnp.float32)

    params = make_params(kp, in_channels, inner_channels)

    fuse = jax.block_until_ready(db_head_forward(params, c2, c3, c4, c5))
    assert fuse.shape == (N, inner_channels, H, W), fuse.shape

    ref = jax.block_until_ready(ref_forward(params, c2, c3, c4, c5))
    max_err = float(jnp.max(jnp.abs(fuse - ref)))
    assert max_err < 2e-2, f"mismatch vs reference: {max_err}"

    print("KERNEL_OK")
</pallas_src>

<mosaic_0001>
module attributes {stable_mosaic.version = 11 : i64} {
  func.func @_conv1x1_kernel(%arg0: i32, %arg1: memref<8x32xf32, #tpu.memory_space<vmem>>, %arg2: memref<32x32xbf16, #tpu.memory_space<vmem>>, %arg3: memref<1x32xf32, #tpu.memory_space<vmem>>, %arg4: memref<1x32xf32, #tpu.memory_space<vmem>>, %arg5: memref<8x32xf32, #tpu.memory_space<vmem>>) attributes {dimension_semantics = [#tpu.dimension_semantics<parallel>], iteration_bounds = array<i64: 1>, scalar_prefetch = 0 : i64, scratch_operands = 0 : i64, tpu.core_type = #tpu.core_type<tc>, window_params = [{transform_indices = @transform_0, window_bounds = array<i64: 8, 32>}, {pipeline_mode = #tpu.pipeline_mode<synchronous>, transform_indices = @transform_1, window_bounds = array<i64: 32, 32>}, {pipeline_mode = #tpu.pipeline_mode<synchronous>, transform_indices = @transform_2, window_bounds = array<i64: 1, 32>}, {pipeline_mode = #tpu.pipeline_mode<synchronous>, transform_indices = @transform_3, window_bounds = array<i64: 1, 32>}, {transform_indices = @transform_4, window_bounds = array<i64: 8, 32>}]} {
    %c0 = arith.constant 0 : index
    %c0_0 = arith.constant 0 : index
    %0 = vector.load %arg1[%c0, %c0_0] : memref<8x32xf32, #tpu.memory_space<vmem>>, vector<8x32xf32>
    %1 = arith.truncf %0 : vector<8x32xf32> to vector<8x32xbf16>
    %c0_1 = arith.constant 0 : index
    %c0_2 = arith.constant 0 : index
    %2 = vector.load %arg2[%c0_1, %c0_2] : memref<32x32xbf16, #tpu.memory_space<vmem>>, vector<32x32xbf16>
    %cst = arith.constant dense<0.000000e+00> : vector<8x32xf32>
    %3 = tpu.matmul %1, %2, %cst {dimension_numbers = #tpu.dot_dimension_numbers<[1], [0], [0], [1], [0, 0, 1, 1], [], []>} : vector<8x32xbf16>, vector<32x32xbf16>, vector<8x32xf32> -> vector<8x32xf32>
    %c0_3 = arith.constant 0 : index
    %c0_4 = arith.constant 0 : index
    %4 = vector.load %arg3[%c0_3, %c0_4] : memref<1x32xf32, #tpu.memory_space<vmem>>, vector<1x32xf32>
    %5 = vector.broadcast %4 : vector<1x32xf32> to vector<8x32xf32>
    %6 = arith.mulf %3, %5 : vector<8x32xf32>
    %c0_5 = arith.constant 0 : index
    %c0_6 = arith.constant 0 : index
    %7 = vector.load %arg4[%c0_5, %c0_6] : memref<1x32xf32, #tpu.memory_space<vmem>>, vector<1x32xf32>
    %8 = vector.broadcast %7 : vector<1x32xf32> to vector<8x32xf32>
    %9 = arith.addf %6, %8 : vector<8x32xf32>
    %cst_7 = arith.constant 0.000000e+00 : f32
    %10 = vector.broadcast %cst_7 : f32 to vector<8x32xf32>
    %11 = arith.maximumf %9, %10 : vector<8x32xf32>
    %c0_8 = arith.constant 0 : index
    %c0_9 = arith.constant 0 : index
    %12 = vector.load %arg5[%c0_8, %c0_9] : memref<8x32xf32, #tpu.memory_space<vmem>>, vector<8x32xf32>
    tpu.vector_store %arg5[%c0_8, %c0_9], %11 {strides = array<i32>} : memref<8x32xf32, #tpu.memory_space<vmem>>, vector<8x32xf32>,
    return
  }
  func.func @transform_0(%arg0: i32) -> (i32, i32) {
    %c0_i32 = arith.constant 0 : i32
    %c0_i32_0 = arith.constant 0 : i32
    return %arg0, %c0_i32 : i32, i32
  }
  func.func @transform_1(%arg0: i32) -> (i32, i32) {
    %c0_i32 = arith.constant 0 : i32
    %c0_i32_0 = arith.constant 0 : i32
    %c0_i32_1 = arith.constant 0 : i32
    return %c0_i32, %c0_i32_0 : i32, i32
  }
  func.func @transform_2(%arg0: i32) -> (i32, i32) {
    %c0_i32 = arith.constant 0 : i32
    %c0_i32_0 = arith.constant 0 : i32
    %c0_i32_1 = arith.constant 0 : i32
    return %c0_i32, %c0_i32_0 : i32, i32
  }
  func.func @transform_3(%arg0: i32) -> (i32, i32) {
    %c0_i32 = arith.constant 0 : i32
    %c0_i32_0 = arith.constant 0 : i32
    %c0_i32_1 = arith.constant 0 : i32
    return %c0_i32, %c0_i32_0 : i32, i32
  }
  func.func @transform_4(%arg0: i32) -> (i32, i32) {
    %c0_i32 = arith.constant 0 : i32
    %c0_i32_0 = arith.constant 0 : i32
    return %arg0, %c0_i32 : i32, i32
  }
}

module attributes {stable_mosaic.version = 11 : i64} {
  func.func @_conv1x1_upadd_kernel(%arg0: i32, %arg1: i32, %arg2: memref<1x4x2x32xf32, #tpu.memory_space<vmem>>, %arg3: memref<1x2x2x32xf32, #tpu.memory_space<vmem>>, %arg4: memref<32x64xbf16, #tpu.memory_space<vmem>>, %arg5: memref<1x64xf32, #tpu.memory_space<vmem>>, %arg6: memref<1x64xf32, #tpu.memory_space<vmem>>, %arg7: memref<1x4x2x64xf32, #tpu.memory_space<vmem>>) attributes {dimension_semantics = [#tpu.dimension_semantics<parallel>, #tpu.dimension_semantics<parallel>], iteration_bounds = array<i64: 2, 1>, scalar_prefetch = 0 : i64, scratch_operands = 0 : i64, tpu.core_type = #tpu.core_type<tc>, window_params = [{transform_indices = @transform_0, window_bounds = array<i64: 1, 4, 2, 32>}, {transform_indices = @transform_1, window_bounds = array<i64: 1, 2, 2, 32>}, {pipeline_mode = #tpu.pipeline_mode<synchronous>, transform_indices = @transform_2, window_bounds = array<i64: 32, 64>}, {pipeline_mode = #tpu.pipeline_mode<synchronous>, transform_indices = @transform_3, window_bounds = array<i64: 1, 64>}, {pipeline_mode = #tpu.pipeline_mode<synchronous>, transform_indices = @transform_4, window_bounds = array<i64: 1, 64>}, {transform_indices = @transform_5, window_bounds = array<i64: 1, 4, 2, 64>}]} {
    %c0 = arith.constant 0 : index
    %c0_0 = arith.constant 0 : index
    %c0_1 = arith.constant 0 : index
    %c0_2 = arith.constant 0 : index
    %0 = vector.load %arg2[%c0, %c0_0, %c0_1, %c0_2] : memref<1x4x2x32xf32, #tpu.memory_space<vmem>>, vector<1x4x2x32xf32>
    %1 = vector.shape_cast %0 : vector<1x4x2x32xf32> to vector<4x2x32xf32>
    %2 = vector.shape_cast %1 : vector<4x2x32xf32> to vector<8x32xf32>
    %3 = arith.truncf %2 : vector<8x32xf32> to vector<8x32xbf16>
    %c0_3 = arith.constant 0 : index
    %c0_4 = arith.constant 0 : index
    %4 = vector.load %arg4[%c0_3, %c0_4] : memref<32x64xbf16, #tpu.memory_space<vmem>>, vector<32x64xbf16>
    %cst = arith.constant dense<0.000000e+00> : vector<8x64xf32>
    %5 = tpu.matmul %3, %4, %cst {dimension_numbers = #tpu.dot_dimension_numbers<[1], [0], [0], [1], [0, 0, 1, 1], [], []>} : vector<8x32xbf16>, vector<32x64xbf16>, vector<8x64xf32> -> vector<8x64xf32>
    %c0_5 = arith.constant 0 : index
    %c0_6 = arith.constant 0 : index
    %6 = vector.load %arg5[%c0_5, %c0_6] : memref<1x64xf32, #tpu.memory_space<vmem>>, vector<1x64xf32>
    %7 = vector.broadcast %6 : vector<1x64xf32> to vector<8x64xf32>
    %8 = arith.mulf %5, %7 : vector<8x64xf32>
    %c0_7 = arith.constant 0 : index
    %c0_8 = arith.constant 0 : index
    %9 = vector.load %arg6[%c0_7, %c0_8] : memref<1x64xf32, #tpu.memory_space<vmem>>, vector<1x64xf32>
    %10 = vector.broadcast %9 : vector<1x64xf32> to vector<8x64xf32>
    %11 = arith.addf %8, %10 : vector<8x64xf32>
    %cst_9 = arith.constant 0.000000e+00 : f32
    %12 = vector.broadcast %cst_9 : f32 to vector<8x64xf32>
    %13 = arith.maximumf %11, %12 : vector<8x64xf32>
    %14 = vector.shape_cast %13 : vector<8x64xf32> to vector<4x2x64xf32>
    %c0_10 = arith.constant 0 : index
    %c0_11 = arith.constant 0 : index
    %c0_12 = arith.constant 0 : index
    %c0_13 = arith.constant 0 : index
    %15 = vector.load %arg3[%c0_10, %c0_11, %c0_12, %c0_13] : memref<1x2x2x32xf32, #tpu.memory_space<vmem>>, vector<1x2x2x32xf32>
    %16 = vector.shape_cast %15 : vector<1x2x2x32xf32> to vector<2x2x32xf32>
    %17 = vector.shape_cast %16 : vector<2x2x32xf32> to vector<2x1x2x32xf32>
    %18 = vector.shape_cast %17 : vector<2x1x2x32xf32> to vector<2x1x2x32xf32>
    %19 = vector.broadcast %18 : vector<2x1x2x32xf32> to vector<2x2x2x32xf32>
    %20 = vector.shape_cast %19 : vector<2x2x2x32xf32> to vector<4x2x32xf32>
    %21 = tpu.concatenate %20, %20 in 2 : vector<4x2x32xf32>, vector<4x2x32xf32> -> vector<4x2x64xf32>
    %22 = arith.addf %14, %21 : vector<4x2x64xf32>
    %c0_14 = arith.constant 0 : index
    %c0_15 = arith.constant 0 : index
    %c0_16 = arith.constant 0 : index
    %c0_17 = arith.constant 0 : index
    %23 = vector.load %arg7[%c0_14, %c0_15, %c0_16, %c0_17] : memref<1x4x2x64xf32, #tpu.memory_space<vmem>>, vector<1x4x2x64xf32>
    %24 = vector.shape_cast %23 : vector<1x4x2x64xf32> to vector<4x2x64xf32>
    %25 = vector.shape_cast %22 : vector<4x2x64xf32> to vector<1x4x2x64xf32>
    tpu.vector_store %arg7[%c0_14, %c0_15, %c0_16, %c0_17], %25 {strides = array<i32>} : memref<1x4x2x64xf32, #tpu.memory_space<vmem>>, vector<1x4x2x64xf32>,
    return
  }
  func.func @transform_0(%arg0: i32, %arg1: i32) -> (i32, i32, i32, i32) {
    %c0_i32 = arith.constant 0 : i32
    %c0_i32_0 = arith.constant 0 : i32
    %c0_i32_1 = arith.constant 0 : i32
    return %arg0, %arg1, %c0_i32, %c0_i32_0 : i32, i32, i32, i32
  }
  func.func @transform_1(%arg0: i32, %arg1: i32) -> (i32, i32, i32, i32) {
    %c0_i32 = arith.constant 0 : i32
    %c0_i32_0 = arith.constant 0 : i32
    %c0_i32_1 = arith.constant 0 : i32
    return %arg0, %arg1, %c0_i32, %c0_i32_0 : i32, i32, i32, i32
  }
  func.func @transform_2(%arg0: i32, %arg1: i32) -> (i32, i32) {
    %c0_i32 = arith.constant 0 : i32
    %c0_i32_0 = arith.constant 0 : i32
    %c0_i32_1 = arith.constant 0 : i32
    return %c0_i32, %c0_i32_0 : i32, i32
  }
  func.func @transform_3(%arg0: i32, %arg1: i32) -> (i32, i32) {
    %c0_i32 = arith.constant 0 : i32
    %c0_i32_0 = arith.constant 0 : i32
    %c0_i32_1 = arith.constant 0 : i32
    return %c0_i32, %c0_i32_0 : i32, i32
  }
  func.func @transform_4(%arg0: i32, %arg1: i32) -> (i32, i32) {
    %c0_i32 = arith.constant 0 : i32
    %c0_i32_0 = arith.constant 0 : i32
    %c0_i32_1 = arith.constant 0 : i32
    return %c0_i32, %c0_i32_0 : i32, i32
  }
  func.func @transform_5(%arg0: i32, %arg1: i32) -> (i32, i32, i32, i32) {
    %c0_i32 = arith.constant 0 : i32
    %c0_i32_0 = arith.constant 0 : i32
    %c0_i32_1 = arith.constant 0 : i32
    return %arg0, %arg1, %c0_i32, %c0_i32_0 : i32, i32, i32, i32
  }
}

module attributes {stable_mosaic.version = 11 : i64} {
  func.func @_conv1x1_upadd_kernel(%arg0: i32, %arg1: i32, %arg2: memref<1x8x4x16xf32, #tpu.memory_space<vmem>>, %arg3: memref<1x4x4x32xf32, #tpu.memory_space<vmem>>, %arg4: memref<16x64xbf16, #tpu.memory_space<vmem>>, %arg5: memref<1x64xf32, #tpu.memory_space<vmem>>, %arg6: memref<1x64xf32, #tpu.memory_space<vmem>>, %arg7: memref<1x8x4x64xf32, #tpu.memory_space<vmem>>) attributes {dimension_semantics = [#tpu.dimension_semantics<parallel>, #tpu.dimension_semantics<parallel>], iteration_bounds = array<i64: 2, 1>, scalar_prefetch = 0 : i64, scratch_operands = 0 : i64, tpu.core_type = #tpu.core_type<tc>, window_params = [{transform_indices = @transform_0, window_bounds = array<i64: 1, 8, 4, 16>}, {transform_indices = @transform_1, window_bounds = array<i64: 1, 4, 4, 32>}, {pipeline_mode = #tpu.pipeline_mode<synchronous>, transform_indices = @transform_2, window_bounds = array<i64: 16, 64>}, {pipeline_mode = #tpu.pipeline_mode<synchronous>, transform_indices = @transform_3, window_bounds = array<i64: 1, 64>}, {pipeline_mode = #tpu.pipeline_mode<synchronous>, transform_indices = @transform_4, window_bounds = array<i64: 1, 64>}, {transform_indices = @transform_5, window_bounds = array<i64: 1, 8, 4, 64>}]} {
    %c0 = arith.constant 0 : index
    %c0_0 = arith.constant 0 : index
    %c0_1 = arith.constant 0 : index
    %c0_2 = arith.constant 0 : index
    %0 = vector.load %arg2[%c0, %c0_0, %c0_1, %c0_2] : memref<1x8x4x16xf32, #tpu.memory_space<vmem>>, vector<1x8x4x16xf32>
    %1 = vector.shape_cast %0 : vector<1x8x4x16xf32> to vector<8x4x16xf32>
    %2 = vector.shape_cast %1 : vector<8x4x16xf32> to vector<32x16xf32>
    %3 = arith.truncf %2 : vector<32x16xf32> to vector<32x16xbf16>
    %c0_3 = arith.constant 0 : index
    %c0_4 = arith.constant 0 : index
    %4 = vector.load %arg4[%c0_3, %c0_4] : memref<16x64xbf16, #tpu.memory_space<vmem>>, vector<16x64xbf16>
    %cst = arith.constant dense<0.000000e+00> : vector<32x64xf32>
    %5 = tpu.matmul %3, %4, %cst {dimension_numbers = #tpu.dot_dimension_numbers<[1], [0], [0], [1], [0, 0, 1, 1], [], []>} : vector<32x16xbf16>, vector<16x64xbf16>, vector<32x64xf32> -> vector<32x64xf32>
    %c0_5 = arith.constant 0 : index
    %c0_6 = arith.constant 0 : index
    %6 = vector.load %arg5[%c0_5, %c0_6] : memref<1x64xf32, #tpu.memory_space<vmem>>, vector<1x64xf32>
    %7 = vector.broadcast %6 : vector<1x64xf32> to vector<32x64xf32>
    %8 = arith.mulf %5, %7 : vector<32x64xf32>
    %c0_7 = arith.constant 0 : index
    %c0_8 = arith.constant 0 : index
    %9 = vector.load %arg6[%c0_7, %c0_8] : memref<1x64xf32, #tpu.memory_space<vmem>>, vector<1x64xf32>
    %10 = vector.broadcast %9 : vector<1x64xf32> to vector<32x64xf32>
    %11 = arith.addf %8, %10 : vector<32x64xf32>
    %cst_9 = arith.constant 0.000000e+00 : f32
    %12 = vector.broadcast %cst_9 : f32 to vector<32x64xf32>
    %13 = arith.maximumf %11, %12 : vector<32x64xf32>
    %14 = vector.shape_cast %13 : vector<32x64xf32> to vector<8x4x64xf32>
    %c0_10 = arith.constant 0 : index
    %c0_11 = arith.constant 0 : index
    %c0_12 = arith.constant 0 : index
    %c0_13 = arith.constant 0 : index
    %15 = vector.load %arg3[%c0_10, %c0_11, %c0_12, %c0_13] : memref<1x4x4x32xf32, #tpu.memory_space<vmem>>, vector<1x4x4x32xf32>
    %16 = vector.shape_cast %15 : vector<1x4x4x32xf32> to vector<4x4x32xf32>
    %17 = vector.shape_cast %16 : vector<4x4x32xf32> to vector<4x1x4x32xf32>
    %18 = vector.shape_cast %17 : vector<4x1x4x32xf32> to vector<4x1x4x32xf32>
    %19 = vector.broadcast %18 : vector<4x1x4x32xf32> to vector<4x2x4x32xf32>
    %20 = vector.shape_cast %19 : vector<4x2x4x32xf32> to vector<8x4x32xf32>
    %21 = tpu.concatenate %20, %20 in 2 : vector<8x4x32xf32>, vector<8x4x32xf32> -> vector<8x4x64xf32>
    %22 = arith.addf %14, %21 : vector<8x4x64xf32>
    %c0_14 = arith.constant 0 : index
    %c0_15 = arith.constant 0 : index
    %c0_16 = arith.constant 0 : index
    %c0_17 = arith.constant 0 : index
    %23 = vector.load %arg7[%c0_14, %c0_15, %c0_16, %c0_17] : memref<1x8x4x64xf32, #tpu.memory_space<vmem>>, vector<1x8x4x64xf32>
    %24 = vector.shape_cast %23 : vector<1x8x4x64xf32> to vector<8x4x64xf32>
    %25 = vector.shape_cast %22 : vector<8x4x64xf32> to vector<1x8x4x64xf32>
    tpu.vector_store %arg7[%c0_14, %c0_15, %c0_16, %c0_17], %25 {strides = array<i32>} : memref<1x8x4x64xf32, #tpu.memory_space<vmem>>, vector<1x8x4x64xf32>,
    return
  }
  func.func @transform_0(%arg0: i32, %arg1: i32) -> (i32, i32, i32, i32) {
    %c0_i32 = arith.constant 0 : i32
    %c0_i32_0 = arith.constant 0 : i32
    %c0_i32_1 = arith.constant 0 : i32
    return %arg0, %arg1, %c0_i32, %c0_i32_0 : i32, i32, i32, i32
  }
  func.func @transform_1(%arg0: i32, %arg1: i32) -> (i32, i32, i32, i32) {
    %c0_i32 = arith.constant 0 : i32
    %c0_i32_0 = arith.constant 0 : i32
    %c0_i32_1 = arith.constant 0 : i32
    return %arg0, %arg1, %c0_i32, %c0_i32_0 : i32, i32, i32, i32
  }
  func.func @transform_2(%arg0: i32, %arg1: i32) -> (i32, i32) {
    %c0_i32 = arith.constant 0 : i32
    %c0_i32_0 = arith.constant 0 : i32
    %c0_i32_1 = arith.constant 0 : i32
    return %c0_i32, %c0_i32_0 : i32, i32
  }
  func.func @transform_3(%arg0: i32, %arg1: i32) -> (i32, i32) {
    %c0_i32 = arith.constant 0 : i32
    %c0_i32_0 = arith.constant 0 : i32
    %c0_i32_1 = arith.constant 0 : i32
    return %c0_i32, %c0_i32_0 : i32, i32
  }
  func.func @transform_4(%arg0: i32, %arg1: i32) -> (i32, i32) {
    %c0_i32 = arith.constant 0 : i32
    %c0_i32_0 = arith.constant 0 : i32
    %c0_i32_1 = arith.constant 0 : i32
    return %c0_i32, %c0_i32_0 : i32, i32
  }
  func.func @transform_5(%arg0: i32, %arg1: i32) -> (i32, i32, i32, i32) {
    %c0_i32 = arith.constant 0 : i32
    %c0_i32_0 = arith.constant 0 : i32
    %c0_i32_1 = arith.constant 0 : i32
    return %arg0, %arg1, %c0_i32, %c0_i32_0 : i32, i32, i32, i32
  }
}

module attributes {stable_mosaic.version = 11 : i64} {
  func.func @_conv1x1_upadd_kernel(%arg0: i32, %arg1: i32, %arg2: memref<1x16x8x8xf32, #tpu.memory_space<vmem>>, %arg3: memref<1x8x8x32xf32, #tpu.memory_space<vmem>>, %arg4: memref<8x64xbf16, #tpu.memory_space<vmem>>, %arg5: memref<1x64xf32, #tpu.memory_space<vmem>>, %arg6: memref<1x64xf32, #tpu.memory_space<vmem>>, %arg7: memref<1x16x8x64xf32, #tpu.memory_space<vmem>>) attributes {dimension_semantics = [#tpu.dimension_semantics<parallel>, #tpu.dimension_semantics<parallel>], iteration_bounds = array<i64: 2, 1>, scalar_prefetch = 0 : i64, scratch_operands = 0 : i64, tpu.core_type = #tpu.core_type<tc>, window_params = [{transform_indices = @transform_0, window_bounds = array<i64: 1, 16, 8, 8>}, {transform_indices = @transform_1, window_bounds = array<i64: 1, 8, 8, 32>}, {pipeline_mode = #tpu.pipeline_mode<synchronous>, transform_indices = @transform_2, window_bounds = array<i64: 8, 64>}, {pipeline_mode = #tpu.pipeline_mode<synchronous>, transform_indices = @transform_3, window_bounds = array<i64: 1, 64>}, {pipeline_mode = #tpu.pipeline_mode<synchronous>, transform_indices = @transform_4, window_bounds = array<i64: 1, 64>}, {transform_indices = @transform_5, window_bounds = array<i64: 1, 16, 8, 64>}]} {
    %c0 = arith.constant 0 : index
    %c0_0 = arith.constant 0 : index
    %c0_1 = arith.constant 0 : index
    %c0_2 = arith.constant 0 : index
    %0 = vector.load %arg2[%c0, %c0_0, %c0_1, %c0_2] : memref<1x16x8x8xf32, #tpu.memory_space<vmem>>, vector<1x16x8x8xf32>
    %1 = vector.shape_cast %0 : vector<1x16x8x8xf32> to vector<16x8x8xf32>
    %2 = vector.shape_cast %1 : vector<16x8x8xf32> to vector<128x8xf32>
    %3 = arith.truncf %2 : vector<128x8xf32> to vector<128x8xbf16>
    %c0_3 = arith.constant 0 : index
    %c0_4 = arith.constant 0 : index
    %4 = vector.load %arg4[%c0_3, %c0_4] : memref<8x64xbf16, #tpu.memory_space<vmem>>, vector<8x64xbf16>
    %cst = arith.constant dense<0.000000e+00> : vector<128x64xf32>
    %5 = tpu.matmul %3, %4, %cst {dimension_numbers = #tpu.dot_dimension_numbers<[1], [0], [0], [1], [0, 0, 1, 1], [], []>} : vector<128x8xbf16>, vector<8x64xbf16>, vector<128x64xf32> -> vector<128x64xf32>
    %c0_5 = arith.constant 0 : index
    %c0_6 = arith.constant 0 : index
    %6 = vector.load %arg5[%c0_5, %c0_6] : memref<1x64xf32, #tpu.memory_space<vmem>>, vector<1x64xf32>
    %7 = vector.broadcast %6 : vector<1x64xf32> to vector<128x64xf32>
    %8 = arith.mulf %5, %7 : vector<128x64xf32>
    %c0_7 = arith.constant 0 : index
    %c0_8 = arith.constant 0 : index
    %9 = vector.load %arg6[%c0_7, %c0_8] : memref<1x64xf32, #tpu.memory_space<vmem>>, vector<1x64xf32>
    %10 = vector.broadcast %9 : vector<1x64xf32> to vector<128x64xf32>
    %11 = arith.addf %8, %10 : vector<128x64xf32>
    %cst_9 = arith.constant 0.000000e+00 : f32
    %12 = vector.broadcast %cst_9 : f32 to vector<128x64xf32>
    %13 = arith.maximumf %11, %12 : vector<128x64xf32>
    %14 = vector.shape_cast %13 : vector<128x64xf32> to vector<16x8x64xf32>
    %c0_10 = arith.constant 0 : index
    %c0_11 = arith.constant 0 : index
    %c0_12 = arith.constant 0 : index
    %c0_13 = arith.constant 0 : index
    %15 = vector.load %arg3[%c0_10, %c0_11, %c0_12, %c0_13] : memref<1x8x8x32xf32, #tpu.memory_space<vmem>>, vector<1x8x8x32xf32>
    %16 = vector.shape_cast %15 : vector<1x8x8x32xf32> to vector<8x8x32xf32>
    %17 = vector.shape_cast %16 : vector<8x8x32xf32> to vector<8x1x8x32xf32>
    %18 = vector.shape_cast %17 : vector<8x1x8x32xf32> to vector<8x1x8x32xf32>
    %19 = vector.broadcast %18 : vector<8x1x8x32xf32> to vector<8x2x8x32xf32>
    %20 = vector.shape_cast %19 : vector<8x2x8x32xf32> to vector<16x8x32xf32>
    %21 = tpu.concatenate %20, %20 in 2 : vector<16x8x32xf32>, vector<16x8x32xf32> -> vector<16x8x64xf32>
    %22 = arith.addf %14, %21 : vector<16x8x64xf32>
    %c0_14 = arith.constant 0 : index
    %c0_15 = arith.constant 0 : index
    %c0_16 = arith.constant 0 : index
    %c0_17 = arith.constant 0 : index
    %23 = vector.load %arg7[%c0_14, %c0_15, %c0_16, %c0_17] : memref<1x16x8x64xf32, #tpu.memory_space<vmem>>, vector<1x16x8x64xf32>
    %24 = vector.shape_cast %23 : vector<1x16x8x64xf32> to vector<16x8x64xf32>
    %25 = vector.shape_cast %22 : vector<16x8x64xf32> to vector<1x16x8x64xf32>
    tpu.vector_store %arg7[%c0_14, %c0_15, %c0_16, %c0_17], %25 {strides = array<i32>} : memref<1x16x8x64xf32, #tpu.memory_space<vmem>>, vector<1x16x8x64xf32>,
    return
  }
  func.func @transform_0(%arg0: i32, %arg1: i32) -> (i32, i32, i32, i32) {
    %c0_i32 = arith.constant 0 : i32
    %c0_i32_0 = arith.constant 0 : i32
    %c0_i32_1 = arith.constant 0 : i32
    return %arg0, %arg1, %c0_i32, %c0_i32_0 : i32, i32, i32, i32
  }
  func.func @transform_1(%arg0: i32, %arg1: i32) -> (i32, i32, i32, i32) {
    %c0_i32 = arith.constant 0 : i32
    %c0_i32_0 = arith.constant 0 : i32
    %c0_i32_1 = arith.constant 0 : i32
    return %arg0, %arg1, %c0_i32, %c0_i32_0 : i32, i32, i32, i32
  }
  func.func @transform_2(%arg0: i32, %arg1: i32) -> (i32, i32) {
    %c0_i32 = arith.constant 0 : i32
    %c0_i32_0 = arith.constant 0 : i32
    %c0_i32_1 = arith.constant 0 : i32
    return %c0_i32, %c0_i32_0 : i32, i32
  }
  func.func @transform_3(%arg0: i32, %arg1: i32) -> (i32, i32) {
    %c0_i32 = arith.constant 0 : i32
    %c0_i32_0 = arith.constant 0 : i32
    %c0_i32_1 = arith.constant 0 : i32
    return %c0_i32, %c0_i32_0 : i32, i32
  }
  func.func @transform_4(%arg0: i32, %arg1: i32) -> (i32, i32) {
    %c0_i32 = arith.constant 0 : i32
    %c0_i32_0 = arith.constant 0 : i32
    %c0_i32_1 = arith.constant 0 : i32
    return %c0_i32, %c0_i32_0 : i32, i32
  }
  func.func @transform_5(%arg0: i32, %arg1: i32) -> (i32, i32, i32, i32) {
    %c0_i32 = arith.constant 0 : i32
    %c0_i32_0 = arith.constant 0 : i32
    %c0_i32_1 = arith.constant 0 : i32
    return %arg0, %arg1, %c0_i32, %c0_i32_0 : i32, i32, i32, i32
  }
}

module attributes {stable_mosaic.version = 11 : i64} {
  func.func @_conv3x3_up_kernel(%arg0: i32, %arg1: memref<1x16x16x32xf32, #tpu.memory_space<vmem>>, %arg2: memref<288x8xbf16, #tpu.memory_space<vmem>>, %arg3: memref<1x8xf32, #tpu.memory_space<vmem>>, %arg4: memref<1x8xf32, #tpu.memory_space<vmem>>, %arg5: memref<1x16x16x8xf32, #tpu.memory_space<vmem>>, %arg6: memref<18x18x32xf32, #tpu.memory_space<vmem>>) attributes {dimension_semantics = [#tpu.dimension_semantics<parallel>], iteration_bounds = array<i64: 2>, scalar_prefetch = 0 : i64, scratch_operands = 1 : i64, tpu.core_type = #tpu.core_type<tc>, window_params = [{transform_indices = @transform_0, window_bounds = array<i64: 1, 16, 16, 32>}, {pipeline_mode = #tpu.pipeline_mode<synchronous>, transform_indices = @transform_1, window_bounds = array<i64: 288, 8>}, {pipeline_mode = #tpu.pipeline_mode<synchronous>, transform_indices = @transform_2, window_bounds = array<i64: 1, 8>}, {pipeline_mode = #tpu.pipeline_mode<synchronous>, transform_indices = @transform_3, window_bounds = array<i64: 1, 8>}, {transform_indices = @transform_4, window_bounds = array<i64: 1, 16, 16, 8>}]} {
    %cst = arith.constant 0.000000e+00 : f32
    %0 = vector.broadcast %cst : f32 to vector<18x18x32xf32>
    %c0 = arith.constant 0 : index
    %c0_0 = arith.constant 0 : index
    %c0_1 = arith.constant 0 : index
    %1 = vector.load %arg6[%c0, %c0_0, %c0_1] : memref<18x18x32xf32, #tpu.memory_space<vmem>>, vector<18x18x32xf32>
    tpu.vector_store %arg6[%c0, %c0_0, %c0_1], %0 {strides = array<i32>} : memref<18x18x32xf32, #tpu.memory_space<vmem>>, vector<18x18x32xf32>,
    %c0_2 = arith.constant 0 : index
    %c0_3 = arith.constant 0 : index
    %c0_4 = arith.constant 0 : index
    %c0_5 = arith.constant 0 : index
    %2 = vector.load %arg1[%c0_2, %c0_3, %c0_4, %c0_5] : memref<1x16x16x32xf32, #tpu.memory_space<vmem>>, vector<1x16x16x32xf32>
    %3 = vector.shape_cast %2 : vector<1x16x16x32xf32> to vector<16x16x32xf32>
    %c1 = arith.constant 1 : index
    %c1_6 = arith.constant 1 : index
    %c0_7 = arith.constant 0 : index
    %4 = vector.load %arg6[%c1, %c1_6, %c0_7] : memref<18x18x32xf32, #tpu.memory_space<vmem>>, vector<16x16x32xf32>
    tpu.vector_store %arg6[%c1, %c1_6, %c0_7], %3 {strides = array<i32>} : memref<18x18x32xf32, #tpu.memory_space<vmem>>, vector<16x16x32xf32>,
    %c0_8 = arith.constant 0 : index
    %c0_9 = arith.constant 0 : index
    %c0_10 = arith.constant 0 : index
    %5 = vector.load %arg6[%c0_8, %c0_9, %c0_10] : memref<18x18x32xf32, #tpu.memory_space<vmem>>, vector<18x18x32xf32>
    %6 = vector.extract_strided_slice %5 {offsets = [0, 0, 0], sizes = [16, 16, 32], strides = [1, 1, 1]} : vector<18x18x32xf32> to vector<16x16x32xf32>
    %7 = vector.extract_strided_slice %5 {offsets = [0, 1, 0], sizes = [16, 16, 32], strides = [1, 1, 1]} : vector<18x18x32xf32> to vector<16x16x32xf32>
    %8 = vector.extract_strided_slice %5 {offsets = [0, 2, 0], sizes = [16, 16, 32], strides = [1, 1, 1]} : vector<18x18x32xf32> to vector<16x16x32xf32>
    %9 = vector.extract_strided_slice %5 {offsets = [1, 0, 0], sizes = [16, 16, 32], strides = [1, 1, 1]} : vector<18x18x32xf32> to vector<16x16x32xf32>
    %10 = vector.extract_strided_slice %5 {offsets = [1, 1, 0], sizes = [16, 16, 32], strides = [1, 1, 1]} : vector<18x18x32xf32> to vector<16x16x32xf32>
    %11 = vector.extract_strided_slice %5 {offsets = [1, 2, 0], sizes = [16, 16, 32], strides = [1, 1, 1]} : vector<18x18x32xf32> to vector<16x16x32xf32>
    %12 = vector.extract_strided_slice %5 {offsets = [2, 0, 0], sizes = [16, 16, 32], strides = [1, 1, 1]} : vector<18x18x32xf32> to vector<16x16x32xf32>
    %13 = vector.extract_strided_slice %5 {offsets = [2, 1, 0], sizes = [16, 16, 32], strides = [1, 1, 1]} : vector<18x18x32xf32> to vector<16x16x32xf32>
    %14 = vector.extract_strided_slice %5 {offsets = [2, 2, 0], sizes = [16, 16, 32], strides = [1, 1, 1]} : vector<18x18x32xf32> to vector<16x16x32xf32>
    %15 = tpu.concatenate %6, %7, %8, %9, %10, %11, %12, %13, %14 in 2 : vector<16x16x32xf32>, vector<16x16x32xf32>, vector<16x16x32xf32>, vector<16x16x32xf32>, vector<16x16x32xf32>, vector<16x16x32xf32>, vector<16x16x32xf32>, vector<16x16x32xf32>, vector<16x16x32xf32> -> vector<16x16x288xf32>
    %16 = vector.shape_cast %15 : vector<16x16x288xf32> to vector<256x288xf32>
    %17 = arith.truncf %16 : vector<256x288xf32> to vector<256x288xbf16>
    %c0_11 = arith.constant 0 : index
    %c0_12 = arith.constant 0 : index
    %18 = vector.load %arg2[%c0_11, %c0_12] : memref<288x8xbf16, #tpu.memory_space<vmem>>, vector<288x8xbf16>
    %cst_13 = arith.constant dense<0.000000e+00> : vector<256x8xf32>
    %19 = tpu.matmul %17, %18, %cst_13 {dimension_numbers = #tpu.dot_dimension_numbers<[1], [0], [0], [1], [0, 0, 1, 1], [], []>} : vector<256x288xbf16>, vector<288x8xbf16>, vector<256x8xf32> -> vector<256x8xf32>
    %c0_14 = arith.constant 0 : index
    %c0_15 = arith.constant 0 : index
    %20 = vector.load %arg3[%c0_14, %c0_15] : memref<1x8xf32, #tpu.memory_space<vmem>>, vector<1x8xf32>
    %21 = vector.broadcast %20 : vector<1x8xf32> to vector<256x8xf32>
    %22 = arith.mulf %19, %21 : vector<256x8xf32>
    %c0_16 = arith.constant 0 : index
    %c0_17 = arith.constant 0 : index
    %23 = vector.load %arg4[%c0_16, %c0_17] : memref<1x8xf32, #tpu.memory_space<vmem>>, vector<1x8xf32>
    %24 = vector.broadcast %23 : vector<1x8xf32> to vector<256x8xf32>
    %25 = arith.addf %22, %24 : vector<256x8xf32>
    %cst_18 = arith.constant 0.000000e+00 : f32
    %26 = vector.broadcast %cst_18 : f32 to vector<256x8xf32>
    %27 = arith.maximumf %25, %26 : vector<256x8xf32>
    %28 = vector.shape_cast %27 : vector<256x8xf32> to vector<16x16x8xf32>
    %c0_19 = arith.constant 0 : index
    %c0_20 = arith.constant 0 : index
    %c0_21 = arith.constant 0 : index
    %c0_22 = arith.constant 0 : index
    %29 = vector.load %arg5[%c0_19, %c0_20, %c0_21, %c0_22] : memref<1x16x16x8xf32, #tpu.memory_space<vmem>>, vector<1x16x16x8xf32>
    %30 = vector.shape_cast %29 : vector<1x16x16x8xf32> to vector<16x16x8xf32>
    %31 = vector.shape_cast %28 : vector<16x16x8xf32> to vector<1x16x16x8xf32>
    tpu.vector_store %arg5[%c0_19, %c0_20, %c0_21, %c0_22], %31 {strides = array<i32>} : memref<1x16x16x8xf32, #tpu.memory_space<vmem>>, vector<1x16x16x8xf32>,
    return
  }
  func.func @transform_0(%arg0: i32) -> (i32, i32, i32, i32) {
    %c0_i32 = arith.constant 0 : i32
    %c0_i32_0 = arith.constant 0 : i32
    %c0_i32_1 = arith.constant 0 : i32
    %c0_i32_2 = arith.constant 0 : i32
    return %arg0, %c0_i32, %c0_i32_0, %c0_i32_1 : i32, i32, i32, i32
  }
  func.func @transform_1(%arg0: i32) -> (i32, i32) {
    %c0_i32 = arith.constant 0 : i32
    %c0_i32_0 = arith.constant 0 : i32
    %c0_i32_1 = arith.constant 0 : i32
    return %c0_i32, %c0_i32_0 : i32, i32
  }
  func.func @transform_2(%arg0: i32) -> (i32, i32) {
    %c0_i32 = arith.constant 0 : i32
    %c0_i32_0 = arith.constant 0 : i32
    %c0_i32_1 = arith.constant 0 : i32
    return %c0_i32, %c0_i32_0 : i32, i32
  }
  func.func @transform_3(%arg0: i32) -> (i32, i32) {
    %c0_i32 = arith.constant 0 : i32
    %c0_i32_0 = arith.constant 0 : i32
    %c0_i32_1 = arith.constant 0 : i32
    return %c0_i32, %c0_i32_0 : i32, i32
  }
  func.func @transform_4(%arg0: i32) -> (i32, i32, i32, i32) {
    %c0_i32 = arith.constant 0 : i32
    %c0_i32_0 = arith.constant 0 : i32
    %c0_i32_1 = arith.constant 0 : i32
    %c0_i32_2 = arith.constant 0 : i32
    return %arg0, %c0_i32, %c0_i32_0, %c0_i32_1 : i32, i32, i32, i32
  }
}

module attributes {stable_mosaic.version = 11 : i64} {
  func.func @_conv3x3_up_kernel(%arg0: i32, %arg1: memref<1x8x8x32xf32, #tpu.memory_space<vmem>>, %arg2: memref<288x8xbf16, #tpu.memory_space<vmem>>, %arg3: memref<1x8xf32, #tpu.memory_space<vmem>>, %arg4: memref<1x8xf32, #tpu.memory_space<vmem>>, %arg5: memref<1x16x8x16xf32, #tpu.memory_space<vmem>>, %arg6: memref<10x10x32xf32, #tpu.memory_space<vmem>>) attributes {dimension_semantics = [#tpu.dimension_semantics<parallel>], iteration_bounds = array<i64: 2>, scalar_prefetch = 0 : i64, scratch_operands = 1 : i64, tpu.core_type = #tpu.core_type<tc>, window_params = [{transform_indices = @transform_0, window_bounds = array<i64: 1, 8, 8, 32>}, {pipeline_mode = #tpu.pipeline_mode<synchronous>, transform_indices = @transform_1, window_bounds = array<i64: 288, 8>}, {pipeline_mode = #tpu.pipeline_mode<synchronous>, transform_indices = @transform_2, window_bounds = array<i64: 1, 8>}, {pipeline_mode = #tpu.pipeline_mode<synchronous>, transform_indices = @transform_3, window_bounds = array<i64: 1, 8>}, {transform_indices = @transform_4, window_bounds = array<i64: 1, 16, 8, 16>}]} {
    %cst = arith.constant 0.000000e+00 : f32
    %0 = vector.broadcast %cst : f32 to vector<10x10x32xf32>
    %c0 = arith.constant 0 : index
    %c0_0 = arith.constant 0 : index
    %c0_1 = arith.constant 0 : index
    %1 = vector.load %arg6[%c0, %c0_0, %c0_1] : memref<10x10x32xf32, #tpu.memory_space<vmem>>, vector<10x10x32xf32>
    tpu.vector_store %arg6[%c0, %c0_0, %c0_1], %0 {strides = array<i32>} : memref<10x10x32xf32, #tpu.memory_space<vmem>>, vector<10x10x32xf32>,
    %c0_2 = arith.constant 0 : index
    %c0_3 = arith.constant 0 : index
    %c0_4 = arith.constant 0 : index
    %c0_5 = arith.constant 0 : index
    %2 = vector.load %arg1[%c0_2, %c0_3, %c0_4, %c0_5] : memref<1x8x8x32xf32, #tpu.memory_space<vmem>>, vector<1x8x8x32xf32>
    %3 = vector.shape_cast %2 : vector<1x8x8x32xf32> to vector<8x8x32xf32>
    %c1 = arith.constant 1 : index
    %c1_6 = arith.constant 1 : index
    %c0_7 = arith.constant 0 : index
    %4 = vector.load %arg6[%c1, %c1_6, %c0_7] : memref<10x10x32xf32, #tpu.memory_space<vmem>>, vector<8x8x32xf32>
    tpu.vector_store %arg6[%c1, %c1_6, %c0_7], %3 {strides = array<i32>} : memref<10x10x32xf32, #tpu.memory_space<vmem>>, vector<8x8x32xf32>,
    %c0_8 = arith.constant 0 : index
    %c0_9 = arith.constant 0 : index
    %c0_10 = arith.constant 0 : index
    %5 = vector.load %arg6[%c0_8, %c0_9, %c0_10] : memref<10x10x32xf32, #tpu.memory_space<vmem>>, vector<10x10x32xf32>
    %6 = vector.extract_strided_slice %5 {offsets = [0, 0, 0], sizes = [8, 8, 32], strides = [1, 1, 1]} : vector<10x10x32xf32> to vector<8x8x32xf32>
    %7 = vector.extract_strided_slice %5 {offsets = [0, 1, 0], sizes = [8, 8, 32], strides = [1, 1, 1]} : vector<10x10x32xf32> to vector<8x8x32xf32>
    %8 = vector.extract_strided_slice %5 {offsets = [0, 2, 0], sizes = [8, 8, 32], strides = [1, 1, 1]} : vector<10x10x32xf32> to vector<8x8x32xf32>
    %9 = vector.extract_strided_slice %5 {offsets = [1, 0, 0], sizes = [8, 8, 32], strides = [1, 1, 1]} : vector<10x10x32xf32> to vector<8x8x32xf32>
    %10 = vector.extract_strided_slice %5 {offsets = [1, 1, 0], sizes = [8, 8, 32], strides = [1, 1, 1]} : vector<10x10x32xf32> to vector<8x8x32xf32>
    %11 = vector.extract_strided_slice %5 {offsets = [1, 2, 0], sizes = [8, 8, 32], strides = [1, 1, 1]} : vector<10x10x32xf32> to vector<8x8x32xf32>
    %12 = vector.extract_strided_slice %5 {offsets = [2, 0, 0], sizes = [8, 8, 32], strides = [1, 1, 1]} : vector<10x10x32xf32> to vector<8x8x32xf32>
    %13 = vector.extract_strided_slice %5 {offsets = [2, 1, 0], sizes = [8, 8, 32], strides = [1, 1, 1]} : vector<10x10x32xf32> to vector<8x8x32xf32>
    %14 = vector.extract_strided_slice %5 {offsets = [2, 2, 0], sizes = [8, 8, 32], strides = [1, 1, 1]} : vector<10x10x32xf32> to vector<8x8x32xf32>
    %15 = tpu.concatenate %6, %7, %8, %9, %10, %11, %12, %13, %14 in 2 : vector<8x8x32xf32>, vector<8x8x32xf32>, vector<8x8x32xf32>, vector<8x8x32xf32>, vector<8x8x32xf32>, vector<8x8x32xf32>, vector<8x8x32xf32>, vector<8x8x32xf32>, vector<8x8x32xf32> -> vector<8x8x288xf32>
    %16 = vector.shape_cast %15 : vector<8x8x288xf32> to vector<64x288xf32>
    %17 = arith.truncf %16 : vector<64x288xf32> to vector<64x288xbf16>
    %c0_11 = arith.constant 0 : index
    %c0_12 = arith.constant 0 : index
    %18 = vector.load %arg2[%c0_11, %c0_12] : memref<288x8xbf16, #tpu.memory_space<vmem>>, vector<288x8xbf16>
    %cst_13 = arith.constant dense<0.000000e+00> : vector<64x8xf32>
    %19 = tpu.matmul %17, %18, %cst_13 {dimension_numbers = #tpu.dot_dimension_numbers<[1], [0], [0], [1], [0, 0, 1, 1], [], []>} : vector<64x288xbf16>, vector<288x8xbf16>, vector<64x8xf32> -> vector<64x8xf32>
    %c0_14 = arith.constant 0 : index
    %c0_15 = arith.constant 0 : index
    %20 = vector.load %arg3[%c0_14, %c0_15] : memref<1x8xf32, #tpu.memory_space<vmem>>, vector<1x8xf32>
    %21 = vector.broadcast %20 : vector<1x8xf32> to vector<64x8xf32>
    %22 = arith.mulf %19, %21 : vector<64x8xf32>
    %c0_16 = arith.constant 0 : index
    %c0_17 = arith.constant 0 : index
    %23 = vector.load %arg4[%c0_16, %c0_17] : memref<1x8xf32, #tpu.memory_space<vmem>>, vector<1x8xf32>
    %24 = vector.broadcast %23 : vector<1x8xf32> to vector<64x8xf32>
    %25 = arith.addf %22, %24 : vector<64x8xf32>
    %cst_18 = arith.constant 0.000000e+00 : f32
    %26 = vector.broadcast %cst_18 : f32 to vector<64x8xf32>
    %27 = arith.maximumf %25, %26 : vector<64x8xf32>
    %28 = vector.shape_cast %27 : vector<64x8xf32> to vector<8x8x8xf32>
    %29 = vector.shape_cast %28 : vector<8x8x8xf32> to vector<8x1x8x8xf32>
    %30 = vector.shape_cast %29 : vector<8x1x8x8xf32> to vector<8x1x8x8xf32>
    %31 = vector.broadcast %30 : vector<8x1x8x8xf32> to vector<8x2x8x8xf32>
    %32 = vector.shape_cast %31 : vector<8x2x8x8xf32> to vector<16x8x8xf32>
    %33 = tpu.concatenate %32, %32 in 2 : vector<16x8x8xf32>, vector<16x8x8xf32> -> vector<16x8x16xf32>
    %c0_19 = arith.constant 0 : index
    %c0_20 = arith.constant 0 : index
    %c0_21 = arith.constant 0 : index
    %c0_22 = arith.constant 0 : index
    %34 = vector.load %arg5[%c0_19, %c0_20, %c0_21, %c0_22] : memref<1x16x8x16xf32, #tpu.memory_space<vmem>>, vector<1x16x8x16xf32>
    %35 = vector.shape_cast %34 : vector<1x16x8x16xf32> to vector<16x8x16xf32>
    %36 = vector.shape_cast %33 : vector<16x8x16xf32> to vector<1x16x8x16xf32>
    tpu.vector_store %arg5[%c0_19, %c0_20, %c0_21, %c0_22], %36 {strides = array<i32>} : memref<1x16x8x16xf32, #tpu.memory_space<vmem>>, vector<1x16x8x16xf32>,
    return
  }
  func.func @transform_0(%arg0: i32) -> (i32, i32, i32, i32) {
    %c0_i32 = arith.constant 0 : i32
    %c0_i32_0 = arith.constant 0 : i32
    %c0_i32_1 = arith.constant 0 : i32
    %c0_i32_2 = arith.constant 0 : i32
    return %arg0, %c0_i32, %c0_i32_0, %c0_i32_1 : i32, i32, i32, i32
  }
  func.func @transform_1(%arg0: i32) -> (i32, i32) {
    %c0_i32 = arith.constant 0 : i32
    %c0_i32_0 = arith.constant 0 : i32
    %c0_i32_1 = arith.constant 0 : i32
    return %c0_i32, %c0_i32_0 : i32, i32
  }
  func.func @transform_2(%arg0: i32) -> (i32, i32) {
    %c0_i32 = arith.constant 0 : i32
    %c0_i32_0 = arith.constant 0 : i32
    %c0_i32_1 = arith.constant 0 : i32
    return %c0_i32, %c0_i32_0 : i32, i32
  }
  func.func @transform_3(%arg0: i32) -> (i32, i32) {
    %c0_i32 = arith.constant 0 : i32
    %c0_i32_0 = arith.constant 0 : i32
    %c0_i32_1 = arith.constant 0 : i32
    return %c0_i32, %c0_i32_0 : i32, i32
  }
  func.func @transform_4(%arg0: i32) -> (i32, i32, i32, i32) {
    %c0_i32 = arith.constant 0 : i32
    %c0_i32_0 = arith.constant 0 : i32
    %c0_i32_1 = arith.constant 0 : i32
    %c0_i32_2 = arith.constant 0 : i32
    return %arg0, %c0_i32, %c0_i32_0, %c0_i32_1 : i32, i32, i32, i32
  }
}

module attributes {stable_mosaic.version = 11 : i64} {
  func.func @_conv3x3_up_kernel(%arg0: i32, %arg1: memref<1x4x4x32xf32, #tpu.memory_space<vmem>>, %arg2: memref<288x8xbf16, #tpu.memory_space<vmem>>, %arg3: memref<1x8xf32, #tpu.memory_space<vmem>>, %arg4: memref<1x8xf32, #tpu.memory_space<vmem>>, %arg5: memref<1x16x4x32xf32, #tpu.memory_space<vmem>>, %arg6: memref<6x6x32xf32, #tpu.memory_space<vmem>>) attributes {dimension_semantics = [#tpu.dimension_semantics<parallel>], iteration_bounds = array<i64: 2>, scalar_prefetch = 0 : i64, scratch_operands = 1 : i64, tpu.core_type = #tpu.core_type<tc>, window_params = [{transform_indices = @transform_0, window_bounds = array<i64: 1, 4, 4, 32>}, {pipeline_mode = #tpu.pipeline_mode<synchronous>, transform_indices = @transform_1, window_bounds = array<i64: 288, 8>}, {pipeline_mode = #tpu.pipeline_mode<synchronous>, transform_indices = @transform_2, window_bounds = array<i64: 1, 8>}, {pipeline_mode = #tpu.pipeline_mode<synchronous>, transform_indices = @transform_3, window_bounds = array<i64: 1, 8>}, {transform_indices = @transform_4, window_bounds = array<i64: 1, 16, 4, 32>}]} {
    %cst = arith.constant 0.000000e+00 : f32
    %0 = vector.broadcast %cst : f32 to vector<6x6x32xf32>
    %c0 = arith.constant 0 : index
    %c0_0 = arith.constant 0 : index
    %c0_1 = arith.constant 0 : index
    %1 = vector.load %arg6[%c0, %c0_0, %c0_1] : memref<6x6x32xf32, #tpu.memory_space<vmem>>, vector<6x6x32xf32>
    tpu.vector_store %arg6[%c0, %c0_0, %c0_1], %0 {strides = array<i32>} : memref<6x6x32xf32, #tpu.memory_space<vmem>>, vector<6x6x32xf32>,
    %c0_2 = arith.constant 0 : index
    %c0_3 = arith.constant 0 : index
    %c0_4 = arith.constant 0 : index
    %c0_5 = arith.constant 0 : index
    %2 = vector.load %arg1[%c0_2, %c0_3, %c0_4, %c0_5] : memref<1x4x4x32xf32, #tpu.memory_space<vmem>>, vector<1x4x4x32xf32>
    %3 = vector.shape_cast %2 : vector<1x4x4x32xf32> to vector<4x4x32xf32>
    %c1 = arith.constant 1 : index
    %c1_6 = arith.constant 1 : index
    %c0_7 = arith.constant 0 : index
    %4 = vector.load %arg6[%c1, %c1_6, %c0_7] : memref<6x6x32xf32, #tpu.memory_space<vmem>>, vector<4x4x32xf32>
    tpu.vector_store %arg6[%c1, %c1_6, %c0_7], %3 {strides = array<i32>} : memref<6x6x32xf32, #tpu.memory_space<vmem>>, vector<4x4x32xf32>,
    %c0_8 = arith.constant 0 : index
    %c0_9 = arith.constant 0 : index
    %c0_10 = arith.constant 0 : index
    %5 = vector.load %arg6[%c0_8, %c0_9, %c0_10] : memref<6x6x32xf32, #tpu.memory_space<vmem>>, vector<6x6x32xf32>
    %6 = vector.extract_strided_slice %5 {offsets = [0, 0, 0], sizes = [4, 4, 32], strides = [1, 1, 1]} : vector<6x6x32xf32> to vector<4x4x32xf32>
    %7 = vector.extract_strided_slice %5 {offsets = [0, 1, 0], sizes = [4, 4, 32], strides = [1, 1, 1]} : vector<6x6x32xf32> to vector<4x4x32xf32>
    %8 = vector.extract_strided_slice %5 {offsets = [0, 2, 0], sizes = [4, 4, 32], strides = [1, 1, 1]} : vector<6x6x32xf32> to vector<4x4x32xf32>
    %9 = vector.extract_strided_slice %5 {offsets = [1, 0, 0], sizes = [4, 4, 32], strides = [1, 1, 1]} : vector<6x6x32xf32> to vector<4x4x32xf32>
    %10 = vector.extract_strided_slice %5 {offsets = [1, 1, 0], sizes = [4, 4, 32], strides = [1, 1, 1]} : vector<6x6x32xf32> to vector<4x4x32xf32>
    %11 = vector.extract_strided_slice %5 {offsets = [1, 2, 0], sizes = [4, 4, 32], strides = [1, 1, 1]} : vector<6x6x32xf32> to vector<4x4x32xf32>
    %12 = vector.extract_strided_slice %5 {offsets = [2, 0, 0], sizes = [4, 4, 32], strides = [1, 1, 1]} : vector<6x6x32xf32> to vector<4x4x32xf32>
    %13 = vector.extract_strided_slice %5 {offsets = [2, 1, 0], sizes = [4, 4, 32], strides = [1, 1, 1]} : vector<6x6x32xf32> to vector<4x4x32xf32>
    %14 = vector.extract_strided_slice %5 {offsets = [2, 2, 0], sizes = [4, 4, 32], strides = [1, 1, 1]} : vector<6x6x32xf32> to vector<4x4x32xf32>
    %15 = tpu.concatenate %6, %7, %8, %9, %10, %11, %12, %13, %14 in 2 : vector<4x4x32xf32>, vector<4x4x32xf32>, vector<4x4x32xf32>, vector<4x4x32xf32>, vector<4x4x32xf32>, vector<4x4x32xf32>, vector<4x4x32xf32>, vector<4x4x32xf32>, vector<4x4x32xf32> -> vector<4x4x288xf32>
    %16 = vector.shape_cast %15 : vector<4x4x288xf32> to vector<16x288xf32>
    %17 = arith.truncf %16 : vector<16x288xf32> to vector<16x288xbf16>
    %c0_11 = arith.constant 0 : index
    %c0_12 = arith.constant 0 : index
    %18 = vector.load %arg2[%c0_11, %c0_12] : memref<288x8xbf16, #tpu.memory_space<vmem>>, vector<288x8xbf16>
    %cst_13 = arith.constant dense<0.000000e+00> : vector<16x8xf32>
    %19 = tpu.matmul %17, %18, %cst_13 {dimension_numbers = #tpu.dot_dimension_numbers<[1], [0], [0], [1], [0, 0, 1, 1], [], []>} : vector<16x288xbf16>, vector<288x8xbf16>, vector<16x8xf32> -> vector<16x8xf32>
    %c0_14 = arith.constant 0 : index
    %c0_15 = arith.constant 0 : index
    %20 = vector.load %arg3[%c0_14, %c0_15] : memref<1x8xf32, #tpu.memory_space<vmem>>, vector<1x8xf32>
    %21 = vector.broadcast %20 : vector<1x8xf32> to vector<16x8xf32>
    %22 = arith.mulf %19, %21 : vector<16x8xf32>
    %c0_16 = arith.constant 0 : index
    %c0_17 = arith.constant 0 : index
    %23 = vector.load %arg4[%c0_16, %c0_17] : memref<1x8xf32, #tpu.memory_space<vmem>>, vector<1x8xf32>
    %24 = vector.broadcast %23 : vector<1x8xf32> to vector<16x8xf32>
    %25 = arith.addf %22, %24 : vector<16x8xf32>
    %cst_18 = arith.constant 0.000000e+00 : f32
    %26 = vector.broadcast %cst_18 : f32 to vector<16x8xf32>
    %27 = arith.maximumf %25, %26 : vector<16x8xf32>
    %28 = vector.shape_cast %27 : vector<16x8xf32> to vector<4x4x8xf32>
    %29 = vector.shape_cast %28 : vector<4x4x8xf32> to vector<4x1x4x8xf32>
    %30 = vector.shape_cast %29 : vector<4x1x4x8xf32> to vector<4x1x4x8xf32>
    %31 = vector.broadcast %30 : vector<4x1x4x8xf32> to vector<4x4x4x8xf32>
    %32 = vector.shape_cast %31 : vector<4x4x4x8xf32> to vector<16x4x8xf32>
    %33 = tpu.concatenate %32, %32, %32, %32 in 2 : vector<16x4x8xf32>, vector<16x4x8xf32>, vector<16x4x8xf32>, vector<16x4x8xf32> -> vector<16x4x32xf32>
    %c0_19 = arith.constant 0 : index
    %c0_20 = arith.constant 0 : index
    %c0_21 = arith.constant 0 : index
    %c0_22 = arith.constant 0 : index
    %34 = vector.load %arg5[%c0_19, %c0_20, %c0_21, %c0_22] : memref<1x16x4x32xf32, #tpu.memory_space<vmem>>, vector<1x16x4x32xf32>
    %35 = vector.shape_cast %34 : vector<1x16x4x32xf32> to vector<16x4x32xf32>
    %36 = vector.shape_cast %33 : vector<16x4x32xf32> to vector<1x16x4x32xf32>
    tpu.vector_store %arg5[%c0_19, %c0_20, %c0_21, %c0_22], %36 {strides = array<i32>} : memref<1x16x4x32xf32, #tpu.memory_space<vmem>>, vector<1x16x4x32xf32>,
    return
  }
  func.func @transform_0(%arg0: i32) -> (i32, i32, i32, i32) {
    %c0_i32 = arith.constant 0 : i32
    %c0_i32_0 = arith.constant 0 : i32
    %c0_i32_1 = arith.constant 0 : i32
    %c0_i32_2 = arith.constant 0 : i32
    return %arg0, %c0_i32, %c0_i32_0, %c0_i32_1 : i32, i32, i32, i32
  }
  func.func @transform_1(%arg0: i32) -> (i32, i32) {
    %c0_i32 = arith.constant 0 : i32
    %c0_i32_0 = arith.constant 0 : i32
    %c0_i32_1 = arith.constant 0 : i32
    return %c0_i32, %c0_i32_0 : i32, i32
  }
  func.func @transform_2(%arg0: i32) -> (i32, i32) {
    %c0_i32 = arith.constant 0 : i32
    %c0_i32_0 = arith.constant 0 : i32
    %c0_i32_1 = arith.constant 0 : i32
    return %c0_i32, %c0_i32_0 : i32, i32
  }
  func.func @transform_3(%arg0: i32) -> (i32, i32) {
    %c0_i32 = arith.constant 0 : i32
    %c0_i32_0 = arith.constant 0 : i32
    %c0_i32_1 = arith.constant 0 : i32
    return %c0_i32, %c0_i32_0 : i32, i32
  }
  func.func @transform_4(%arg0: i32) -> (i32, i32, i32, i32) {
    %c0_i32 = arith.constant 0 : i32
    %c0_i32_0 = arith.constant 0 : i32
    %c0_i32_1 = arith.constant 0 : i32
    %c0_i32_2 = arith.constant 0 : i32
    return %arg0, %c0_i32, %c0_i32_0, %c0_i32_1 : i32, i32, i32, i32
  }
}

module attributes {stable_mosaic.version = 11 : i64} {
  func.func @_conv3x3_up_kernel(%arg0: i32, %arg1: memref<1x2x2x32xf32, #tpu.memory_space<vmem>>, %arg2: memref<288x8xbf16, #tpu.memory_space<vmem>>, %arg3: memref<1x8xf32, #tpu.memory_space<vmem>>, %arg4: memref<1x8xf32, #tpu.memory_space<vmem>>, %arg5: memref<1x16x2x64xf32, #tpu.memory_space<vmem>>, %arg6: memref<4x4x32xf32, #tpu.memory_space<vmem>>) attributes {dimension_semantics = [#tpu.dimension_semantics<parallel>], iteration_bounds = array<i64: 2>, scalar_prefetch = 0 : i64, scratch_operands = 1 : i64, tpu.core_type = #tpu.core_type<tc>, window_params = [{transform_indices = @transform_0, window_bounds = array<i64: 1, 2, 2, 32>}, {pipeline_mode = #tpu.pipeline_mode<synchronous>, transform_indices = @transform_1, window_bounds = array<i64: 288, 8>}, {pipeline_mode = #tpu.pipeline_mode<synchronous>, transform_indices = @transform_2, window_bounds = array<i64: 1, 8>}, {pipeline_mode = #tpu.pipeline_mode<synchronous>, transform_indices = @transform_3, window_bounds = array<i64: 1, 8>}, {transform_indices = @transform_4, window_bounds = array<i64: 1, 16, 2, 64>}]} {
    %cst = arith.constant 0.000000e+00 : f32
    %0 = vector.broadcast %cst : f32 to vector<4x4x32xf32>
    %c0 = arith.constant 0 : index
    %c0_0 = arith.constant 0 : index
    %c0_1 = arith.constant 0 : index
    %1 = vector.load %arg6[%c0, %c0_0, %c0_1] : memref<4x4x32xf32, #tpu.memory_space<vmem>>, vector<4x4x32xf32>
    tpu.vector_store %arg6[%c0, %c0_0, %c0_1], %0 {strides = array<i32>} : memref<4x4x32xf32, #tpu.memory_space<vmem>>, vector<4x4x32xf32>,
    %c0_2 = arith.constant 0 : index
    %c0_3 = arith.constant 0 : index
    %c0_4 = arith.constant 0 : index
    %c0_5 = arith.constant 0 : index
    %2 = vector.load %arg1[%c0_2, %c0_3, %c0_4, %c0_5] : memref<1x2x2x32xf32, #tpu.memory_space<vmem>>, vector<1x2x2x32xf32>
    %3 = vector.shape_cast %2 : vector<1x2x2x32xf32> to vector<2x2x32xf32>
    %c1 = arith.constant 1 : index
    %c1_6 = arith.constant 1 : index
    %c0_7 = arith.constant 0 : index
    %4 = vector.load %arg6[%c1, %c1_6, %c0_7] : memref<4x4x32xf32, #tpu.memory_space<vmem>>, vector<2x2x32xf32>
    tpu.vector_store %arg6[%c1, %c1_6, %c0_7], %3 {strides = array<i32>} : memref<4x4x32xf32, #tpu.memory_space<vmem>>, vector<2x2x32xf32>,
    %c0_8 = arith.constant 0 : index
    %c0_9 = arith.constant 0 : index
    %c0_10 = arith.constant 0 : index
    %5 = vector.load %arg6[%c0_8, %c0_9, %c0_10] : memref<4x4x32xf32, #tpu.memory_space<vmem>>, vector<4x4x32xf32>
    %6 = vector.extract_strided_slice %5 {offsets = [0, 0, 0], sizes = [2, 2, 32], strides = [1, 1, 1]} : vector<4x4x32xf32> to vector<2x2x32xf32>
    %7 = vector.extract_strided_slice %5 {offsets = [0, 1, 0], sizes = [2, 2, 32], strides = [1, 1, 1]} : vector<4x4x32xf32> to vector<2x2x32xf32>
    %8 = vector.extract_strided_slice %5 {offsets = [0, 2, 0], sizes = [2, 2, 32], strides = [1, 1, 1]} : vector<4x4x32xf32> to vector<2x2x32xf32>
    %9 = vector.extract_strided_slice %5 {offsets = [1, 0, 0], sizes = [2, 2, 32], strides = [1, 1, 1]} : vector<4x4x32xf32> to vector<2x2x32xf32>
    %10 = vector.extract_strided_slice %5 {offsets = [1, 1, 0], sizes = [2, 2, 32], strides = [1, 1, 1]} : vector<4x4x32xf32> to vector<2x2x32xf32>
    %11 = vector.extract_strided_slice %5 {offsets = [1, 2, 0], sizes = [2, 2, 32], strides = [1, 1, 1]} : vector<4x4x32xf32> to vector<2x2x32xf32>
    %12 = vector.extract_strided_slice %5 {offsets = [2, 0, 0], sizes = [2, 2, 32], strides = [1, 1, 1]} : vector<4x4x32xf32> to vector<2x2x32xf32>
    %13 = vector.extract_strided_slice %5 {offsets = [2, 1, 0], sizes = [2, 2, 32], strides = [1, 1, 1]} : vector<4x4x32xf32> to vector<2x2x32xf32>
    %14 = vector.extract_strided_slice %5 {offsets = [2, 2, 0], sizes = [2, 2, 32], strides = [1, 1, 1]} : vector<4x4x32xf32> to vector<2x2x32xf32>
    %15 = tpu.concatenate %6, %7, %8, %9, %10, %11, %12, %13, %14 in 2 : vector<2x2x32xf32>, vector<2x2x32xf32>, vector<2x2x32xf32>, vector<2x2x32xf32>, vector<2x2x32xf32>, vector<2x2x32xf32>, vector<2x2x32xf32>, vector<2x2x32xf32>, vector<2x2x32xf32> -> vector<2x2x288xf32>
    %16 = vector.shape_cast %15 : vector<2x2x288xf32> to vector<4x288xf32>
    %17 = arith.truncf %16 : vector<4x288xf32> to vector<4x288xbf16>
    %c0_11 = arith.constant 0 : index
    %c0_12 = arith.constant 0 : index
    %18 = vector.load %arg2[%c0_11, %c0_12] : memref<288x8xbf16, #tpu.memory_space<vmem>>, vector<288x8xbf16>
    %cst_13 = arith.constant dense<0.000000e+00> : vector<4x8xf32>
    %19 = tpu.matmul %17, %18, %cst_13 {dimension_numbers = #tpu.dot_dimension_numbers<[1], [0], [0], [1], [0, 0, 1, 1], [], []>} : vector<4x288xbf16>, vector<288x8xbf16>, vector<4x8xf32> -> vector<4x8xf32>
    %c0_14 = arith.constant 0 : index
    %c0_15 = arith.constant 0 : index
    %20 = vector.load %arg3[%c0_14, %c0_15] : memref<1x8xf32, #tpu.memory_space<vmem>>, vector<1x8xf32>
    %21 = vector.broadcast %20 : vector<1x8xf32> to vector<4x8xf32>
    %22 = arith.mulf %19, %21 : vector<4x8xf32>
    %c0_16 = arith.constant 0 : index
    %c0_17 = arith.constant 0 : index
    %23 = vector.load %arg4[%c0_16, %c0_17] : memref<1x8xf32, #tpu.memory_space<vmem>>, vector<1x8xf32>
    %24 = vector.broadcast %23 : vector<1x8xf32> to vector<4x8xf32>
    %25 = arith.addf %22, %24 : vector<4x8xf32>
    %cst_18 = arith.constant 0.000000e+00 : f32
    %26 = vector.broadcast %cst_18 : f32 to vector<4x8xf32>
    %27 = arith.maximumf %25, %26 : vector<4x8xf32>
    %28 = vector.shape_cast %27 : vector<4x8xf32> to vector<2x2x8xf32>
    %29 = vector.shape_cast %28 : vector<2x2x8xf32> to vector<2x1x2x8xf32>
    %30 = vector.shape_cast %29 : vector<2x1x2x8xf32> to vector<2x1x2x8xf32>
    %31 = vector.broadcast %30 : vector<2x1x2x8xf32> to vector<2x8x2x8xf32>
    %32 = vector.shape_cast %31 : vector<2x8x2x8xf32> to vector<16x2x8xf32>
    %33 = tpu.concatenate %32, %32, %32, %32, %32, %32, %32, %32 in 2 : vector<16x2x8xf32>, vector<16x2x8xf32>, vector<16x2x8xf32>, vector<16x2x8xf32>, vector<16x2x8xf32>, vector<16x2x8xf32>, vector<16x2x8xf32>, vector<16x2x8xf32> -> vector<16x2x64xf32>
    %c0_19 = arith.constant 0 : index
    %c0_20 = arith.constant 0 : index
    %c0_21 = arith.constant 0 : index
    %c0_22 = arith.constant 0 : index
    %34 = vector.load %arg5[%c0_19, %c0_20, %c0_21, %c0_22] : memref<1x16x2x64xf32, #tpu.memory_space<vmem>>, vector<1x16x2x64xf32>
    %35 = vector.shape_cast %34 : vector<1x16x2x64xf32> to vector<16x2x64xf32>
    %36 = vector.shape_cast %33 : vector<16x2x64xf32> to vector<1x16x2x64xf32>
    tpu.vector_store %arg5[%c0_19, %c0_20, %c0_21, %c0_22], %36 {strides = array<i32>} : memref<1x16x2x64xf32, #tpu.memory_space<vmem>>, vector<1x16x2x64xf32>,
    return
  }
  func.func @transform_0(%arg0: i32) -> (i32, i32, i32, i32) {
    %c0_i32 = arith.constant 0 : i32
    %c0_i32_0 = arith.constant 0 : i32
    %c0_i32_1 = arith.constant 0 : i32
    %c0_i32_2 = arith.constant 0 : i32
    return %arg0, %c0_i32, %c0_i32_0, %c0_i32_1 : i32, i32, i32, i32
  }
  func.func @transform_1(%arg0: i32) -> (i32, i32) {
    %c0_i32 = arith.constant 0 : i32
    %c0_i32_0 = arith.constant 0 : i32
    %c0_i32_1 = arith.constant 0 : i32
    return %c0_i32, %c0_i32_0 : i32, i32
  }
  func.func @transform_2(%arg0: i32) -> (i32, i32) {
    %c0_i32 = arith.constant 0 : i32
    %c0_i32_0 = arith.constant 0 : i32
    %c0_i32_1 = arith.constant 0 : i32
    return %c0_i32, %c0_i32_0 : i32, i32
  }
  func.func @transform_3(%arg0: i32) -> (i32, i32) {
    %c0_i32 = arith.constant 0 : i32
    %c0_i32_0 = arith.constant 0 : i32
    %c0_i32_1 = arith.constant 0 : i32
    return %c0_i32, %c0_i32_0 : i32, i32
  }
  func.func @transform_4(%arg0: i32) -> (i32, i32, i32, i32) {
    %c0_i32 = arith.constant 0 : i32
    %c0_i32_0 = arith.constant 0 : i32
    %c0_i32_1 = arith.constant 0 : i32
    %c0_i32_2 = arith.constant 0 : i32
    return %arg0, %c0_i32, %c0_i32_0, %c0_i32_1 : i32, i32, i32, i32
  }
}

</mosaic_0001>

<bundles_post_ra>
// kernel: db_head_forward.8
= control target key start
LH: loop header
LB: loop body
LE: loop exit
PB: predicated region body
PF: predicated region fallthrough
CT: control target
= control target key end

     0   :  { %v122_v0 = vmov 0.0   ;;  %vm123_vm0 = vmmov 0   ;;  %vm36_vm1 = vcmask 261120   ;;  %s167_s1 = inlined_call_operand.vmem [shape: bf16[32,32], index: 1, kind: input, shape index: {}]   ;;  %s168_s0 = inlined_call_operand.vmem [shape: f32[8,32], index: 0, kind: input, shape index: {}]   ;;  %s169_s2 = inlined_call_operand.vmem [shape: f32[1,32], index: 2, kind: input, shape index: {}]   ;;  %s170_s3 = inlined_call_operand.vmem [shape: f32[1,32], index: 3, kind: input, shape index: {}]   ;;  %s171_s4 = inlined_call_operand.vmem [shape: f32[8,32], index: 4, kind: output, shape index: {}]  }
   0x1   :  { %110 = vmatprep.subr.bf16.mxu0 %v122_v0  ;;  %v120_v1 = vld [vmem:[%s167_s1 + $0x8] sm:$0xff]   ;;  %114 = vmatprep.mubr.msk.bf16.mxu0 %vm123_vm0, %v122_v0  ;;  %v121_v2 = vld [vmem:[%s167_s1] sm:$0xff]  }
   0x2   :  { %111 = vmatpush3.bf16.msra.mxu0 %v120_v1  ;;  %v18_v3 = vld [vmem:[%s168_s0] sm:$0xff] }
   0x3   :  { %112 = vmatprep.subr.bf16.mxu0 %v122_v0  ;;  %v19_v4 = vpack.c.bf16 %v18_v3, %v18_v3  ;;  %v105_v5 = vld [vmem:[%s169_s2] ss:$0 sm:$0xff] }
   0x4   :  { %v106_v7 = vld [vmem:[%s170_s3] ss:$0 sm:$0xff] }
   0x6   :  { %113 = vmatpush3.bf16.msra.mxu0 %v121_v2 }
   0x9   :  { %115 = vmatmul.mubr.msk.bf16.vlgmr.msra.gmra.mxu0 %vm36_vm1, %v19_v4 }
  0xc9   :  { %v74_v6 = vpop.f32.mrf.mxu0 }
  0xca   :  { %v87_v8 = vmul.f32 %v105_v5, %v74_v6 }
  0xcb   :  { %v116_v9 = vpop.f32.mrf.mxu0 }
  0xcc   :  { %v95_v10 = vadd.f32 %v106_v7, %v87_v8 }
  0xcd   :  { %v77_v11 = vpop.f32.mrf.mxu0 }
  0xce   :  { %v96_v12 = vmax.f32 %v95_v10, 0.0 }
  0xcf   :  { %v117_v13 = vpop.f32.mrf.mxu0 }
  0xd0   :  { %97 = vst.msk [vmem:[%s171_s4] sm:$0xff] %vm36_vm1, %v96_v12 }

// kernel: db_head_forward.9
= control target key start
LH: loop header
LB: loop body
LE: loop exit
PB: predicated region body
PF: predicated region fallthrough
CT: control target
= control target key end

     0   :  { %s673_s18 = smov 0   ;;  %s675_s19 = smov 0   ;;  %s732_s0 = inlined_call_operand.vmem [shape: f32[2,4,2,32], index: 0, kind: input, shape index: {}]   ;;  %s733_s1 = inlined_call_operand.vmem [shape: f32[2,2,2,32], index: 1, kind: input, shape index: {}]   ;;  %s734_s2 = inlined_call_operand.vmem [shape: bf16[32,64], index: 2, kind: input, shape index: {}]   ;;  %s735_s3 = inlined_call_operand.vmem [shape: f32[1,64], index: 3, kind: input, shape index: {}]   ;;  %s736_s4 = inlined_call_operand.vmem [shape: f32[1,64], index: 4, kind: input, shape index: {}]   ;;  %s737_s5 = inlined_call_operand.vmem [shape: f32[2,4,2,64], index: 5, kind: output, shape index: {}]  }
   0x1   :  { %s677_s20 = smov 0  }
   0x2 LB: > { %s27_s21 = sadd.s32 1, %s633_s19  ;;  %p557_p0 = scmp.ge.s32.totalorder %s637_s20, 1  ;;  %s637_s20 = sphi %s677_s20, %s15_s20   ;;  %s633_s19 = sphi %s675_s19, %s739_s19   ;;  %s629_s18 = sphi %s673_s18, %s738_s18  }
   0x3   : > { %p29_p1 = scmp.ge.s32.totalorder %s27_s21, 2  ;;  %p225_p2 = scmp.lt.s32.totalorder %s637_s20, 3 }
   0x5   : > { %s741_s21 = smov (%p29_p1, %s27_s21), 0  ;;  %p226_p3 = pnand %p557_p0, %p225_p2 }
   0x6   : > { %p271_p4 = scmp.lt.s32.totalorder (!%p226_p3), %s629_s18, 1  ;;  %s642_s9 = smov (!%p226_p3), 32  }
   0x7   : > { %229 = sbr.rel (%p226_p3) target bundleno = 234 (0xea), region = 40 }
   0xc   : > { %v613_v0 = vld [vmem:[%s734_s2 + $0x8] sm:$0xff]   ;;  %v314_v1 = vlaneseq  ;;  %v639_v2 = vmov 0.0   ;;  %v614_v3 = vld [vmem:[%s734_s2] sm:$0xff]   ;;  %vm640_vm0 = vmmov 0   ;;  %v641_v4 = vmov 1983009808  }
   0xd   : > { %577 = vmatprep.subr.bf16.mxu0 %v639_v2  ;;  %581 = vmatprep.mubr.msk.bf16.mxu0 %vm640_vm0, %v639_v2  ;;  %v312_v5 = vunpack.c.l.s4 %v641_v4  ;;  %s743_s18 = smov (!%p271_p4, %s629_s18), 1  ;;  %vm344_vm1 = vcmask 261120   ;;  %v567_v21 = vld [vmem:[%s735_s3] ss:$0 sm:$0xff]  ;;  %vm443_vm2 = vcmask 517120  }
   0xe   : > { %578 = vmatpush3.bf16.msra.mxu0 %v613_v0  ;;  %v315_v6 = vshrl.u32 %v314_v1, 7  ;;  %s571_s26 = sshll.u32 %s743_s18, 3  ;;  %s572_s27 = sshll.u32 %s743_s18, 2  ;;  %v568_v24 = vld [vmem:[%s736_s4] ss:$0 sm:$0xff] }
   0xf   : > { %579 = vmatprep.subr.bf16.mxu0 %v639_v2  ;;  %v313_v7 = vunpack.c.0.s8 %v312_v5  ;;  %s278_s30 = scalar_lea.vmem %s732_s0, %s571_s26  ;;  %s288_s8 = scalar_lea.vmem %s733_s1, %s572_s27 }
  0x10   : > { %v301_v9 = vld [vmem:[%s278_s30] sm:$0x3]  ;;  %v302_v10 = vld [vmem:[%s278_s30 + $0x2] sm:$0x3]  ;;  %v303_v11 = vld [vmem:[%s278_s30 + $0x4] sm:$0x3]  ;;  %s298_s16 = scalar_lea.vmem %s737_s5, %s571_s26 }
  0x11   : > { %v316_v8 = vsub.s32 %v313_v7, %v315_v6  ;;  %v304_v12 = vld [vmem:[%s278_s30 + $0x6] sm:$0x3]  ;;  %v309_v13 = vcombine.low %v301_v9, %v302_v10  ;;  %v427_v14 = vld [vmem:[%s288_s8] sm:$0x3]  ;;  %v428_v17 = vld [vmem:[%s288_s8 + $0x2] sm:$0x3] }
  0x12   : > { %580 = vmatpush3.bf16.msra.mxu0 %v614_v3  ;;  %v310_v15 = vcombine.low %v303_v11, %v304_v12  ;;  %431 = vrot.lane.b32.xlu0 %v427_v14, %s642_s9 }
  0x13   : > { %v317_v16 = vrot.slane %v309_v13, %v316_v8 }
  0x14   : > { %v324_v18 = vrot.slane %v310_v15, %v316_v8 }
  0x16   : > { %v325_v19 = vcombine.low %v317_v16, %v324_v18  ;;  %433 = vrot.lane.b32.xlu0 %v428_v17, %s642_s9 }
  0x18   : > { %v327_v20 = vpack.c.bf16 %v325_v19, %v325_v19 }
  0x1a   : > { %582 = vmatmul.mubr.msk.bf16.vlgmr.msra.gmra.mxu0 %vm344_vm1, %v327_v20 }
  0x84   : > { %v432_v22 = vpop.permute.xlu0 %431 }
  0x85   : > { %v437_v31 = vsel %vm344_vm1, %v427_v14, %v432_v22 }
  0x88   : > { %v434_v30 = vpop.permute.xlu0 %433 }
  0x89   : > { %v438_v35 = vsel %vm344_vm1, %v428_v17, %v434_v30 }
  0xda   : > { %v382_v23 = vpop.f32.mrf.mxu0 }
  0xdb   : > { %v395_v25 = vmul.f32 %v567_v21, %v382_v23 }
  0xdc   : > { %v583_v26 = vpop.f32.mrf.mxu0 }
  0xdd   : > { %v403_v27 = vadd.f32 %v568_v24, %v395_v25 }
  0xde   : > { %v385_v28 = vpop.f32.mrf.mxu0 }
  0xdf   : > { %v404_v29 = vmax.f32 %v403_v27, 0.0 }
  0xe0   : > { %v584_v32 = vpop.f32.mrf.mxu0 }
  0xe1   : > { %v406_v33 = vcombine.high %v404_v29, %v404_v29  ;;  %v413_v34 = vrot.slane %v404_v29, %v316_v8 }
  0xe3   : > { %v421_v36 = vcombine.high %v413_v34, %v413_v34  ;;  %v439_v37 = vadd.f32 %v437_v31, %v413_v34  ;;  %v420_v38 = vrot.slane %v406_v33, %v316_v8 }
  0xe5   : > { %v440_v39 = vadd.f32 %v437_v31, %v421_v36  ;;  %444 = vst.msk [vmem:[%s298_s16] sm:$0x3] %vm443_vm2, %v439_v37  ;;  %v422_v40 = vcombine.high %v420_v38, %v420_v38  ;;  %v441_v41 = vadd.f32 %v438_v35, %v420_v38 }
  0xe7   : > { %445 = vst.msk [vmem:[%s298_s16 + $0x2] sm:$0x3] %vm443_vm2, %v440_v39  ;;  %v442_v42 = vadd.f32 %v438_v35, %v422_v40  ;;  %446 = vst.msk [vmem:[%s298_s16 + $0x4] sm:$0x3] %vm443_vm2, %v441_v41 }
  0xe9   : > { %447 = vst.msk [vmem:[%s298_s16 + $0x6] sm:$0x3] %vm443_vm2, %v442_v42 }
  0xea PF: > { %s15_s20 = sadd.s32 1, %s637_s20   ;;  %s738_s18 = smov %s633_s19 }
  0xeb   : > { %p12_p5 = scmp.ge.s32.totalorder %s15_s20, 4   ;;  %s739_s19 = smov %s741_s21 }
  0xed   :  { %14 = sbr.rel (!%p12_p5) target bundleno = 2 (0x2), region = 73 }

// kernel: db_head_forward.10
= control target key start
LH: loop header
LB: loop body
LE: loop exit
PB: predicated region body
PF: predicated region fallthrough
CT: control target
= control target key end

     0   :  { %s691_s18 = smov 0   ;;  %s693_s19 = smov 0   ;;  %s766_s0 = inlined_call_operand.vmem [shape: f32[2,8,4,16], index: 0, kind: input, shape index: {}]   ;;  %s767_s1 = inlined_call_operand.vmem [shape: f32[2,4,4,32], index: 1, kind: input, shape index: {}]   ;;  %s768_s2 = inlined_call_operand.vmem [shape: bf16[16,64], index: 2, kind: input, shape index: {}]   ;;  %s769_s3 = inlined_call_operand.vmem [shape: f32[1,64], index: 3, kind: input, shape index: {}]   ;;  %s770_s4 = inlined_call_operand.vmem [shape: f32[1,64], index: 4, kind: input, shape index: {}]   ;;  %s771_s5 = inlined_call_operand.vmem [shape: f32[2,8,4,64], index: 5, kind: output, shape index: {}]  }
   0x1   :  { %s695_s20 = smov 0  }
   0x2 LB: > { %s27_s21 = sadd.s32 1, %s654_s19  ;;  %p580_p0 = scmp.ge.s32.totalorder %s658_s20, 1  ;;  %s658_s20 = sphi %s695_s20, %s15_s20   ;;  %s654_s19 = sphi %s693_s19, %s773_s19   ;;  %s650_s18 = sphi %s691_s18, %s772_s18  }
   0x3   : > { %p29_p1 = scmp.ge.s32.totalorder %s27_s21, 2  ;;  %p225_p2 = scmp.lt.s32.totalorder %s658_s20, 3 }
   0x5   : > { %s775_s21 = smov (%p29_p1, %s27_s21), 0  ;;  %p226_p3 = pnand %p580_p0, %p225_p2 }
   0x6   : > { %p271_p4 = scmp.lt.s32.totalorder (!%p226_p3), %s650_s18, 1  ;;  %s660_s7 = smov (!%p226_p3), 32  }
   0x7   : > { %229 = sbr.rel (%p226_p3) target bundleno = 230 (0xe6), region = 40 }
   0xc   : > { %v631_v0 = vld [vmem:[%s768_s2] sm:$0xff]   ;;  %s777_s18 = smov (!%p271_p4, %s650_s18), 1  ;;  %vm335_vm0 = vcmask 130048   ;;  %vm449_vm1 = vcmask 261120   ;;  %vm462_vm2 = vcmask 519168  }
   0xd   : > { %600 = vmatprep.subr.bf16.mxu0 %v631_v0  ;;  %s594_s24 = sshll.u32 %s777_s18, 5  ;;  %s595_s25 = sshll.u32 %s777_s18, 4  ;;  %v590_v11 = vld [vmem:[%s769_s3] ss:$0 sm:$0xff] }
   0xe   : > { %601 = vmatpush3.bf16.msra.mxu0 %v631_v0  ;;  %s278_s28 = scalar_lea.vmem %s766_s0, %s594_s24  ;;  %s288_s6 = scalar_lea.vmem %s767_s1, %s595_s25  ;;  %v591_v14 = vld [vmem:[%s770_s4] ss:$0 sm:$0xff] }
   0xf   : > { %v632_v1 = vld [vmem:[%s278_s28] sm:$0xff]   ;;  %v633_v2 = vld [vmem:[%s278_s28 + $0x8] sm:$0xff]   ;;  %v634_v4 = vld [vmem:[%s278_s28 + $0x10] sm:$0xff]   ;;  %s736_s14 = scalar_lea.vmem %s771_s5, %s594_s24 }
  0x10   : > { %v325_v3 = vpack.c.bf16 %v633_v2, %v632_v1  ;;  %v635_v5 = vld [vmem:[%s278_s28 + $0x18] sm:$0xff]   ;;  %v431_v6 = vld [vmem:[%s288_s6 + $0x8] sm:$0xf]  ;;  %v429_v7 = vld [vmem:[%s288_s6] sm:$0xf] }
  0x11   : > { %v326_v8 = vpack.c.bf16 %v635_v5, %v634_v4  ;;  %441 = vrot.lane.b32.xlu1 %v431_v6, %s660_s7  ;;  %437 = vrot.lane.b32.xlu0 %v429_v7, %s660_s7  ;;  %v432_v9 = vld [vmem:[%s288_s6 + $0xc] sm:$0xf]  ;;  %v430_v10 = vld [vmem:[%s288_s6 + $0x4] sm:$0xf] }
  0x12   : > { %602 = vmatprep.mubr.msk.bf16.mxu0 %vm335_vm0, %v325_v3 }
  0x13   : > { %603 = vmatmul.mubr.msk.bf16.vlgmr.msra.gmra.mxu0 %vm335_vm0, %v326_v8 }
  0x15   : > { %443 = vrot.lane.b32.xlu1 %v432_v9, %s660_s7  ;;  %439 = vrot.lane.b32.xlu0 %v430_v10, %s660_s7 }
  0x83   : > { %v442_v12 = vpop.permute.xlu1 %441  ;;  %v438_v17 = vpop.permute.xlu0 %437 }
  0x84   : > { %v452_v21 = vsel %vm449_vm1, %v431_v6, %v442_v12  ;;  %v450_v27 = vsel %vm449_vm1, %v429_v7, %v438_v17 }
  0x87   : > { %v444_v25 = vpop.permute.xlu1 %443  ;;  %v440_v34 = vpop.permute.xlu0 %439 }
  0x88   : > { %v453_v33 = vsel %vm449_vm1, %v432_v9, %v444_v25  ;;  %v451_v43 = vsel %vm449_vm1, %v430_v10, %v440_v34 }
  0xd3   : > { %v604_v13 = vpop.f32.mrf.mxu0 }
  0xd4   : > { %v400_v15 = vmul.f32 %v604_v13, %v590_v11 }
  0xd5   : > { %v376_v16 = vpop.f32.mrf.mxu0 }
  0xd6   : > { %v411_v18 = vadd.f32 %v591_v14, %v400_v15  ;;  %v398_v19 = vmul.f32 %v590_v11, %v376_v16 }
  0xd7   : > { %v605_v20 = vpop.f32.mrf.mxu0 }
  0xd8   : > { %v415_v22 = vmax.f32 %v411_v18, 0.0  ;;  %v409_v23 = vadd.f32 %v591_v14, %v398_v19  ;;  %v401_v24 = vmul.f32 %v605_v20, %v590_v11 }
  0xd9   : > { %v379_v26 = vpop.f32.mrf.mxu0 }
  0xda   : > { %v413_v28 = vmax.f32 %v409_v23, 0.0  ;;  %v412_v29 = vadd.f32 %v591_v14, %v401_v24  ;;  %v423_v30 = vcombine.high %v415_v22, %v415_v22  ;;  %v458_v31 = vadd.f32 %v452_v21, %v415_v22 }
  0xdb   : > { %v399_v32 = vmul.f32 %v590_v11, %v379_v26 }
  0xdc   : > { %v416_v35 = vmax.f32 %v412_v29, 0.0  ;;  %v459_v36 = vadd.f32 %v452_v21, %v423_v30  ;;  %467 = vst.msk [vmem:[%s736_s14 + $0x10] sm:$0xf] %vm462_vm2, %v458_v31  ;;  %v421_v37 = vcombine.high %v413_v28, %v413_v28  ;;  %v454_v38 = vadd.f32 %v450_v27, %v413_v28 }
  0xdd   : > { %v410_v39 = vadd.f32 %v591_v14, %v399_v32 }
  0xde   : > { %468 = vst.msk [vmem:[%s736_s14 + $0x14] sm:$0xf] %vm462_vm2, %v459_v36  ;;  %v455_v40 = vadd.f32 %v450_v27, %v421_v37  ;;  %463 = vst.msk [vmem:[%s736_s14] sm:$0xf] %vm462_vm2, %v454_v38  ;;  %v424_v41 = vcombine.high %v416_v35, %v416_v35  ;;  %v460_v42 = vadd.f32 %v453_v33, %v416_v35 }
  0xdf   : > { %v414_v44 = vmax.f32 %v410_v39, 0.0 }
  0xe0   : > { %464 = vst.msk [vmem:[%s736_s14 + $0x4] sm:$0xf] %vm462_vm2, %v455_v40  ;;  %v461_v45 = vadd.f32 %v453_v33, %v424_v41  ;;  %469 = vst.msk [vmem:[%s736_s14 + $0x18] sm:$0xf] %vm462_vm2, %v460_v42 }
  0xe1   : > { %v422_v46 = vcombine.high %v414_v44, %v414_v44  ;;  %v456_v47 = vadd.f32 %v451_v43, %v414_v44 }
  0xe2   : > { %470 = vst.msk [vmem:[%s736_s14 + $0x1c] sm:$0xf] %vm462_vm2, %v461_v45 }
  0xe3   : > { %v457_v48 = vadd.f32 %v451_v43, %v422_v46  ;;  %465 = vst.msk [vmem:[%s736_s14 + $0x8] sm:$0xf] %vm462_vm2, %v456_v47 }
  0xe5   : > { %466 = vst.msk [vmem:[%s736_s14 + $0xc] sm:$0xf] %vm462_vm2, %v457_v48 }
  0xe6 PF: > { %s15_s20 = sadd.s32 1, %s658_s20   ;;  %s772_s18 = smov %s654_s19 }
  0xe7   : > { %p12_p5 = scmp.ge.s32.totalorder %s15_s20, 4   ;;  %s773_s19 = smov %s775_s21 }
  0xe9   :  { %14 = sbr.rel (!%p12_p5) target bundleno = 2 (0x2), region = 73 }

// kernel: db_head_forward.11
= control target key start
LH: loop header
LB: loop body
LE: loop exit
PB: predicated region body
PF: predicated region fallthrough
CT: control target
= control target key end

     0   :  { %s838_s18 = smov 0   ;;  %s840_s19 = smov 0   ;;  %s1021_s0 = inlined_call_operand.vmem [shape: f32[2,16,8,8], index: 0, kind: input, shape index: {}]   ;;  %s1022_s1 = inlined_call_operand.vmem [shape: f32[2,8,8,32], index: 1, kind: input, shape index: {}]   ;;  %s1023_s2 = inlined_call_operand.vmem [shape: bf16[8,64], index: 2, kind: input, shape index: {}]   ;;  %s1024_s3 = inlined_call_operand.vmem [shape: f32[1,64], index: 3, kind: input, shape index: {}]   ;;  %s1025_s4 = inlined_call_operand.vmem [shape: f32[1,64], index: 4, kind: input, shape index: {}]   ;;  %s1026_s5 = inlined_call_operand.vmem [shape: f32[2,16,8,64], index: 5, kind: output, shape index: {}]  }
   0x1   :  { %s842_s20 = smov 0  }
   0x2 LB: > { %s27_s21 = sadd.s32 1, %s801_s19  ;;  %p705_p0 = scmp.ge.s32.totalorder %s805_s20, 1  ;;  %s805_s20 = sphi %s842_s20, %s15_s20   ;;  %s801_s19 = sphi %s840_s19, %s1028_s19   ;;  %s797_s18 = sphi %s838_s18, %s1027_s18  }
   0x3   : > { %p29_p1 = scmp.ge.s32.totalorder %s27_s21, 2  ;;  %p225_p2 = scmp.lt.s32.totalorder %s805_s20, 3 }
   0x5   : > { %s1030_s21 = smov (%p29_p1, %s27_s21), 0  ;;  %p226_p3 = pnand %p705_p0, %p225_p2 }
   0x6   : > { %p271_p4 = scmp.lt.s32.totalorder (!%p226_p3), %s797_s18, 1  ;;  %s807_s7 = smov (!%p226_p3), 32  }
   0x7   : > { %229 = sbr.rel (%p226_p3) target bundleno = 236 (0xec), region = 40 }
   0xc   : > { %v325_v0 = vld [vmem:[%s1023_s2] sm:$0xf]  ;;  %vm351_vm0 = vcmask 1043456   ;;  %s1032_s18 = smov (!%p271_p4, %s797_s18), 1  ;;  %vm326_vm1 = vcmask 64512   ;;  %vm554_vm2 = vcmask 261120  }
   0xd   : > { %756 = vmatprep.subr.msk.bf16.mxu0 %vm351_vm0, %v325_v0  ;;  %757 = vmatprep.subr.msk.bf16.mxu1 %vm351_vm0, %v325_v0  ;;  %v353_v1 = vsel %vm351_vm0, %v325_v0, 0  ;;  %s724_s24 = sshll.u32 %s1032_s18, 7  ;;  %s725_s28 = sshll.u32 %s1032_s18, 6  ;;  %v910_v38 = vld [vmem:[%s1024_s3] ss:$0 sm:$0xff]  ;;  %vm579_vm3 = vcmask 523264  }
   0xe   : > { %737 = vmatpush3.bf16.msra.mxu0 %v353_v1  ;;  %755 = vmatpush3.bf16.msra.mxu1 %v353_v1  ;;  %s867_s27 = scalar_lea.vmem %s1021_s0, %s724_s24  ;;  %s882_s6 = scalar_lea.vmem %s1022_s1, %s725_s28  ;;  %v915_v42 = vld [vmem:[%s1025_s4] ss:$0 sm:$0xff] }
   0xf   : > { %v301_v2 = vld [vmem:[%s867_s27] sm:$0xff]  ;;  %v302_v3 = vld [vmem:[%s867_s27 + $0x8] sm:$0xff]  ;;  %v303_v7 = vld [vmem:[%s867_s27 + $0x10] sm:$0xff]  ;;  %s943_s14 = scalar_lea.vmem %s1026_s5, %s724_s24 }
  0x10   : > { %v309_v4 = vld [vmem:[%s867_s27 + $0x40] sm:$0xff]  ;;  %v317_v5 = vpack.c.bf16 %v302_v3, %v301_v2  ;;  %v310_v6 = vld [vmem:[%s867_s27 + $0x48] sm:$0xff]  ;;  %v304_v8 = vld [vmem:[%s867_s27 + $0x18] sm:$0xff] }
  0x11   : > { %v321_v9 = vpack.c.bf16 %v310_v6, %v309_v4  ;;  %v318_v10 = vpack.c.bf16 %v304_v8, %v303_v7  ;;  %v311_v11 = vld [vmem:[%s867_s27 + $0x50] sm:$0xff]  ;;  %v312_v12 = vld [vmem:[%s867_s27 + $0x58] sm:$0xff]  ;;  %v305_v13 = vld [vmem:[%s867_s27 + $0x20] sm:$0xff] }
  0x12   : > { %738 = vmatprep.mubr.msk.bf16.mxu0 %vm326_vm1, %v317_v5  ;;  %v322_v14 = vpack.c.bf16 %v312_v12, %v311_v11  ;;  %v306_v15 = vld [vmem:[%s867_s27 + $0x28] sm:$0xff]  ;;  %v313_v16 = vld [vmem:[%s867_s27 + $0x60] sm:$0xff]  ;;  %v307_v20 = vld [vmem:[%s867_s27 + $0x30] sm:$0xff] }
  0x13   : > { %v314_v17 = vld [vmem:[%s867_s27 + $0x68] sm:$0xff]  ;;  %746 = vmatprep.mubr.msk.bf16.mxu1 %vm326_vm1, %v321_v9  ;;  %739 = vmatmul.mubr.msk.bf16.vlgmr.msra.gmra.mxu0 %vm326_vm1, %v318_v10  ;;  %v319_v18 = vpack.c.bf16 %v306_v15, %v305_v13  ;;  %v308_v21 = vld [vmem:[%s867_s27 + $0x38] sm:$0xff]  ;;  %v516_v22 = vld [vmem:[%s882_s6 + $0x10] sm:$0xff] }
  0x14   : > { %v323_v19 = vpack.c.bf16 %v314_v17, %v313_v16  ;;  %747 = vmatmul.mubr.msk.bf16.vlgmr.msra.gmra.mxu1 %vm326_vm1, %v322_v14  ;;  %v514_v23 = vld [vmem:[%s882_s6] sm:$0xff]  ;;  %v315_v24 = vld [vmem:[%s867_s27 + $0x70] sm:$0xff]  ;;  %v316_v25 = vld [vmem:[%s867_s27 + $0x78] sm:$0xff]  ;;  %534 = vrot.lane.b32.xlu1 %v516_v22, %s807_s7  ;;  %v320_v26 = vpack.c.bf16 %v308_v21, %v307_v20 }
  0x15   : > { %742 = vmatprep.mubr.msk.bf16.mxu0 %vm326_vm1, %v319_v18  ;;  %530 = vrot.lane.b32.xlu0 %v514_v23, %s807_s7  ;;  %v517_v27 = vld [vmem:[%s882_s6 + $0x18] sm:$0xff]  ;;  %v515_v28 = vld [vmem:[%s882_s6 + $0x8] sm:$0xff]  ;;  %v324_v29 = vpack.c.bf16 %v316_v25, %v315_v24  ;;  %v518_v31 = vld [vmem:[%s882_s6 + $0x20] sm:$0xff] }
  0x16   : > { %750 = vmatprep.mubr.msk.bf16.mxu1 %vm326_vm1, %v323_v19  ;;  %v519_v30 = vld [vmem:[%s882_s6 + $0x28] sm:$0xff]  ;;  %v521_v32 = vld [vmem:[%s882_s6 + $0x38] sm:$0xff]  ;;  %v520_v33 = vld [vmem:[%s882_s6 + $0x30] sm:$0xff] }
  0x18   : > { %536 = vrot.lane.b32.xlu1 %v517_v27, %s807_s7 }
  0x19   : > { %532 = vrot.lane.b32.xlu0 %v515_v28, %s807_s7 }
  0x1b   : > { %743 = vmatmul.mubr.msk.bf16.gmra.mxu0 %vm326_vm1, %v320_v26 }
  0x1c   : > { %751 = vmatmul.mubr.msk.bf16.gmra.mxu1 %vm326_vm1, %v324_v29  ;;  %540 = vrot.lane.b32.xlu1 %v519_v30, %s807_s7 }
  0x1d   : > { %538 = vrot.lane.b32.xlu0 %v518_v31, %s807_s7 }
  0x20   : > { %544 = vrot.lane.b32.xlu1 %v521_v32, %s807_s7 }
  0x21   : > { %542 = vrot.lane.b32.xlu0 %v520_v33, %s807_s7 }
  0x86   : > { %v535_v34 = vpop.permute.xlu1 %534 }
  0x87   : > { %v531_v35 = vpop.permute.xlu0 %530  ;;  %v919_v45 = vsel %vm554_vm2, %v516_v22, %v535_v34 }
  0x88   : > { %v555_v46 = vsel %vm554_vm2, %v514_v23, %v531_v35 }
  0x8a   : > { %v537_v36 = vpop.permute.xlu1 %536 }
  0x8b   : > { %v533_v37 = vpop.permute.xlu0 %532  ;;  %v925_v51 = vsel %vm554_vm2, %v517_v27, %v537_v36 }
  0x8c   : > { %v556_v54 = vsel %vm554_vm2, %v515_v28, %v533_v37 }
  0x8e   : > { %v541_v39 = vpop.permute.xlu1 %540 }
  0x8f   : > { %v539_v40 = vpop.permute.xlu0 %538  ;;  %v560_v59 = vsel %vm554_vm2, %v519_v30, %v541_v39 }
  0x90   : > { %v559_v60 = vsel %vm554_vm2, %v518_v31, %v539_v40 }
  0x92   : > { %v545_v49 = vpop.permute.xlu1 %544 }
  0x93   : > { %v543_v55 = vpop.permute.xlu0 %542  ;;  %v936_v1 = vsel %vm554_vm2, %v521_v32, %v545_v49 }
  0x94   : > { %v948_v6 = vsel %vm554_vm2, %v520_v33, %v543_v55 }
  0xd3   : > { %v740_v41 = vpop.f32.mrf.mxu0 }
  0xd4   : > { %v461_v43 = vmul.f32 %v740_v41, %v910_v38  ;;  %v748_v44 = vpop.f32.mrf.mxu1 }
  0xd5   : > { %v469_v47 = vmul.f32 %v748_v44, %v910_v38  ;;  %v389_v48 = vpop.f32.mrf.mxu0 }
  0xd6   : > { %v484_v50 = vadd.f32 %v915_v42, %v461_v43  ;;  %v459_v52 = vmul.f32 %v910_v38, %v389_v48  ;;  %v421_v53 = vpop.f32.mrf.mxu1 }
  0xd7   : > { %v492_v56 = vadd.f32 %v915_v42, %v469_v47  ;;  %v467_v57 = vmul.f32 %v910_v38, %v421_v53  ;;  %v741_v58 = vpop.f32.mrf.mxu0 }
  0xd8   : > { %v500_v61 = vmax.f32 %v484_v50, 0.0  ;;  %v482_v62 = vadd.f32 %v915_v42, %v459_v52  ;;  %v462_v63 = vmul.f32 %v741_v58, %v910_v38  ;;  %v749_v0 = vpop.f32.mrf.mxu1 }
  0xd9   : > { %v508_v2 = vmax.f32 %v492_v56, 0.0  ;;  %v490_v3 = vadd.f32 %v915_v42, %v467_v57  ;;  %v470_v4 = vmul.f32 %v749_v0, %v910_v38  ;;  %v392_v5 = vpop.f32.mrf.mxu0 }
  0xda   : > { %v498_v7 = vmax.f32 %v482_v62, 0.0  ;;  %v565_v8 = vadd.f32 %v556_v54, %v500_v61  ;;  %v485_v9 = vadd.f32 %v915_v42, %v462_v63  ;;  %v460_v10 = vmul.f32 %v910_v38, %v392_v5  ;;  %v424_v11 = vpop.f32.mrf.mxu1 }
  0xdb   : > { %v506_v12 = vmax.f32 %v490_v3, 0.0  ;;  %v493_v13 = vadd.f32 %v915_v42, %v470_v4  ;;  %v573_v14 = vadd.f32 %v560_v59, %v508_v2  ;;  %v468_v15 = vmul.f32 %v910_v38, %v424_v11  ;;  %v744_v16 = vpop.f32.mrf.mxu0 }
  0xdc   : > { %v563_v17 = vadd.f32 %v555_v46, %v498_v7  ;;  %582 = vst.msk [vmem:[%s943_s14 + $0x10] sm:$0xff] %vm579_vm3, %v565_v8  ;;  %v501_v18 = vmax.f32 %v485_v9, 0.0  ;;  %v483_v19 = vadd.f32 %v915_v42, %v460_v10  ;;  %v465_v20 = vmul.f32 %v744_v16, %v910_v38  ;;  %v752_v21 = vpop.f32.mrf.mxu1 }
  0xdd   : > { %v509_v22 = vmax.f32 %v493_v13, 0.0  ;;  %590 = vst.msk [vmem:[%s943_s14 + $0x50] sm:$0xff] %vm579_vm3, %v573_v14  ;;  %v491_v23 = vadd.f32 %v915_v42, %v468_v15  ;;  %v571_v24 = vadd.f32 %v559_v60, %v506_v12  ;;  %v473_v25 = vmul.f32 %v752_v21, %v910_v38  ;;  %v405_v26 = vpop.f32.mrf.mxu0 }
  0xde   : > { %580 = vst.msk [vmem:[%s943_s14] sm:$0xff] %vm579_vm3, %v563_v17  ;;  %v566_v27 = vadd.f32 %v556_v54, %v501_v18  ;;  %v499_v28 = vmax.f32 %v483_v19, 0.0  ;;  %v488_v29 = vadd.f32 %v915_v42, %v465_v20  ;;  %v463_v30 = vmul.f32 %v910_v38, %v405_v26  ;;  %v437_v31 = vpop.f32.mrf.mxu1 }
  0xdf   : > { %v574_v32 = vadd.f32 %v560_v59, %v509_v22  ;;  %v507_v33 = vmax.f32 %v491_v23, 0.0  ;;  %588 = vst.msk [vmem:[%s943_s14 + $0x40] sm:$0xff] %vm579_vm3, %v571_v24  ;;  %v496_v34 = vadd.f32 %v915_v42, %v473_v25  ;;  %v471_v35 = vmul.f32 %v910_v38, %v437_v31  ;;  %v745_v36 = vpop.f32.mrf.mxu0 }
  0xe0   : > { %583 = vst.msk [vmem:[%s943_s14 + $0x18] sm:$0xff] %vm579_vm3, %v566_v27  ;;  %v564_v37 = vadd.f32 %v555_v46, %v499_v28  ;;  %v504_v39 = vmax.f32 %v488_v29, 0.0  ;;  %v486_v40 = vadd.f32 %v915_v42, %v463_v30  ;;  %v466_v41 = vmul.f32 %v745_v36, %v910_v38  ;;  %v753_v43 = vpop.f32.mrf.mxu1 }
  0xe1   : > { %591 = vst.msk [vmem:[%s943_s14 + $0x58] sm:$0xff] %vm579_vm3, %v574_v32  ;;  %v572_v44 = vadd.f32 %v559_v60, %v507_v33  ;;  %v512_v47 = vmax.f32 %v496_v34, 0.0  ;;  %v494_v48 = vadd.f32 %v915_v42, %v471_v35  ;;  %v474_v49 = vmul.f32 %v753_v43, %v910_v38  ;;  %v408_v50 = vpop.f32.mrf.mxu0 }
  0xe2   : > { %581 = vst.msk [vmem:[%s943_s14 + $0x8] sm:$0xff] %vm579_vm3, %v564_v37  ;;  %v569_v46 = vadd.f32 %v925_v51, %v504_v39  ;;  %v502_v52 = vmax.f32 %v486_v40, 0.0  ;;  %v489_v53 = vadd.f32 %v915_v42, %v466_v41  ;;  %v464_v54 = vmul.f32 %v910_v38, %v408_v50  ;;  %v440_v55 = vpop.f32.mrf.mxu1 }
  0xe3   : > { %589 = vst.msk [vmem:[%s943_s14 + $0x48] sm:$0xff] %vm579_vm3, %v572_v44  ;;  %v510_v56 = vmax.f32 %v494_v48, 0.0  ;;  %v497_v57 = vadd.f32 %v915_v42, %v474_v49  ;;  %v577_v58 = vadd.f32 %v936_v1, %v512_v47  ;;  %v472_v59 = vmul.f32 %v910_v38, %v440_v55 }
  0xe4   : > { %586 = vst.msk [vmem:[%s943_s14 + $0x30] sm:$0xff] %vm579_vm3, %v569_v46  ;;  %v567_v60 = vadd.f32 %v919_v45, %v502_v52  ;;  %v505_v61 = vmax.f32 %v489_v53, 0.0  ;;  %v487_v62 = vadd.f32 %v915_v42, %v464_v54 }
  0xe5   : > { %v513_v63 = vmax.f32 %v497_v57, 0.0  ;;  %594 = vst.msk [vmem:[%s943_s14 + $0x70] sm:$0xff] %vm579_vm3, %v577_v58  ;;  %v495_v0 = vadd.f32 %v915_v42, %v472_v59  ;;  %v575_v2 = vadd.f32 %v948_v6, %v510_v56 }
  0xe6   : > { %584 = vst.msk [vmem:[%s943_s14 + $0x20] sm:$0xff] %vm579_vm3, %v567_v60  ;;  %v570_v38 = vadd.f32 %v925_v51, %v505_v61  ;;  %v503_v3 = vmax.f32 %v487_v62, 0.0 }
  0xe7   : > { %v578_v4 = vadd.f32 %v936_v1, %v513_v63  ;;  %v511_v5 = vmax.f32 %v495_v0, 0.0  ;;  %592 = vst.msk [vmem:[%s943_s14 + $0x60] sm:$0xff] %vm579_vm3, %v575_v2 }
  0xe8   : > { %587 = vst.msk [vmem:[%s943_s14 + $0x38] sm:$0xff] %vm579_vm3, %v570_v38  ;;  %v568_v7 = vadd.f32 %v919_v45, %v503_v3 }
  0xe9   : > { %595 = vst.msk [vmem:[%s943_s14 + $0x78] sm:$0xff] %vm579_vm3, %v578_v4  ;;  %v576_v42 = vadd.f32 %v948_v6, %v511_v5 }
  0xea   : > { %585 = vst.msk [vmem:[%s943_s14 + $0x28] sm:$0xff] %vm579_vm3, %v568_v7 }
  0xeb   : > { %593 = vst.msk [vmem:[%s943_s14 + $0x68] sm:$0xff] %vm579_vm3, %v576_v42 }
  0xec PF: > { %s15_s20 = sadd.s32 1, %s805_s20   ;;  %s1027_s18 = smov %s801_s19 }
  0xed   : > { %p12_p5 = scmp.ge.s32.totalorder %s15_s20, 4   ;;  %s1028_s19 = smov %s1030_s21 }
  0xef   :  { %14 = sbr.rel (!%p12_p5) target bundleno = 2 (0x2), region = 73 }

// kernel: db_head_forward.13
= control target key start
LH: loop header
LB: loop body
LE: loop exit
PB: predicated region body
PF: predicated region fallthrough
CT: control target
= control target key end

     0   :  { %s893_s15 = smov 0   ;;  %s1124_s0 = inlined_call_operand.vmem [shape: f32[2,4,4,32], index: 0, kind: input, shape index: {}]   ;;  %s1125_s1 = inlined_call_operand.vmem [shape: bf16[288,8], index: 1, kind: input, shape index: {}]   ;;  %s1126_s2 = inlined_call_operand.vmem [shape: f32[1,8], index: 2, kind: input, shape index: {}]   ;;  %s1127_s3 = inlined_call_operand.vmem [shape: f32[1,8], index: 3, kind: input, shape index: {}]   ;;  %s1128_s4 = inlined_call_operand.vmem [shape: f32[2,16,4,32], index: 4, kind: output, shape index: {}]  }
   0x1 LB: > { %s747_s16 = sadd.s32 4294967295, %s858_s15   ;;  %p751_p0 = scmp.ge.s32.totalorder %s858_s15, 1  ;;  %s858_s15 = sphi %s893_s15, %s14_s15  }
   0x2   : > { %p162_p1 = scmp.lt.s32.totalorder %s858_s15, 3 }
   0x4   : > { %p163_p2 = pnand %p751_p0, %p162_p1 }
   0x5   : > { %p188_p3 = scmp.lt.s32.totalorder (!%p163_p2), %s747_s16, 1  ;;  %s861_s21 = smov (!%p163_p2), 32  }
   0x6   : > { %166 = sbr.rel (%p163_p2) target bundleno = 532 (0x214), region = 36  ;;  %s862_s22 = smov (!%p163_p2), 64  }
   0x7   : > { %s863_s30 = smov (!%p163_p2), 96   ;;  %s865_s14 = smov (!%p163_p2), 8  }
   0x8   : > { %s867_s18 = smov (!%p163_p2), 24  }
   0xb   : > { %vm199_vm0 = vcmask 259072   ;;  %v860_v0 = vmov 0.0   ;;  %s1130_s16 = smov (!%p188_p3, %s747_s16), 1  ;;  %vm211_vm1 = vcmask 257024   ;;  %v834_v13 = vld [vmem:[%s1125_s1 + $0x78] sm:$0xff]   ;;  %v836_v17 = vld [vmem:[%s1125_s1 + $0x70] sm:$0xff]  }
   0xc   : > { %200 = vst.msk [vmem:[#allocation2] sm:$0x3f] %vm199_vm0, %v860_v0  ;;  %201 = vst.msk [vmem:[#allocation2 + $0x8] sm:$0x3f] %vm199_vm0, %v860_v0  ;;  %810 = vmatprep.subr.bf16.mxu1 %v860_v0  ;;  %s783_s17 = sshll.u32 %s1130_s16, 4  ;;  %v835_v14 = vld [vmem:[%s1125_s1 + $0x38] sm:$0xff]   ;;  %785 = vmatprep.subr.bf16.mxu0 %v834_v13 }
   0xd   : > { %202 = vst.msk [vmem:[#allocation2 + $0x10] sm:$0x3f] %vm199_vm0, %v860_v0  ;;  %203 = vst.msk [vmem:[#allocation2 + $0x18] sm:$0x3f] %vm199_vm0, %v860_v0  ;;  %s192_s20 = scalar_lea.vmem %s1124_s0, %s783_s17  ;;  %786 = vmatpush3.bf16.msra.mxu0 %v835_v14  ;;  %v837_v18 = vld [vmem:[%s1125_s1 + $0x30] sm:$0xff]   ;;  %v838_v21 = vld [vmem:[%s1125_s1 + $0x68] sm:$0xff]  }
   0xe   : > { %204 = vst.msk [vmem:[#allocation2 + $0x20] sm:$0x3f] %vm199_vm0, %v860_v0  ;;  %205 = vst.msk [vmem:[#allocation2 + $0x28] sm:$0x3f] %vm199_vm0, %v860_v0  ;;  %v208_v1 = vld [vmem:[%s192_s20 + $0x8] sm:$0xf]  ;;  %787 = vmatprep.subr.bf16.mxu0 %v836_v17 }
   0xf   : > { %v207_v2 = vld [vmem:[%s192_s20 + $0x4] sm:$0xf]  ;;  %v206_v3 = vld [vmem:[%s192_s20] sm:$0xf]  ;;  %214 = vst.msk [vmem:[#allocation2 + $0x19] sm:$0xf] %vm211_vm1, %v208_v1 }
  0x10   : > { %213 = vst.msk [vmem:[#allocation2 + $0x11] sm:$0xf] %vm211_vm1, %v207_v2  ;;  %212 = vst.msk [vmem:[#allocation2 + $0x9] sm:$0xf] %vm211_vm1, %v206_v3  ;;  %v209_v4 = vld [vmem:[%s192_s20 + $0xc] sm:$0xf] }
  0x11   : > { %215 = vst.msk [vmem:[#allocation2 + $0x21] sm:$0xf] %vm211_vm1, %v209_v4  ;;  %788 = vmatpush3.bf16.msra.mxu0 %v837_v18  ;;  %v839_v22 = vld [vmem:[%s1125_s1 + $0x28] sm:$0xff]   ;;  %v840_v24 = vld [vmem:[%s1125_s1 + $0x60] sm:$0xff]   ;;  %v842_v28 = vld [vmem:[%s1125_s1 + $0x58] sm:$0xff]   ;;  %vm316_vm2 = vcmask 261120  }
  0x12   : > { %789 = vmatprep.subr.bf16.mxu0 %v838_v21  ;;  %v841_v25 = vld [vmem:[%s1125_s1 + $0x20] sm:$0xff]   ;;  %v843_v29 = vld [vmem:[%s1125_s1 + $0x18] sm:$0xff]   ;;  %v844_v30 = vld [vmem:[%s1125_s1 + $0x50] sm:$0xff]   ;;  %vm864_vm3 = vmmov 0   ;;  %vm321_vm4 = vcmask 523264   ;;  %vm326_vm5 = vcmask 785408  }
  0x13   : > { %v917_v5 = vld [vmem:[#allocation2] sm:$0x3f]  ;;  %v845_v31 = vld [vmem:[%s1125_s1 + $0x10] sm:$0xff]   ;;  %v846_v33 = vld [vmem:[%s1125_s1 + $0x88] sm:$0xff]   ;;  %814 = vmatprep.mubr.msk.bf16.mxu1 %vm864_vm3, %v860_v0  ;;  %s866_s17 = smov 16   ;;  %s784_s19 = sshll.u32 %s1130_s16, 6 }
  0x14   : > { %v226_v6 = vrot.slane %v917_v5, 1  ;;  %v242_v26 = vrot.slane %v917_v5, 2  ;;  %v847_v34 = vld [vmem:[%s1125_s1 + $0x48] sm:$0xff]   ;;  %811 = vmatpush3.bf16.msra.mxu1 %v846_v33  ;;  %v849_v39 = vld [vmem:[%s1125_s1 + $0x80] sm:$0xff]   ;;  %vm661_vm6 = vcmask 64512   ;;  %vm666_vm7 = vcmask 130048   ;;  %s1075_s23 = scalar_lea.vmem %s1128_s4, %s784_s19 }
  0x15   : > { %790 = vmatpush3.bf16.msra.mxu0 %v839_v22  ;;  %v221_v27 = vld [vmem:[#allocation2 + $0x28] sm:$0x3f]  ;;  %812 = vmatprep.subr.bf16.mxu1 %v860_v0  ;;  %v850_v40 = vld [vmem:[%s1125_s1 + $0x40] sm:$0xff]   ;;  %vm671_vm8 = vcmask 195584  }
  0x16   : > { %230 = vrot.lane.b32.xlu0 %v226_v6, %s861_s21  ;;  %v922_v7 = vld [vmem:[#allocation2 + $0x18] sm:$0x3f]  ;;  %791 = vmatprep.subr.bf16.mxu0 %v840_v24  ;;  %v315_v32 = vrot.slane %v221_v27, 2  ;;  %v848_v35 = vld [vmem:[%s1125_s1 + $0x8] sm:$0xff]   ;;  %v851_v41 = vld [vmem:[%s1125_s1] sm:$0xff]   ;;  %v302_v42 = vrot.slane %v221_v27, 1 }
  0x17   : > { %v924_v8 = vld [vmem:[#allocation2 + $0x10] sm:$0x3f]  ;;  %v926_v9 = vld [vmem:[#allocation2 + $0x8] sm:$0x3f]  ;;  %292 = vrot.lane.b32.xlu1 %v922_v7, %s862_s22  ;;  %v933_v10 = vrot.slane %v922_v7, 2  ;;  %v973_v23 = vrot.slane %v922_v7, 1 }
  0x18   : > { %v243_v11 = vrot.slane %v926_v9, 2  ;;  %v936_v12 = vld [vmem:[#allocation2 + $0x20] sm:$0x3f]  ;;  %v244_v16 = vrot.slane %v924_v8, 2  ;;  %v958_v19 = vrot.slane %v924_v8, 1  ;;  %v227_v20 = vrot.slane %v926_v9, 1  ;;  %813 = vmatpush3.bf16.msra.mxu1 %v849_v39 }
  0x19   : > { %v276_v15 = vrot.slane %v936_v12, 2  ;;  %792 = vmatpush3.bf16.msra.mxu0 %v841_v25  ;;  %v271_v38 = vrot.slane %v936_v12, 1 }
  0x1a   : > { %290 = vrot.lane.b32.xlu0 %v924_v8, %s862_s22  ;;  %793 = vmatprep.subr.bf16.mxu0 %v842_v28  ;;  %v357_v36 = vcombine.low %v244_v16, %v933_v10 }
  0x1b   : > { %281 = vrot.lane.b32.xlu1 %v933_v10, %s861_s21  ;;  %v360_v37 = vcombine.low %v276_v15, %v315_v32 }
  0x1d   : > { %794 = vmatpush3.bf16.msra.mxu0 %v843_v29  ;;  %v369_v43 = vpack.c.bf16 %v360_v37, %v357_v36 }
  0x1e   : > { %277 = vrot.lane.b32.xlu0 %v243_v11, %s861_s21  ;;  %795 = vmatprep.subr.bf16.mxu0 %v844_v30 }
  0x1f   : > { %283 = vrot.lane.b32.xlu1 %v276_v15, %s861_s21  ;;  %815 = vmatmul.mubr.msk.bf16.vlgmr.msra.gmra.mxu1 %vm316_vm2, %v369_v43 }
  0x21   : > { %796 = vmatpush3.bf16.msra.mxu0 %v845_v31 }
  0x22   : > { %279 = vrot.lane.b32.xlu0 %v244_v16, %s861_s21  ;;  %797 = vmatprep.subr.bf16.mxu0 %v847_v34 }
  0x23   : > { %232 = vrot.lane.b32.xlu1 %v227_v20, %s861_s21 }
  0x25   : > { %798 = vmatpush3.bf16.msra.mxu0 %v848_v35 }
  0x26   : > { %234 = vrot.lane.b32.xlu0 %v958_v19, %s861_s21  ;;  %799 = vmatprep.subr.bf16.mxu0 %v850_v40 }
  0x27   : > { %236 = vrot.lane.b32.xlu1 %v973_v23, %s861_s21 }
  0x29   : > { %800 = vmatpush3.bf16.msra.mxu0 %v851_v41  ;;  %v779_v41 = vld [vmem:[%s1126_s2] ss:$0 sm:$0xff] }
  0x2a   : > { %294 = vrot.lane.b32.xlu0 %v936_v12, %s862_s22 }
  0x2b   : > { %296 = vrot.lane.b32.xlu1 %v221_v27, %s862_s22 }
  0x2e   : > { %246 = vrot.lane.b32.xlu0 %v242_v26, %s862_s22 }
  0x2f   : > { %248 = vrot.lane.b32.xlu1 %v243_v11, %s862_s22 }
  0x32   : > { %250 = vrot.lane.b32.xlu0 %v244_v16, %s862_s22 }
  0x33   : > { %252 = vrot.lane.b32.xlu1 %v933_v10, %s862_s22 }
  0x36   : > { %303 = vrot.lane.b32.xlu0 %v958_v19, %s863_s30 }
  0x37   : > { %305 = vrot.lane.b32.xlu1 %v973_v23, %s863_s30 }
  0x3a   : > { %307 = vrot.lane.b32.xlu0 %v271_v38, %s863_s30 }
  0x3b   : > { %309 = vrot.lane.b32.xlu1 %v302_v42, %s863_s30 }
  0x3e   : > { %259 = vrot.lane.b32.xlu0 %v926_v9, %s863_s30 }
  0x3f   : > { %261 = vrot.lane.b32.xlu1 %v924_v8, %s863_s30 }
  0x42   : > { %263 = vrot.lane.b32.xlu0 %v922_v7, %s863_s30 }
  0x43   : > { %265 = vrot.lane.b32.xlu1 %v936_v12, %s863_s30 }
  0x88   : > { %v231_v44 = vpop.permute.xlu0 %230 }
  0x89   : > { %v293_v45 = vpop.permute.xlu1 %292  ;;  %v317_v24 = vsel %vm316_vm2, %v917_v5, %v231_v44  ;;  %v780_v44 = vld [vmem:[%s1127_s3] ss:$0 sm:$0xff] }
  0x8c   : > { %v291_v46 = vpop.permute.xlu0 %290 }
  0x8d   : > { %v282_v47 = vpop.permute.xlu1 %281 }
  0x8e   : > { %v333_v2 = vsel %vm316_vm2, %v973_v23, %v282_v47 }
  0x90   : > { %v278_v48 = vpop.permute.xlu0 %277 }
  0x91   : > { %v284_v49 = vpop.permute.xlu1 %283  ;;  %v331_v0 = vsel %vm316_vm2, %v227_v20, %v278_v48 }
  0x92   : > { %v334_v3 = vsel %vm316_vm2, %v271_v38, %v284_v49  ;;  %v335_v11 = vsel %vm321_vm4, %v331_v0, %v291_v46 }
  0x94   : > { %v280_v50 = vpop.permute.xlu0 %279 }
  0x95   : > { %v233_v52 = vpop.permute.xlu1 %232  ;;  %v332_v61 = vsel %vm316_vm2, %v958_v19, %v280_v50 }
  0x96   : > { %v336_v1 = vsel %vm321_vm4, %v332_v61, %v293_v45  ;;  %v318_v21 = vsel %vm316_vm2, %v926_v9, %v233_v52 }
  0x98   : > { %v235_v51 = vpop.permute.xlu0 %234 }
  0x99   : > { %v237_v54 = vpop.permute.xlu1 %236  ;;  %v319_v25 = vsel %vm316_vm2, %v924_v8, %v235_v51 }
  0x9a   : > { %v320_v26 = vsel %vm316_vm2, %v922_v7, %v237_v54 }
  0x9c   : > { %v295_v53 = vpop.permute.xlu0 %294 }
  0x9d   : > { %v297_v56 = vpop.permute.xlu1 %296  ;;  %v337_v6 = vsel %vm321_vm4, %v333_v2, %v295_v53 }
  0x9e   : > { %v338_v10 = vsel %vm321_vm4, %v334_v3, %v297_v56 }
  0xa0   : > { %v247_v55 = vpop.permute.xlu0 %246 }
  0xa1   : > { %v249_v58 = vpop.permute.xlu1 %248  ;;  %v322_v28 = vsel %vm321_vm4, %v317_v24, %v247_v55 }
  0xa2   : > { %v323_v22 = vsel %vm321_vm4, %v318_v21, %v249_v58 }
  0xa4   : > { %v251_v57 = vpop.permute.xlu0 %250 }
  0xa5   : > { %v253_v60 = vpop.permute.xlu1 %252  ;;  %v324_v29 = vsel %vm321_vm4, %v319_v25, %v251_v57 }
  0xa6   : > { %v325_v9 = vsel %vm321_vm4, %v320_v26, %v253_v60 }
  0xa8   : > { %v304_v59 = vpop.permute.xlu0 %303 }
  0xa9   : > { %v306_v63 = vpop.permute.xlu1 %305  ;;  %v339_v14 = vsel %vm326_vm5, %v335_v11, %v304_v59 }
  0xaa   : > { %v340_v4 = vsel %vm326_vm5, %v336_v1, %v306_v63 }
  0xab   : > { %v757_v17 = vcombine.low %v339_v14, %v340_v4 }
  0xac   : > { %v308_v62 = vpop.permute.xlu0 %307 }
  0xad   : > { %v310_v13 = vpop.permute.xlu1 %309  ;;  %v341_v15 = vsel %vm326_vm5, %v337_v6, %v308_v62 }
  0xae   : > { %v342_v16 = vsel %vm326_vm5, %v338_v10, %v310_v13 }
  0xaf   : > { %v759_v18 = vcombine.low %v341_v15, %v342_v16 }
  0xb0   : > { %v260_v12 = vpop.permute.xlu0 %259 }
  0xb1   : > { %v262_v19 = vpop.permute.xlu1 %261  ;;  %v368_v20 = vpack.c.bf16 %v759_v18, %v757_v17  ;;  %v327_v31 = vsel %vm326_vm5, %v322_v28, %v260_v12 }
  0xb2   : > { %v328_v27 = vsel %vm326_vm5, %v323_v22, %v262_v19 }
  0xb3   : > { %549 = vmatprep.mubr.bf16.mxu0 %v368_v20  ;;  %v756_v33 = vcombine.low %v327_v31, %v328_v27 }
  0xb4   : > { %v264_v23 = vpop.permute.xlu0 %263 }
  0xb5   : > { %v266_v30 = vpop.permute.xlu1 %265  ;;  %v329_v32 = vsel %vm326_vm5, %v324_v29, %v264_v23 }
  0xb6   : > { %v330_v5 = vsel %vm326_vm5, %v325_v9, %v266_v30 }
  0xb7   : > { %v758_v8 = vcombine.low %v329_v32, %v330_v5 }
  0xb9   : > { %v367_v34 = vpack.c.bf16 %v758_v8, %v756_v33 }
  0xbb   : > { %550 = vmatmul.mubr.bf16.vlgmr.msra.gmra.mxu0 %v367_v34 }
  0xdf   : > { %v592_v7 = vpop.f32.mrf.mxu1 }
  0xe1   : > { %v816_v35 = vpop.f32.mrf.mxu1 }
  0xe3   : > { %v595_v36 = vpop.f32.mrf.mxu1 }
  0xe5   : > { %v817_v37 = vpop.f32.mrf.mxu1 }
 0x17b   : > { %v801_v38 = vpop.f32.mrf.mxu0 }
 0x17d   : > { %v802_v39 = vpop.f32.mrf.mxu0 }
 0x17e   : > { %v803_v40 = vadd.f32 %v802_v39, %v801_v38 }
 0x17f   : > { %v804_v42 = vpop.f32.mrf.mxu0 }
 0x180   : > { %v593_v43 = vadd.f32 %v803_v40, %v592_v7 }
 0x181   : > { %v805_v45 = vpop.f32.mrf.mxu0 }
 0x182   : > { %v606_v46 = vmul.f32 %v779_v41, %v593_v43  ;;  %v806_v47 = vadd.f32 %v805_v45, %v804_v42 }
 0x184   : > { %v615_v48 = vadd.f32 %v780_v44, %v606_v46  ;;  %v596_v49 = vadd.f32 %v806_v47, %v595_v36 }
 0x186   : > { %v617_v50 = vmax.f32 %v615_v48, 0.0  ;;  %v607_v51 = vmul.f32 %v779_v41, %v596_v49 }
 0x188   : > { %625 = vrot.lane.b32.xlu0 %v617_v50, %s865_s14  ;;  %v621_v52 = vcombine.high %v617_v50, %v617_v50  ;;  %v616_v53 = vadd.f32 %v780_v44, %v607_v51 }
 0x18a   : > { %627 = vrot.lane.b32.xlu1 %v621_v52, %s865_s14  ;;  %v618_v54 = vmax.f32 %v616_v53, 0.0 }
 0x18c   : > { %637 = vrot.lane.b32.xlu0 %v617_v50, %s866_s17  ;;  %v622_v55 = vcombine.high %v618_v54, %v618_v54 }
 0x18e   : > { %639 = vrot.lane.b32.xlu1 %v621_v52, %s866_s17 }
 0x190   : > { %649 = vrot.lane.b32.xlu0 %v617_v50, %s867_s18 }
 0x192   : > { %651 = vrot.lane.b32.xlu1 %v621_v52, %s867_s18 }
 0x194   : > { %629 = vrot.lane.b32.xlu0 %v618_v54, %s865_s14 }
 0x196   : > { %631 = vrot.lane.b32.xlu1 %v622_v55, %s865_s14 }
 0x198   : > { %641 = vrot.lane.b32.xlu0 %v618_v54, %s866_s17 }
 0x19a   : > { %643 = vrot.lane.b32.xlu1 %v622_v55, %s866_s17 }
 0x19c   : > { %653 = vrot.lane.b32.xlu0 %v618_v54, %s867_s18 }
 0x19e   : > { %655 = vrot.lane.b32.xlu1 %v622_v55, %s867_s18 }
 0x1fa   : > { %v626_v56 = vpop.permute.xlu0 %625 }
 0x1fb   : > { %v662_v60 = vsel %vm661_vm6, %v617_v50, %v626_v56 }
 0x1fc   : > { %v628_v57 = vpop.permute.xlu1 %627 }
 0x1fd   : > { %v663_v63 = vsel %vm661_vm6, %v621_v52, %v628_v57 }
 0x1fe   : > { %v638_v58 = vpop.permute.xlu0 %637 }
 0x1ff   : > { %v667_v61 = vsel %vm666_vm7, %v662_v60, %v638_v58 }
 0x200   : > { %v640_v59 = vpop.permute.xlu1 %639 }
 0x201   : > { %v668_v1 = vsel %vm666_vm7, %v663_v63, %v640_v59 }
 0x202   : > { %v650_v62 = vpop.permute.xlu0 %649 }
 0x203   : > { %v672_v0 = vsel %vm671_vm8, %v667_v61, %v650_v62 }
 0x204   : > { %676 = vst.msk [vmem:[%s1075_s23] sm:$0xf] %vm211_vm1, %v672_v0  ;;  %677 = vst.msk [vmem:[%s1075_s23 + $0x4] sm:$0xf] %vm211_vm1, %v672_v0  ;;  %v652_v2 = vpop.permute.xlu1 %651 }
 0x205   : > { %678 = vst.msk [vmem:[%s1075_s23 + $0x8] sm:$0xf] %vm211_vm1, %v672_v0  ;;  %679 = vst.msk [vmem:[%s1075_s23 + $0xc] sm:$0xf] %vm211_vm1, %v672_v0  ;;  %v673_v3 = vsel %vm671_vm8, %v668_v1, %v652_v2 }
 0x206   : > { %680 = vst.msk [vmem:[%s1075_s23 + $0x10] sm:$0xf] %vm211_vm1, %v673_v3  ;;  %681 = vst.msk [vmem:[%s1075_s23 + $0x14] sm:$0xf] %vm211_vm1, %v673_v3  ;;  %v630_v4 = vpop.permute.xlu0 %629 }
 0x207   : > { %682 = vst.msk [vmem:[%s1075_s23 + $0x18] sm:$0xf] %vm211_vm1, %v673_v3  ;;  %683 = vst.msk [vmem:[%s1075_s23 + $0x1c] sm:$0xf] %vm211_vm1, %v673_v3  ;;  %v664_v12 = vsel %vm661_vm6, %v618_v54, %v630_v4 }
 0x208   : > { %v632_v6 = vpop.permute.xlu1 %631 }
 0x209   : > { %v665_v15 = vsel %vm661_vm6, %v622_v55, %v632_v6 }
 0x20a   : > { %v642_v10 = vpop.permute.xlu0 %641 }
 0x20b   : > { %v669_v13 = vsel %vm666_vm7, %v664_v12, %v642_v10 }
 0x20c   : > { %v644_v11 = vpop.permute.xlu1 %643 }
 0x20d   : > { %v670_v17 = vsel %vm666_vm7, %v665_v15, %v644_v11 }
 0x20e   : > { %v654_v14 = vpop.permute.xlu0 %653 }
 0x20f   : > { %v674_v16 = vsel %vm671_vm8, %v669_v13, %v654_v14 }
 0x210   : > { %684 = vst.msk [vmem:[%s1075_s23 + $0x20] sm:$0xf] %vm211_vm1, %v674_v16  ;;  %685 = vst.msk [vmem:[%s1075_s23 + $0x24] sm:$0xf] %vm211_vm1, %v674_v16  ;;  %v656_v18 = vpop.permute.xlu1 %655 }
 0x211   : > { %686 = vst.msk [vmem:[%s1075_s23 + $0x28] sm:$0xf] %vm211_vm1, %v674_v16  ;;  %687 = vst.msk [vmem:[%s1075_s23 + $0x2c] sm:$0xf] %vm211_vm1, %v674_v16  ;;  %v675_v19 = vsel %vm671_vm8, %v670_v17, %v656_v18 }
 0x212   : > { %688 = vst.msk [vmem:[%s1075_s23 + $0x30] sm:$0xf] %vm211_vm1, %v675_v19  ;;  %689 = vst.msk [vmem:[%s1075_s23 + $0x34] sm:$0xf] %vm211_vm1, %v675_v19 }
 0x213   : > { %690 = vst.msk [vmem:[%s1075_s23 + $0x38] sm:$0xf] %vm211_vm1, %v675_v19  ;;  %691 = vst.msk [vmem:[%s1075_s23 + $0x3c] sm:$0xf] %vm211_vm1, %v675_v19 }
 0x214 PF: > { %s14_s15 = sadd.s32 1, %s858_s15  }
 0x215   : > { %p11_p4 = scmp.ge.s32.totalorder %s14_s15, 4  }
 0x217   :  { %13 = sbr.rel (!%p11_p4) target bundleno = 1 (0x1), region = 67 }

// kernel: db_head_forward.14
= control target key start
LH: loop header
LB: loop body
LE: loop exit
PB: predicated region body
PF: predicated region fallthrough
CT: control target
= control target key end

     0   :  { %s1299_s15 = smov 0   ;;  %s1730_s0 = inlined_call_operand.vmem [shape: f32[2,8,8,32], index: 0, kind: input, shape index: {}]   ;;  %s1731_s1 = inlined_call_operand.vmem [shape: bf16[288,8], index: 1, kind: input, shape index: {}]   ;;  %s1732_s2 = inlined_call_operand.vmem [shape: f32[1,8], index: 2, kind: input, shape index: {}]   ;;  %s1733_s3 = inlined_call_operand.vmem [shape: f32[1,8], index: 3, kind: input, shape index: {}]   ;;  %s1734_s4 = inlined_call_operand.vmem [shape: f32[2,16,8,16], index: 4, kind: output, shape index: {}]  }
   0x1 LB: > { %s999_s16 = sadd.s32 4294967295, %s1267_s15   ;;  %p1003_p0 = scmp.ge.s32.totalorder %s1267_s15, 1  ;;  %s1267_s15 = sphi %s1299_s15, %s14_s15  }
   0x2   : > { %p162_p1 = scmp.lt.s32.totalorder %s1267_s15, 3 }
   0x4   : > { %p163_p2 = pnand %p1003_p0, %p162_p1 }
   0x5   : > { %p1309_p3 = scmp.lt.s32.totalorder (!%p163_p2), %s999_s16, 1  ;;  %s1270_s10 = smov (!%p163_p2), 64  }
   0x6   : > { %166 = sbr.rel (%p163_p2) target bundleno = 528 (0x210), region = 36  ;;  %s1271_s17 = smov (!%p163_p2), 96  }
   0x7   : > { %s1272_s18 = smov (!%p163_p2), 32  }
   0xb   : > { %vm199_vm0 = vcmask 261120   ;;  %vm201_vm1 = vcmask 254976   ;;  %v1269_v0 = vmov 0.0   ;;  %v1243_v1 = vld [vmem:[%s1731_s1 + $0x78] sm:$0xff]   ;;  %s1737_s16 = smov (!%p1309_p3, %s999_s16), 1  ;;  %v1245_v3 = vld [vmem:[%s1731_s1 + $0x70] sm:$0xff]  }
   0xc   : > { %217 = vst.msk [vmem:[#allocation2 + $0x80] sm:$0xff] %vm199_vm0, %v1269_v0  ;;  %219 = vst.msk [vmem:[#allocation2 + $0x90] sm:$0xff] %vm199_vm0, %v1269_v0  ;;  %v1244_v2 = vld [vmem:[%s1731_s1 + $0x38] sm:$0xff]   ;;  %1036 = vmatprep.subr.bf16.mxu0 %v1243_v1  ;;  %1094 = vmatprep.subr.bf16.mxu1 %v1243_v1  ;;  %s1034_s22 = sshll.u32 %s1737_s16, 6  ;;  %v1246_v4 = vld [vmem:[%s1731_s1 + $0x30] sm:$0xff]   ;;  %vm323_vm2 = vcmask 1045504  }
   0xd   : > { %218 = vst.msk [vmem:[#allocation2 + $0x88] sm:$0x3] %vm201_vm1, %v1269_v0  ;;  %202 = vst.msk [vmem:[#allocation2 + $0x8] sm:$0x3] %vm201_vm1, %v1269_v0  ;;  %1037 = vmatpush3.bf16.msra.mxu0 %v1244_v2  ;;  %1102 = vmatpush3.bf16.msra.mxu1 %v1244_v2  ;;  %s192_s29 = scalar_lea.vmem %s1730_s0, %s1034_s22  ;;  %v1247_v23 = vld [vmem:[%s1731_s1 + $0x68] sm:$0xff]   ;;  %vm274_vm3 = vcmask 1046528  }
   0xe   : > { %200 = vst.msk [vmem:[#allocation2] sm:$0xff] %vm199_vm0, %v1269_v0  ;;  %203 = vst.msk [vmem:[#allocation2 + $0x10] sm:$0xff] %vm199_vm0, %v1269_v0  ;;  %v228_v5 = vld [vmem:[%s192_s29 + $0x38] sm:$0xff]  ;;  %v222_v6 = vld [vmem:[%s192_s29 + $0x8] sm:$0xff]  ;;  %1038 = vmatprep.subr.bf16.mxu0 %v1245_v3  ;;  %1095 = vmatprep.subr.bf16.mxu1 %v1245_v3  ;;  %vm508_vm4 = vcmask 523264   ;;  %vm517_vm5 = vcmask 785408  }
   0xf   : > { %204 = vst.msk [vmem:[#allocation2 + $0x18] sm:$0x3] %vm201_vm1, %v1269_v0  ;;  %206 = vst.msk [vmem:[#allocation2 + $0x28] sm:$0x3] %vm201_vm1, %v1269_v0  ;;  %v223_v7 = vld [vmem:[%s192_s29 + $0x10] sm:$0xff]  ;;  %v221_v8 = vld [vmem:[%s192_s29] sm:$0xff] }
  0x10   : > { %205 = vst.msk [vmem:[#allocation2 + $0x20] sm:$0xff] %vm199_vm0, %v1269_v0  ;;  %207 = vst.msk [vmem:[#allocation2 + $0x30] sm:$0xff] %vm199_vm0, %v1269_v0  ;;  %v227_v9 = vld [vmem:[%s192_s29 + $0x30] sm:$0xff]  ;;  %v226_v10 = vld [vmem:[%s192_s29 + $0x28] sm:$0xff]  ;;  %vm918_vm6 = vcmask 64512   ;;  %vm927_vm7 = vcmask 130048  }
  0x11   : > { %208 = vst.msk [vmem:[#allocation2 + $0x38] sm:$0x3] %vm201_vm1, %v1269_v0  ;;  %210 = vst.msk [vmem:[#allocation2 + $0x48] sm:$0x3] %vm201_vm1, %v1269_v0  ;;  %1039 = vmatpush3.bf16.msra.mxu0 %v1246_v4  ;;  %1103 = vmatpush3.bf16.msra.mxu1 %v1246_v4  ;;  %v224_v20 = vld [vmem:[%s192_s29 + $0x18] sm:$0xff]  ;;  %v225_v21 = vld [vmem:[%s192_s29 + $0x20] sm:$0xff] }
  0x12   : > { %209 = vst.msk [vmem:[#allocation2 + $0x40] sm:$0xff] %vm199_vm0, %v1269_v0  ;;  %211 = vst.msk [vmem:[#allocation2 + $0x50] sm:$0xff] %vm199_vm0, %v1269_v0  ;;  %v1248_v25 = vld [vmem:[%s1731_s1 + $0x28] sm:$0xff]   ;;  %1040 = vmatprep.subr.bf16.mxu0 %v1247_v23  ;;  %v1249_v26 = vld [vmem:[%s1731_s1 + $0x60] sm:$0xff]   ;;  %1096 = vmatprep.subr.bf16.mxu1 %v1247_v23 }
  0x13   : > { %212 = vst.msk [vmem:[#allocation2 + $0x58] sm:$0x3] %vm201_vm1, %v1269_v0  ;;  %214 = vst.msk [vmem:[#allocation2 + $0x68] sm:$0x3] %vm201_vm1, %v1269_v0  ;;  %v1358_v11 = vld [vmem:[#allocation2 + $0x90] sm:$0xff]  ;;  %v1250_v1 = vld [vmem:[%s1731_s1 + $0x20] sm:$0xff]  }
  0x14   : > { %213 = vst.msk [vmem:[#allocation2 + $0x60] sm:$0xff] %vm199_vm0, %v1269_v0  ;;  %215 = vst.msk [vmem:[#allocation2 + $0x70] sm:$0xff] %vm199_vm0, %v1269_v0  ;;  %v239_v13 = vld [vmem:[#allocation2 + $0x8] sm:$0x3]  ;;  %v489_v14 = vrot.slane %v1358_v11, 2  ;;  %v462_v28 = vrot.slane %v1358_v11, 1 }
  0x15   : > { %216 = vst.msk [vmem:[#allocation2 + $0x78] sm:$0x3] %vm201_vm1, %v1269_v0  ;;  %220 = vst.msk [vmem:[#allocation2 + $0x98] sm:$0x3] %vm201_vm1, %v1269_v0  ;;  %v1361_v12 = vld [vmem:[#allocation2] sm:$0xff]  ;;  %v325_v17 = vrot.slane %v239_v13, 2  ;;  %1041 = vmatpush3.bf16.msra.mxu0 %v1248_v25  ;;  %1104 = vmatpush3.bf16.msra.mxu1 %v1248_v25 }
  0x16   : > { %237 = vst.msk [vmem:[#allocation2 + $0x81] sm:$0xff] %vm199_vm0, %v228_v5  ;;  %231 = vst.msk [vmem:[#allocation2 + $0x21] sm:$0xff] %vm199_vm0, %v222_v6  ;;  %v324_v16 = vrot.slane %v1361_v12, 2  ;;  %v275_v18 = vrot.slane %v1361_v12, 1  ;;  %v276_v22 = vrot.slane %v239_v13, 1  ;;  %1042 = vmatprep.subr.bf16.mxu0 %v1249_v26  ;;  %1097 = vmatprep.subr.bf16.mxu1 %v1249_v26  ;;  %v1251_v2 = vld [vmem:[%s1731_s1 + $0x58] sm:$0xff]  }
  0x17   : > { %232 = vst.msk [vmem:[#allocation2 + $0x31] sm:$0xff] %vm199_vm0, %v223_v7  ;;  %230 = vst.msk [vmem:[#allocation2 + $0x11] sm:$0xff] %vm199_vm0, %v221_v8  ;;  %v1252_v7 = vld [vmem:[%s1731_s1 + $0x18] sm:$0xff]  }
  0x18   : > { %236 = vst.msk [vmem:[#allocation2 + $0x71] sm:$0xff] %vm199_vm0, %v227_v9  ;;  %235 = vst.msk [vmem:[#allocation2 + $0x61] sm:$0xff] %vm199_vm0, %v226_v10  ;;  %v1393_v31 = vsel %vm323_vm2, %v324_v16, %v325_v17  ;;  %v277_v38 = vsel %vm274_vm3, %v275_v18, %v276_v22 }
  0x19   : > { %233 = vst.msk [vmem:[#allocation2 + $0x41] sm:$0xff] %vm199_vm0, %v224_v20  ;;  %234 = vst.msk [vmem:[#allocation2 + $0x51] sm:$0xff] %vm199_vm0, %v225_v21  ;;  %1043 = vmatpush3.bf16.msra.mxu0 %v1250_v1  ;;  %1105 = vmatpush3.bf16.msra.mxu1 %v1250_v1 }
  0x1a   : > { %1044 = vmatprep.subr.bf16.mxu0 %v1251_v2  ;;  %1098 = vmatprep.subr.bf16.mxu1 %v1251_v2 }
  0x1c   : > { %v1366_v15 = vld [vmem:[#allocation2 + $0x98] sm:$0x3] }
  0x1d   : > { %v490_v19 = vrot.slane %v1366_v15, 2  ;;  %v1385_v27 = vld [vmem:[#allocation2 + $0x80] sm:$0xff]  ;;  %v243_v36 = vld [vmem:[#allocation2 + $0x28] sm:$0x3]  ;;  %v463_v60 = vrot.slane %v1366_v15, 1  ;;  %1045 = vmatpush3.bf16.msra.mxu0 %v1252_v7  ;;  %1106 = vmatpush3.bf16.msra.mxu1 %v1252_v7 }
  0x1e   : > { %v1388_v29 = vld [vmem:[#allocation2 + $0x20] sm:$0xff]  ;;  %v1390_v30 = vld [vmem:[#allocation2 + $0x30] sm:$0xff]  ;;  %v1133_v32 = vpack.i.bf16 %v1358_v11, %v1385_v27  ;;  %v241_v35 = vld [vmem:[#allocation2 + $0x18] sm:$0x3]  ;;  %v331_v42 = vrot.slane %v243_v36, 2  ;;  %v282_v48 = vrot.slane %v243_v36, 1 }
  0x1f   : > { %v1377_v24 = vsel %vm323_vm2, %v489_v14, %v490_v19  ;;  %v1123_v33 = vpack.i.bf16 %v1390_v30, %v1388_v29  ;;  %v1399_v34 = vld [vmem:[#allocation2 + $0x10] sm:$0xff]  ;;  %v330_v37 = vrot.slane %v1388_v29, 2  ;;  %v328_v41 = vrot.slane %v241_v35, 2  ;;  %v1406_v43 = vld [vmem:[#allocation2 + $0x38] sm:$0x3]  ;;  %v1422_v55 = vld [vmem:[#allocation2 + $0x60] sm:$0xff] }
  0x20   : > { %v1128_v39 = vpack.i.bf16 %v1388_v29, %v1399_v34  ;;  %v327_v40 = vrot.slane %v1399_v34, 2  ;;  %v1408_v44 = vld [vmem:[#allocation2 + $0x70] sm:$0xff]  ;;  %1134 = vrot.lane.b32.xlu0 %v1133_v32, %s1270_s10  ;;  %v278_v45 = vrot.slane %v1399_v34, 1  ;;  %v279_v46 = vrot.slane %v241_v35, 1  ;;  %v253_v49 = vld [vmem:[#allocation2 + $0x78] sm:$0x3] }
  0x21   : > { %1124 = vrot.lane.b32.xlu1 %v1123_v33, %s1270_s10  ;;  %v281_v47 = vrot.slane %v1388_v29, 1  ;;  %v1416_v51 = vsel %vm323_vm2, %v330_v37, %v331_v42  ;;  %v284_v52 = vrot.slane %v1390_v30, 1  ;;  %v285_v53 = vrot.slane %v1406_v43, 1  ;;  %v1420_v54 = vld [vmem:[#allocation2 + $0x88] sm:$0x3]  ;;  %v1253_v14 = vld [vmem:[%s1731_s1 + $0x50] sm:$0xff]  }
  0x22   : > { %v329_v50 = vsel %vm323_vm2, %v327_v40, %v328_v41  ;;  %v1427_v58 = vsel %vm274_vm3, %v278_v45, %v279_v46  ;;  %v251_v59 = vld [vmem:[#allocation2 + $0x68] sm:$0x3]  ;;  %v345_v63 = vrot.slane %v1408_v44, 2  ;;  %v346_v0 = vrot.slane %v253_v49, 2  ;;  %v1472_v22 = vld [vmem:[#allocation2 + $0x40] sm:$0xff]  ;;  %v1254_v33 = vld [vmem:[%s1731_s1 + $0x10] sm:$0xff]   ;;  %1046 = vmatprep.subr.bf16.mxu0 %v1253_v14  ;;  %1099 = vmatprep.subr.bf16.mxu1 %v1253_v14 }
  0x23   : > { %v1138_v56 = vpack.i.bf16 %v1416_v51, %v329_v50  ;;  %v1148_v57 = vpack.i.bf16 %v329_v50, %v1393_v31  ;;  %v1143_v61 = vpack.i.bf16 %v1427_v58, %v277_v38  ;;  %v1432_v62 = vsel %vm274_vm3, %v281_v47, %v282_v48  ;;  %v247_v23 = vld [vmem:[#allocation2 + $0x48] sm:$0x3]  ;;  %v249_v35 = vld [vmem:[#allocation2 + $0x58] sm:$0x3]  ;;  %1047 = vmatpush3.bf16.msra.mxu0 %v1254_v33 }
  0x24   : > { %v1444_v3 = vsel %vm274_vm3, %v284_v52, %v285_v53  ;;  %v409_v4 = vrot.slane %v1385_v27, 2  ;;  %v410_v5 = vrot.slane %v1420_v54, 2  ;;  %v342_v6 = vrot.slane %v1422_v55, 2  ;;  %v1255_v36 = vld [vmem:[%s1731_s1 + $0x48] sm:$0xff]   ;;  %1107 = vmatpush3.bf16.msra.mxu1 %v1254_v33 }
  0x25   : > { %1129 = vrot.lane.b32.xlu1 %v1128_v39, %s1271_s17  ;;  %1139 = vrot.lane.b32.xlu0 %v1138_v56, %s1272_s18  ;;  %v1453_v8 = vsel %vm323_vm2, %v345_v63, %v346_v0  ;;  %v343_v9 = vrot.slane %v251_v59, 2  ;;  %v293_v10 = vrot.slane %v1422_v55, 1  ;;  %v294_v13 = vrot.slane %v251_v59, 1  ;;  %v1494_v39 = vld [vmem:[#allocation2 + $0x50] sm:$0xff]  ;;  %v1256_v48 = vld [vmem:[%s1731_s1 + $0x8] sm:$0xff]  }
  0x26   : > { %v1460_v15 = vsel %vm323_vm2, %v409_v4, %v410_v5  ;;  %v296_v16 = vrot.slane %v1408_v44, 1  ;;  %v297_v17 = vrot.slane %v253_v49, 1  ;;  %v1158_v19 = vpack.i.bf16 %v1444_v3, %v1432_v62  ;;  %1048 = vmatprep.subr.bf16.mxu0 %v1255_v36  ;;  %v1257_v49 = vld [vmem:[%s1731_s1 + $0x40] sm:$0xff]   ;;  %1100 = vmatprep.subr.bf16.mxu1 %v1255_v36 }
  0x27   : > { %v561_v18 = vpack.c.bf16 %v1377_v24, %v1460_v15  ;;  %v1153_v20 = vpack.i.bf16 %v1460_v15, %v1453_v8  ;;  %v398_v21 = vrot.slane %v1385_v27, 1  ;;  %v1475_v25 = vsel %vm323_vm2, %v342_v6, %v343_v9  ;;  %1049 = vmatpush3.bf16.msra.mxu0 %v1256_v48 }
  0x28   : > { %v1478_v26 = vsel %vm274_vm3, %v293_v10, %v294_v13  ;;  %v1481_v31 = vsel %vm274_vm3, %v296_v16, %v297_v17  ;;  %v399_v32 = vrot.slane %v1420_v54, 1  ;;  %v464_v37 = vsel %vm274_vm3, %v462_v28, %v463_v60  ;;  %1108 = vmatpush3.bf16.msra.mxu1 %v1256_v48  ;;  %1050 = vmatprep.subr.bf16.mxu0 %v1257_v49 }
  0x29   : > { %1149 = vrot.lane.b32.xlu1 %v1148_v57, %s1270_s10  ;;  %1144 = vrot.lane.b32.xlu0 %v1143_v61, %s1272_s18  ;;  %v333_v38 = vrot.slane %v1390_v30, 2  ;;  %v1168_v40 = vpack.i.bf16 %v1453_v8, %v1475_v25  ;;  %v1163_v41 = vpack.i.bf16 %v1481_v31, %v1478_v26  ;;  %v336_v42 = vrot.slane %v1472_v22, 2  ;;  %v1536_v57 = vld [vmem:[%s1731_s1 + $0x88] sm:$0xff]  }
  0x2a   : > { %v337_v45 = vrot.slane %v247_v23, 2  ;;  %v1504_v11 = vsel %vm274_vm3, %v398_v21, %v399_v32  ;;  %v334_v28 = vrot.slane %v1406_v43, 2  ;;  %v339_v46 = vrot.slane %v1494_v39, 2  ;;  %1101 = vmatprep.subr.bf16.mxu1 %v1257_v49 }
  0x2b   : > { %v340_v47 = vrot.slane %v249_v35, 2  ;;  %v1178_v50 = vpack.i.bf16 %v1385_v27, %v1408_v44  ;;  %v1173_v43 = vpack.i.bf16 %v464_v37, %v1504_v11  ;;  %v1258_v27 = vld [vmem:[%s1731_s1] sm:$0xff]   ;;  %v287_v61 = vrot.slane %v1472_v22, 1 }
  0x2c   : > { %v1520_v52 = vsel %vm323_vm2, %v336_v42, %v337_v45  ;;  %v1526_v54 = vsel %vm323_vm2, %v333_v38, %v334_v28  ;;  %v288_v63 = vrot.slane %v247_v23, 1  ;;  %v290_v0 = vrot.slane %v1494_v39, 1  ;;  %1051 = vmatpush3.bf16.msra.mxu0 %v1258_v27  ;;  %1109 = vmatpush3.bf16.msra.mxu1 %v1258_v27 }
  0x2d   : > { %1159 = vrot.lane.b32.xlu1 %v1158_v19, %s1271_s17  ;;  %1154 = vrot.lane.b32.xlu0 %v1153_v20, %s1272_s18  ;;  %v1523_v53 = vsel %vm323_vm2, %v339_v46, %v340_v47  ;;  %v552_v59 = vpack.c.bf16 %v1526_v54, %v1416_v51  ;;  %v1183_v60 = vpack.i.bf16 %v1520_v52, %v1526_v54  ;;  %v291_v1 = vrot.slane %v249_v35, 1 }
  0x2e   : > { %v555_v56 = vpack.c.bf16 %v1523_v53, %v1520_v52  ;;  %1082 = vmatprep.subr.bf16.mxu1 %v1536_v57  ;;  %v1198_v2 = vpack.i.bf16 %v1526_v54, %v1416_v51  ;;  %v1193_v4 = vpack.i.bf16 %v1494_v39, %v1472_v22  ;;  %v1554_v5 = vsel %vm274_vm3, %v287_v61, %v288_v63 }
  0x2f   : > { %v1557_v6 = vsel %vm274_vm3, %v290_v0, %v291_v1  ;;  %v1208_v7 = vpack.i.bf16 %v1472_v22, %v1390_v30  ;;  %v558_v10 = vpack.c.bf16 %v1453_v8, %v1475_v25  ;;  %v1213_v13 = vpack.i.bf16 %v1475_v25, %v1523_v53 }
  0x30   : > { %v1203_v9 = vpack.i.bf16 %v1557_v6, %v1554_v5  ;;  %v1228_v14 = vpack.i.bf16 %v1523_v53, %v1520_v52  ;;  %v1223_v16 = vpack.i.bf16 %v1408_v44, %v1422_v55  ;;  %v1238_v17 = vpack.i.bf16 %v1422_v55, %v1494_v39 }
  0x31   : > { %1169 = vrot.lane.b32.xlu1 %v1168_v40, %s1270_s10  ;;  %1164 = vrot.lane.b32.xlu0 %v1163_v41, %s1272_s18 }
  0x35   : > { %1179 = vrot.lane.b32.xlu1 %v1178_v50, %s1271_s17  ;;  %1174 = vrot.lane.b32.xlu0 %v1173_v43, %s1271_s17 }
  0x39   : > { %1189 = vrot.lane.b32.xlu1 %v1158_v19, %s1272_s18  ;;  %1184 = vrot.lane.b32.xlu0 %v1183_v60, %s1272_s18 }
  0x3d   : > { %1199 = vrot.lane.b32.xlu1 %v1198_v2, %s1270_s10  ;;  %1194 = vrot.lane.b32.xlu0 %v1193_v4, %s1270_s10 }
  0x41   : > { %1209 = vrot.lane.b32.xlu1 %v1208_v7, %s1271_s17  ;;  %1204 = vrot.lane.b32.xlu0 %v1203_v9, %s1271_s17 }
  0x45   : > { %1219 = vrot.lane.b32.xlu1 %v1203_v9, %s1272_s18  ;;  %1214 = vrot.lane.b32.xlu0 %v1213_v13, %s1272_s18  ;;  %s1035_s18 = sshll.u32 %s1737_s16, 7 }
  0x46   : > { %s1685_s21 = scalar_lea.vmem %s1734_s4, %s1035_s18 }
  0x49   : > { %1229 = vrot.lane.b32.xlu1 %v1228_v14, %s1270_s10  ;;  %1224 = vrot.lane.b32.xlu0 %v1223_v16, %s1270_s10 }
  0x4d   : > { %1239 = vrot.lane.b32.xlu1 %v1238_v17, %s1271_s17  ;;  %1234 = vrot.lane.b32.xlu0 %v1163_v41, %s1271_s17  ;;  %s1273_s17 = smov 8  }
  0x92   : > { %v1135_v19 = vpop.permute.xlu0 %1134 }
  0x93   : > { %v1125_v20 = vpop.permute.xlu1 %1124 }
  0x94   : > { %v1127_v45 = vunpack.i.h.bf16 %v1125_v20  ;;  %v1126_v28 = vunpack.i.l.bf16 %v1125_v20 }
  0x97   : > { %v1130_v21 = vpop.permute.xlu1 %1129  ;;  %v1140_v23 = vpop.permute.xlu0 %1139 }
  0x98   : > { %v1142_v32 = vunpack.i.h.bf16 %v1140_v23  ;;  %v1141_v33 = vunpack.i.l.bf16 %v1140_v23  ;;  %v1132_v49 = vunpack.i.h.bf16 %v1130_v21  ;;  %v1131_v50 = vunpack.i.l.bf16 %v1130_v21 }
  0x9a   : > { %v526_v47 = vsel %vm199_vm0, %v1427_v58, %v1141_v33  ;;  %v527_v48 = vsel %vm199_vm0, %v1432_v62, %v1142_v32 }
  0x9b   : > { %v1150_v35 = vpop.permute.xlu1 %1149  ;;  %v1145_v36 = vpop.permute.xlu0 %1144 }
  0x9c   : > { %v1152_v37 = vunpack.i.h.bf16 %v1150_v35  ;;  %v1151_v38 = vunpack.i.l.bf16 %v1150_v35  ;;  %v1147_v40 = vunpack.i.h.bf16 %v1145_v36  ;;  %v1146_v42 = vunpack.i.l.bf16 %v1145_v36 }
  0x9e   : > { %v501_v46 = vsel %vm199_vm0, %v1399_v34, %v1147_v40  ;;  %v500_v41 = vsel %vm199_vm0, %v1361_v12, %v1146_v42  ;;  %v534_v34 = vsel %vm508_vm4, %v526_v47, %v1126_v28  ;;  %v535_v12 = vsel %vm508_vm4, %v527_v48, %v1127_v45 }
  0x9f   : > { %v1160_v43 = vpop.permute.xlu1 %1159  ;;  %v1155_v27 = vpop.permute.xlu0 %1154  ;;  %v509_v60 = vsel %vm508_vm4, %v500_v41, %v1151_v38  ;;  %v510_v61 = vsel %vm508_vm4, %v501_v46, %v1152_v37  ;;  %v1137_v37 = vunpack.i.h.bf16 %v1135_v19  ;;  %v1136_v38 = vunpack.i.l.bf16 %v1135_v19 }
  0xa0   : > { %v1162_v63 = vunpack.i.h.bf16 %v1160_v43  ;;  %v1161_v0 = vunpack.i.l.bf16 %v1160_v43  ;;  %v518_v1 = vsel %vm517_vm5, %v509_v60, %v1131_v50  ;;  %v519_v58 = vsel %vm517_vm5, %v510_v61, %v1132_v49  ;;  %v1260_v61 = vld [vmem:[%s1731_s1 + $0x80] sm:$0xff]  }
  0xa1   : > { %v1157_v2 = vunpack.i.h.bf16 %v1155_v27  ;;  %v1156_v62 = vunpack.i.l.bf16 %v1155_v27  ;;  %v550_v20 = vpack.c.bf16 %v519_v58, %v518_v1 }
  0xa2   : > { %v542_v4 = vsel %vm517_vm5, %v534_v34, %v1161_v0  ;;  %v543_v7 = vsel %vm517_vm5, %v535_v12, %v1162_v63 }
  0xa3   : > { %v1170_v9 = vpop.permute.xlu1 %1169  ;;  %v1165_v13 = vpop.permute.xlu0 %1164  ;;  %v551_v14 = vpack.c.bf16 %v543_v7, %v542_v4  ;;  %v532_v35 = vsel %vm199_vm0, %v1481_v31, %v1156_v62  ;;  %v533_v36 = vsel %vm199_vm0, %v1504_v11, %v1157_v2 }
  0xa4   : > { %v1167_v16 = vunpack.i.h.bf16 %v1165_v13  ;;  %v1166_v17 = vunpack.i.l.bf16 %v1165_v13  ;;  %v1172_v21 = vunpack.i.h.bf16 %v1170_v9  ;;  %v1171_v23 = vunpack.i.l.bf16 %v1170_v9 }
  0xa5   : > { %750 = vmatprep.mubr.bf16.mxu0 %v551_v14  ;;  %v541_v47 = vsel %vm508_vm4, %v533_v36, %v1137_v37 }
  0xa6   : > { %v507_v32 = vsel %vm199_vm0, %v1408_v44, %v1167_v16  ;;  %v506_v33 = vsel %vm199_vm0, %v1422_v55, %v1166_v17  ;;  %751 = vmatmul.mubr.bf16.vlgmr.msra.gmra.mxu0 %v550_v20  ;;  %v540_v44 = vsel %vm508_vm4, %v532_v35, %v1136_v38 }
  0xa7   : > { %v1180_v40 = vpop.permute.xlu1 %1179  ;;  %v1175_v42 = vpop.permute.xlu0 %1174  ;;  %v515_v55 = vsel %vm508_vm4, %v506_v33, %v1171_v23  ;;  %v516_v48 = vsel %vm508_vm4, %v507_v32, %v1172_v21 }
  0xa8   : > { %v1182_v45 = vunpack.i.h.bf16 %v1180_v40  ;;  %v1181_v28 = vunpack.i.l.bf16 %v1180_v40  ;;  %v1177_v46 = vunpack.i.h.bf16 %v1175_v42  ;;  %v1176_v41 = vunpack.i.l.bf16 %v1175_v42 }
  0xaa   : > { %v548_v31 = vsel %vm517_vm5, %v540_v44, %v1176_v41  ;;  %v549_v11 = vsel %vm517_vm5, %v541_v47, %v1177_v46  ;;  %v524_v19 = vsel %vm517_vm5, %v515_v55, %v1181_v28  ;;  %v525_v49 = vsel %vm517_vm5, %v516_v48, %v1182_v45 }
  0xab   : > { %v1190_v50 = vpop.permute.xlu1 %1189  ;;  %v1185_v43 = vpop.permute.xlu0 %1184  ;;  %v560_v27 = vpack.c.bf16 %v549_v11, %v548_v31  ;;  %v559_v60 = vpack.c.bf16 %v525_v49, %v524_v19 }
  0xac   : > { %v1192_v63 = vunpack.i.h.bf16 %v1190_v50  ;;  %v1191_v0 = vunpack.i.l.bf16 %v1190_v50  ;;  %v1187_v34 = vunpack.i.h.bf16 %v1185_v43  ;;  %v1186_v12 = vunpack.i.l.bf16 %v1185_v43 }
  0xad   : > { %774 = vmatprep.mubr.bf16.mxu1 %v560_v27 }
  0xae   : > { %775 = vmatmul.mubr.bf16.vlgmr.msra.gmra.mxu1 %v559_v60  ;;  %v503_v9 = vsel %vm199_vm0, %v1390_v30, %v1192_v63  ;;  %v502_v13 = vsel %vm199_vm0, %v1388_v29, %v1191_v0  ;;  %v529_v14 = vsel %vm199_vm0, %v1554_v5, %v1187_v34 }
  0xaf   : > { %v1200_v1 = vpop.permute.xlu1 %1199  ;;  %v1195_v58 = vpop.permute.xlu0 %1194  ;;  %1083 = vmatpush3.bf16.msra.mxu1 %v1536_v57  ;;  %1086 = vmatprep.mubr.msk.bf16.mxu1 %vm199_vm0, %v552_v59  ;;  %v528_v57 = vsel %vm199_vm0, %v1444_v3, %v1186_v12 }
  0xb0   : > { %1084 = vmatprep.subr.bf16.mxu1 %v1260_v61  ;;  %v1202_v2 = vunpack.i.h.bf16 %v1200_v1  ;;  %v1201_v62 = vunpack.i.l.bf16 %v1200_v1  ;;  %v1197_v4 = vunpack.i.h.bf16 %v1195_v58  ;;  %v1196_v7 = vunpack.i.l.bf16 %v1195_v58 }
  0xb2   : > { %v511_v21 = vsel %vm508_vm4, %v502_v13, %v1201_v62  ;;  %v512_v30 = vsel %vm508_vm4, %v503_v9, %v1202_v2  ;;  %v536_v23 = vsel %vm508_vm4, %v528_v57, %v1196_v7  ;;  %v537_v29 = vsel %vm508_vm4, %v529_v14, %v1197_v4  ;;  %v1030_v7 = vld [vmem:[%s1732_s2] ss:$0 sm:$0xff] }
  0xb3   : > { %v1210_v51 = vpop.permute.xlu1 %1209  ;;  %v1205_v54 = vpop.permute.xlu0 %1204  ;;  %1085 = vmatpush3.bf16.msra.mxu1 %v1260_v61  ;;  %v1031_v57 = vld [vmem:[%s1733_s3] ss:$0 sm:$0xff] }
  0xb4   : > { %v1212_v59 = vunpack.i.h.bf16 %v1210_v51  ;;  %v1211_v16 = vunpack.i.l.bf16 %v1210_v51  ;;  %v1207_v17 = vunpack.i.h.bf16 %v1205_v54  ;;  %v1206_v20 = vunpack.i.l.bf16 %v1205_v54 }
  0xb6   : > { %1087 = vmatmul.mubr.msk.bf16.vlgmr.msra.gmra.mxu1 %vm199_vm0, %v555_v56  ;;  %v544_v3 = vsel %vm517_vm5, %v536_v23, %v1206_v20  ;;  %v545_v5 = vsel %vm517_vm5, %v537_v29, %v1207_v17  ;;  %v520_v32 = vsel %vm517_vm5, %v511_v21, %v1211_v16  ;;  %v521_v33 = vsel %vm517_vm5, %v512_v30, %v1212_v59 }
  0xb7   : > { %v1220_v35 = vpop.permute.xlu1 %1219  ;;  %v1215_v36 = vpop.permute.xlu0 %1214  ;;  %v554_v37 = vpack.c.bf16 %v545_v5, %v544_v3  ;;  %v553_v38 = vpack.c.bf16 %v521_v33, %v520_v32  ;;  %1090 = vmatprep.mubr.msk.bf16.mxu1 %vm199_vm0, %v558_v10 }
  0xb8   : > { %v1222_v52 = vunpack.i.h.bf16 %v1220_v35  ;;  %v1221_v53 = vunpack.i.l.bf16 %v1220_v35  ;;  %v1217_v56 = vunpack.i.h.bf16 %v1215_v36  ;;  %v1216_v40 = vunpack.i.l.bf16 %v1215_v36 }
  0xb9   : > { %758 = vmatprep.mubr.bf16.mxu0 %v554_v37 }
  0xba   : > { %759 = vmatmul.mubr.bf16.gmra.mxu0 %v553_v38  ;;  %v505_v8 = vsel %vm199_vm0, %v1494_v39, %v1222_v52  ;;  %v504_v25 = vsel %vm199_vm0, %v1472_v22, %v1221_v53  ;;  %v531_v10 = vsel %vm199_vm0, %v1478_v26, %v1217_v56  ;;  %v530_v47 = vsel %vm199_vm0, %v1557_v6, %v1216_v40 }
  0xbb   : > { %v1230_v42 = vpop.permute.xlu1 %1229  ;;  %v1225_v45 = vpop.permute.xlu0 %1224 }
  0xbc   : > { %v1232_v28 = vunpack.i.h.bf16 %v1230_v42  ;;  %v1231_v46 = vunpack.i.l.bf16 %v1230_v42  ;;  %v1227_v41 = vunpack.i.h.bf16 %v1225_v45  ;;  %v1226_v44 = vunpack.i.l.bf16 %v1225_v45 }
  0xbe   : > { %1091 = vmatmul.mubr.msk.bf16.gmra.mxu1 %vm199_vm0, %v561_v18  ;;  %v513_v15 = vsel %vm508_vm4, %v504_v25, %v1231_v46  ;;  %v514_v18 = vsel %vm508_vm4, %v505_v8, %v1232_v28  ;;  %v538_v39 = vsel %vm508_vm4, %v530_v47, %v1226_v44  ;;  %v539_v22 = vsel %vm508_vm4, %v531_v10, %v1227_v41 }
  0xbf   : > { %v1240_v55 = vpop.permute.xlu1 %1239  ;;  %v1235_v48 = vpop.permute.xlu0 %1234 }
  0xc0   : > { %v1242_v31 = vunpack.i.h.bf16 %v1240_v55  ;;  %v1241_v11 = vunpack.i.l.bf16 %v1240_v55  ;;  %v1237_v19 = vunpack.i.h.bf16 %v1235_v48  ;;  %v1236_v24 = vunpack.i.l.bf16 %v1235_v48 }
  0xc2   : > { %v546_v49 = vsel %vm517_vm5, %v538_v39, %v1236_v24  ;;  %v547_v26 = vsel %vm517_vm5, %v539_v22, %v1237_v19  ;;  %v522_v6 = vsel %vm517_vm5, %v513_v15, %v1241_v11  ;;  %v523_v50 = vsel %vm517_vm5, %v514_v18, %v1242_v31 }
  0xc3   : > { %v557_v43 = vpack.c.bf16 %v547_v26, %v546_v49  ;;  %v556_v27 = vpack.c.bf16 %v523_v50, %v522_v6 }
  0xc5   : > { %766 = vmatprep.mubr.bf16.mxu0 %v557_v43 }
  0xc6   : > { %767 = vmatmul.mubr.bf16.gmra.mxu0 %v556_v27 }
 0x166   : > { %v1052_v60 = vpop.f32.mrf.mxu0 }
 0x168   : > { %v1053_v63 = vpop.f32.mrf.mxu0 }
 0x169   : > { %v1054_v2 = vadd.f32 %v1053_v63, %v1052_v60 }
 0x16a   : > { %v1055_v12 = vpop.f32.mrf.mxu0 }
 0x16c   : > { %v1056_v62 = vpop.f32.mrf.mxu0 }
 0x16d   : > { %v1057_v51 = vadd.f32 %v1056_v62, %v1055_v12 }
 0x16e   : > { %v1070_v61 = vpop.f32.mrf.mxu1 }
 0x170   : > { %v1071_v0 = vpop.f32.mrf.mxu1 }
 0x171   : > { %v1072_v45 = vadd.f32 %v1071_v0, %v1070_v61 }
 0x172   : > { %v1073_v34 = vpop.f32.mrf.mxu1 }
 0x174   : > { %v1074_v1 = vpop.f32.mrf.mxu1 }
 0x175   : > { %v1075_v47 = vadd.f32 %v1074_v1, %v1073_v34 }
 0x176   : > { %v1088_v58 = vpop.f32.mrf.mxu1 }
 0x178   : > { %v817_v4 = vpop.f32.mrf.mxu1 }
 0x179   : > { %v818_v9 = vadd.f32 %v1054_v2, %v817_v4 }
 0x17a   : > { %v1058_v13 = vpop.f32.mrf.mxu0  ;;  %v1089_v14 = vpop.f32.mrf.mxu1 }
 0x17b   : > { %v855_v54 = vmul.f32 %v1030_v7, %v818_v9 }
 0x17c   : > { %v1059_v59 = vpop.f32.mrf.mxu0  ;;  %v820_v16 = vpop.f32.mrf.mxu1 }
 0x17d   : > { %v1060_v17 = vadd.f32 %v1059_v59, %v1058_v13  ;;  %v821_v20 = vadd.f32 %v1057_v51, %v820_v16  ;;  %v870_v21 = vadd.f32 %v1031_v57, %v855_v54 }
 0x17e   : > { %v1061_v30 = vpop.f32.mrf.mxu0  ;;  %v1092_v36 = vpop.f32.mrf.mxu1 }
 0x17f   : > { %v826_v23 = vadd.f32 %v1088_v58, %v1060_v17  ;;  %v856_v29 = vmul.f32 %v1030_v7, %v821_v20  ;;  %v878_v3 = vmax.f32 %v870_v21, 0.0  ;;  %v842_v41 = vadd.f32 %v1092_v36, %v1072_v45 }
 0x180   : > { %v1062_v5 = vpop.f32.mrf.mxu0  ;;  %v833_v40 = vpop.f32.mrf.mxu1 }
 0x181   : > { %v857_v32 = vmul.f32 %v1030_v7, %v826_v23  ;;  %v1063_v33 = vadd.f32 %v1062_v5, %v1061_v30  ;;  %894 = vrot.lane.b32.xlu0 %v878_v3, %s1273_s17  ;;  %v871_v35 = vadd.f32 %v1031_v57, %v856_v29  ;;  %v861_v31 = vmul.f32 %v1030_v7, %v842_v41 }
 0x182   : > { %v1093_v25 = vpop.f32.mrf.mxu1 }
 0x183   : > { %v829_v37 = vadd.f32 %v1089_v14, %v1063_v33  ;;  %v879_v38 = vmax.f32 %v871_v35, 0.0  ;;  %v872_v52 = vadd.f32 %v1031_v57, %v857_v32  ;;  %v845_v11 = vadd.f32 %v1093_v25, %v1075_v47 }
 0x184   : > { %v836_v15 = vpop.f32.mrf.mxu1  ;;  %v876_v6 = vadd.f32 %v1031_v57, %v861_v31 }
 0x185   : > { %v858_v53 = vmul.f32 %v1030_v7, %v829_v37  ;;  %896 = vrot.lane.b32.xlu1 %v879_v38, %s1273_s17  ;;  %v880_v56 = vmax.f32 %v872_v52, 0.0  ;;  %v862_v22 = vmul.f32 %v1030_v7, %v845_v11 }
 0x186   : > { %v1064_v42 = vpop.f32.mrf.mxu0  ;;  %v884_v27 = vmax.f32 %v876_v6, 0.0 }
 0x187   : > { %898 = vrot.lane.b32.xlu0 %v880_v56, %s1273_s17  ;;  %v873_v28 = vadd.f32 %v1031_v57, %v858_v53  ;;  %v877_v60 = vadd.f32 %v1031_v57, %v862_v22 }
 0x188   : > { %v1065_v46 = vpop.f32.mrf.mxu0 }
 0x189   : > { %v1066_v44 = vadd.f32 %v1065_v46, %v1064_v42  ;;  %v881_v8 = vmax.f32 %v873_v28, 0.0  ;;  %v885_v61 = vmax.f32 %v877_v60, 0.0 }
 0x18a   : > { %v1067_v10 = vpop.f32.mrf.mxu0 }
 0x18b   : > { %v834_v55 = vadd.f32 %v1066_v44, %v833_v40  ;;  %900 = vrot.lane.b32.xlu1 %v881_v8, %s1273_s17 }
 0x18c   : > { %v1068_v48 = vpop.f32.mrf.mxu0 }
 0x18d   : > { %v859_v19 = vmul.f32 %v1030_v7, %v834_v55  ;;  %v1069_v24 = vadd.f32 %v1068_v48, %v1067_v10 }
 0x18f   : > { %v837_v18 = vadd.f32 %v1069_v24, %v836_v15  ;;  %v874_v39 = vadd.f32 %v1031_v57, %v859_v19 }
 0x191   : > { %v860_v49 = vmul.f32 %v1030_v7, %v837_v18  ;;  %v882_v26 = vmax.f32 %v874_v39, 0.0 }
 0x193   : > { %902 = vrot.lane.b32.xlu0 %v882_v26, %s1273_s17  ;;  %v875_v50 = vadd.f32 %v1031_v57, %v860_v49 }
 0x195   : > { %v883_v43 = vmax.f32 %v875_v50, 0.0 }
 0x197   : > { %904 = vrot.lane.b32.xlu1 %v883_v43, %s1273_s17  ;;  %906 = vrot.lane.b32.xlu0 %v884_v27, %s1273_s17 }
 0x19b   : > { %908 = vrot.lane.b32.xlu1 %v885_v61, %s1273_s17 }
 0x1f3   : > { %v895_v63 = vpop.permute.xlu0 %894 }
 0x1f4   : > { %v919_v0 = vsel %vm918_vm6, %v878_v3, %v895_v63 }
 0x1f5   : > { %928 = vst.msk [vmem:[%s1685_s21] sm:$0xff] %vm927_vm7, %v919_v0  ;;  %929 = vst.msk [vmem:[%s1685_s21 + $0x8] sm:$0xff] %vm927_vm7, %v919_v0 }
 0x1f7   : > { %v897_v34 = vpop.permute.xlu1 %896 }
 0x1f8   : > { %v920_v12 = vsel %vm918_vm6, %v879_v38, %v897_v34 }
 0x1f9   : > { %930 = vst.msk [vmem:[%s1685_s21 + $0x10] sm:$0xff] %vm927_vm7, %v920_v12  ;;  %931 = vst.msk [vmem:[%s1685_s21 + $0x18] sm:$0xff] %vm927_vm7, %v920_v12  ;;  %v899_v1 = vpop.permute.xlu0 %898 }
 0x1fa   : > { %v921_v58 = vsel %vm918_vm6, %v880_v56, %v899_v1 }
 0x1fb   : > { %932 = vst.msk [vmem:[%s1685_s21 + $0x20] sm:$0xff] %vm927_vm7, %v921_v58  ;;  %933 = vst.msk [vmem:[%s1685_s21 + $0x28] sm:$0xff] %vm927_vm7, %v921_v58 }
 0x1fd   : > { %v901_v2 = vpop.permute.xlu1 %900 }
 0x1fe   : > { %v922_v62 = vsel %vm918_vm6, %v881_v8, %v901_v2 }
 0x1ff   : > { %934 = vst.msk [vmem:[%s1685_s21 + $0x30] sm:$0xff] %vm927_vm7, %v922_v62  ;;  %935 = vst.msk [vmem:[%s1685_s21 + $0x38] sm:$0xff] %vm927_vm7, %v922_v62 }
 0x205   : > { %v903_v4 = vpop.permute.xlu0 %902 }
 0x206   : > { %v923_v7 = vsel %vm918_vm6, %v882_v26, %v903_v4 }
 0x207   : > { %936 = vst.msk [vmem:[%s1685_s21 + $0x40] sm:$0xff] %vm927_vm7, %v923_v7  ;;  %937 = vst.msk [vmem:[%s1685_s21 + $0x48] sm:$0xff] %vm927_vm7, %v923_v7 }
 0x209   : > { %v905_v9 = vpop.permute.xlu1 %904  ;;  %v907_v13 = vpop.permute.xlu0 %906 }
 0x20a   : > { %v924_v14 = vsel %vm918_vm6, %v883_v43, %v905_v9  ;;  %v925_v57 = vsel %vm918_vm6, %v884_v27, %v907_v13 }
 0x20b   : > { %938 = vst.msk [vmem:[%s1685_s21 + $0x50] sm:$0xff] %vm927_vm7, %v924_v14  ;;  %939 = vst.msk [vmem:[%s1685_s21 + $0x58] sm:$0xff] %vm927_vm7, %v924_v14 }
 0x20c   : > { %940 = vst.msk [vmem:[%s1685_s21 + $0x60] sm:$0xff] %vm927_vm7, %v925_v57  ;;  %941 = vst.msk [vmem:[%s1685_s21 + $0x68] sm:$0xff] %vm927_vm7, %v925_v57 }
 0x20d   : > { %v909_v51 = vpop.permute.xlu1 %908 }
 0x20e   : > { %v926_v54 = vsel %vm918_vm6, %v885_v61, %v909_v51 }
 0x20f   : > { %942 = vst.msk [vmem:[%s1685_s21 + $0x70] sm:$0xff] %vm927_vm7, %v926_v54  ;;  %943 = vst.msk [vmem:[%s1685_s21 + $0x78] sm:$0xff] %vm927_vm7, %v926_v54 }
 0x210 PF: > { %s14_s15 = sadd.s32 1, %s1267_s15  }
 0x211   : > { %p11_p4 = scmp.ge.s32.totalorder %s14_s15, 4  }
 0x213   :  { %13 = sbr.rel (!%p11_p4) target bundleno = 1 (0x1), region = 67 }

// kernel: db_head_forward.15
= control target key start
LH: loop header
LB: loop body
LE: loop exit
PB: predicated region body
PF: predicated region fallthrough
CT: control target
= control target key end

     0   :  { %s3014_s15 = smov 0   ;;  %s4385_s0 = inlined_call_operand.vmem [shape: f32[2,16,16,32], index: 0, kind: input, shape index: {}]   ;;  %s4386_s1 = inlined_call_operand.vmem [shape: bf16[288,8], index: 1, kind: input, shape index: {}]   ;;  %s4387_s2 = inlined_call_operand.vmem [shape: f32[1,8], index: 2, kind: input, shape index: {}]   ;;  %s4388_s3 = inlined_call_operand.vmem [shape: f32[1,8], index: 3, kind: input, shape index: {}]   ;;  %s4389_s4 = inlined_call_operand.vmem [shape: f32[2,16,16,8], index: 4, kind: output, shape index: {}]  }
   0x1 LB: > { %s2204_s16 = sadd.s32 4294967295, %s2983_s15   ;;  %p2208_p0 = scmp.ge.s32.totalorder %s2983_s15, 1  ;;  %s2983_s15 = sphi %s3014_s15, %s14_s15  }
   0x2   : > { %p162_p1 = scmp.lt.s32.totalorder %s2983_s15, 3 }
   0x4   : > { %p163_p2 = pnand %p2208_p0, %p162_p1 }
   0x6   : > { %166 = sbr.rel (%p163_p2) target bundleno = 567 (0x237), region = 36 }
   0xb   : > { %vm199_vm0 = vcmask 261120   ;;  %vm202_vm1 = vcmask 254976   ;;  %p3024_p3 = scmp.lt.s32.totalorder %s2204_s16, 1  ;;  %v2985_v0 = vmov 0.0   ;;  %v2927_v1 = vld [vmem:[%s4386_s1 + $0x78] sm:$0xff]   ;;  %v2929_v3 = vld [vmem:[%s4386_s1 + $0x70] sm:$0xff]  }
   0xc   : > { %200 = vst.msk [vmem:[#allocation2] sm:$0xff] %vm199_vm0, %v2985_v0  ;;  %201 = vst.msk [vmem:[#allocation2 + $0x8] sm:$0xff] %vm199_vm0, %v2985_v0  ;;  %v2928_v2 = vld [vmem:[%s4386_s1 + $0x38] sm:$0xff]   ;;  %2253 = vmatprep.subr.bf16.mxu0 %v2927_v1  ;;  %2419 = vmatprep.subr.bf16.mxu1 %v2927_v1  ;;  %v2930_v4 = vld [vmem:[%s4386_s1 + $0x30] sm:$0xff]   ;;  %vm422_vm2 = vcmask 1046528   ;;  %vm599_vm3 = vcmask 1045504  }
   0xd   : > { %203 = vst.msk [vmem:[#allocation2 + $0x10] sm:$0x3] %vm202_vm1, %v2985_v0  ;;  %206 = vst.msk [vmem:[#allocation2 + $0x28] sm:$0x3] %vm202_vm1, %v2985_v0  ;;  %s4527_s16 = smov (!%p3024_p3, %s2204_s16), 1  ;;  %2254 = vmatpush3.bf16.msra.mxu0 %v2928_v2  ;;  %2427 = vmatpush3.bf16.msra.mxu1 %v2928_v2  ;;  %s2986_s30 = smov 32  }
   0xe   : > { %204 = vst.msk [vmem:[#allocation2 + $0x18] sm:$0xff] %vm199_vm0, %v2985_v0  ;;  %205 = vst.msk [vmem:[#allocation2 + $0x20] sm:$0xff] %vm199_vm0, %v2985_v0  ;;  %s2251_s22 = sshll.u32 %s4527_s16, 8  ;;  %2255 = vmatprep.subr.bf16.mxu0 %v2929_v3  ;;  %2420 = vmatprep.subr.bf16.mxu1 %v2929_v3  ;;  %s2987_s5 = smov 64   ;;  %vm1282_vm4 = vcmask 523264   ;;  %vm1315_vm5 = vcmask 785408  }
   0xf   : > { %207 = vst.msk [vmem:[#allocation2 + $0x30] sm:$0xff] %vm199_vm0, %v2985_v0  ;;  %208 = vst.msk [vmem:[#allocation2 + $0x38] sm:$0xff] %vm199_vm0, %v2985_v0  ;;  %s3103_s27 = scalar_lea.vmem %s4385_s0, %s2251_s22  ;;  %s2988_s18 = smov 96   ;;  %vm2116_vm6 = vcmask 64512  }
  0x10   : > { %209 = vst.msk [vmem:[#allocation2 + $0x40] sm:$0x3] %vm202_vm1, %v2985_v0  ;;  %212 = vst.msk [vmem:[#allocation2 + $0x58] sm:$0x3] %vm202_vm1, %v2985_v0  ;;  %v257_v5 = vld [vmem:[%s3103_s27 + $0x10] sm:$0xff]  ;;  %v258_v6 = vld [vmem:[%s3103_s27 + $0x18] sm:$0xff]  ;;  %s4227_s20 = scalar_lea.vmem %s4389_s4, %s2251_s22 }
  0x11   : > { %210 = vst.msk [vmem:[#allocation2 + $0x48] sm:$0xff] %vm199_vm0, %v2985_v0  ;;  %211 = vst.msk [vmem:[#allocation2 + $0x50] sm:$0xff] %vm199_vm0, %v2985_v0  ;;  %v255_v7 = vld [vmem:[%s3103_s27] sm:$0xff]  ;;  %v256_v8 = vld [vmem:[%s3103_s27 + $0x8] sm:$0xff]  ;;  %2256 = vmatpush3.bf16.msra.mxu0 %v2930_v4  ;;  %2428 = vmatpush3.bf16.msra.mxu1 %v2930_v4 }
  0x12   : > { %213 = vst.msk [vmem:[#allocation2 + $0x60] sm:$0xff] %vm199_vm0, %v2985_v0  ;;  %214 = vst.msk [vmem:[#allocation2 + $0x68] sm:$0xff] %vm199_vm0, %v2985_v0  ;;  %v259_v9 = vld [vmem:[%s3103_s27 + $0x20] sm:$0xff]  ;;  %v260_v10 = vld [vmem:[%s3103_s27 + $0x28] sm:$0xff] }
  0x13   : > { %215 = vst.msk [vmem:[#allocation2 + $0x70] sm:$0x3] %vm202_vm1, %v2985_v0  ;;  %218 = vst.msk [vmem:[#allocation2 + $0x88] sm:$0x3] %vm202_vm1, %v2985_v0  ;;  %v320_v11 = vld [vmem:[#allocation2] sm:$0xff]  ;;  %v321_v12 = vld [vmem:[#allocation2 + $0x8] sm:$0xff] }
  0x14   : > { %216 = vst.msk [vmem:[#allocation2 + $0x78] sm:$0xff] %vm199_vm0, %v2985_v0  ;;  %217 = vst.msk [vmem:[#allocation2 + $0x80] sm:$0xff] %vm199_vm0, %v2985_v0  ;;  %v322_v13 = vld [vmem:[#allocation2 + $0x10] sm:$0x3]  ;;  %v423_v14 = vrot.slane %v320_v11, 1  ;;  %v424_v15 = vrot.slane %v321_v12, 1 }
  0x15   : > { %219 = vst.msk [vmem:[#allocation2 + $0x90] sm:$0xff] %vm199_vm0, %v2985_v0  ;;  %220 = vst.msk [vmem:[#allocation2 + $0x98] sm:$0xff] %vm199_vm0, %v2985_v0  ;;  %v426_v16 = vrot.slane %v322_v13, 1  ;;  %v603_v17 = vrot.slane %v322_v13, 2  ;;  %v261_v18 = vld [vmem:[%s3103_s27 + $0x30] sm:$0xff]  ;;  %v262_v19 = vld [vmem:[%s3103_s27 + $0x38] sm:$0xff] }
  0x16   : > { %221 = vst.msk [vmem:[#allocation2 + $0xa0] sm:$0x3] %vm202_vm1, %v2985_v0  ;;  %224 = vst.msk [vmem:[#allocation2 + $0xb8] sm:$0x3] %vm202_vm1, %v2985_v0  ;;  %v600_v20 = vrot.slane %v320_v11, 2  ;;  %v601_v21 = vrot.slane %v321_v12, 2  ;;  %v425_v25 = vsel %vm422_vm2, %v423_v14, %v424_v15 }
  0x17   : > { %222 = vst.msk [vmem:[#allocation2 + $0xa8] sm:$0xff] %vm199_vm0, %v2985_v0  ;;  %223 = vst.msk [vmem:[#allocation2 + $0xb0] sm:$0xff] %vm199_vm0, %v2985_v0  ;;  %v263_v22 = vld [vmem:[%s3103_s27 + $0x40] sm:$0xff]  ;;  %v264_v23 = vld [vmem:[%s3103_s27 + $0x48] sm:$0xff]  ;;  %v427_v26 = vsel %vm422_vm2, %v424_v15, %v426_v16 }
  0x18   : > { %225 = vst.msk [vmem:[#allocation2 + $0xc0] sm:$0xff] %vm199_vm0, %v2985_v0  ;;  %226 = vst.msk [vmem:[#allocation2 + $0xc8] sm:$0xff] %vm199_vm0, %v2985_v0  ;;  %v279_v24 = vld [vmem:[%s3103_s27 + $0xc0] sm:$0xff]  ;;  %v280_v27 = vld [vmem:[%s3103_s27 + $0xc8] sm:$0xff]  ;;  %v2447_v30 = vpack.i.bf16 %v427_v26, %v425_v25  ;;  %v602_v31 = vsel %vm599_vm3, %v600_v20, %v601_v21  ;;  %v604_v32 = vsel %vm599_vm3, %v601_v21, %v603_v17 }
  0x19   : > { %227 = vst.msk [vmem:[#allocation2 + $0xd0] sm:$0x3] %vm202_vm1, %v2985_v0  ;;  %230 = vst.msk [vmem:[#allocation2 + $0xe8] sm:$0x3] %vm202_vm1, %v2985_v0  ;;  %v277_v28 = vld [vmem:[%s3103_s27 + $0xb0] sm:$0xff]  ;;  %v278_v29 = vld [vmem:[%s3103_s27 + $0xb8] sm:$0xff]  ;;  %v2452_v41 = vpack.i.bf16 %v604_v32, %v602_v31 }
  0x1a   : > { %228 = vst.msk [vmem:[#allocation2 + $0xd8] sm:$0xff] %vm199_vm0, %v2985_v0  ;;  %229 = vst.msk [vmem:[#allocation2 + $0xe0] sm:$0xff] %vm199_vm0, %v2985_v0  ;;  %v281_v33 = vld [vmem:[%s3103_s27 + $0xd0] sm:$0xff]  ;;  %v282_v34 = vld [vmem:[%s3103_s27 + $0xd8] sm:$0xff]  ;;  %2448 = vrot.lane.b32.xlu0 %v2447_v30, %s2986_s30 }
  0x1b   : > { %231 = vst.msk [vmem:[#allocation2 + $0xf0] sm:$0xff] %vm199_vm0, %v2985_v0  ;;  %232 = vst.msk [vmem:[#allocation2 + $0xf8] sm:$0xff] %vm199_vm0, %v2985_v0  ;;  %v283_v35 = vld [vmem:[%s3103_s27 + $0xe0] sm:$0xff]  ;;  %v284_v36 = vld [vmem:[%s3103_s27 + $0xe8] sm:$0xff] }
  0x1c   : > { %233 = vst.msk [vmem:[#allocation2 + $0x100] sm:$0x3] %vm202_vm1, %v2985_v0  ;;  %236 = vst.msk [vmem:[#allocation2 + $0x118] sm:$0x3] %vm202_vm1, %v2985_v0  ;;  %v285_v37 = vld [vmem:[%s3103_s27 + $0xf0] sm:$0xff]  ;;  %v286_v38 = vld [vmem:[%s3103_s27 + $0xf8] sm:$0xff] }
  0x1d   : > { %234 = vst.msk [vmem:[#allocation2 + $0x108] sm:$0xff] %vm199_vm0, %v2985_v0  ;;  %235 = vst.msk [vmem:[#allocation2 + $0x110] sm:$0xff] %vm199_vm0, %v2985_v0 }
  0x1e   : > { %237 = vst.msk [vmem:[#allocation2 + $0x120] sm:$0xff] %vm199_vm0, %v2985_v0  ;;  %238 = vst.msk [vmem:[#allocation2 + $0x128] sm:$0xff] %vm199_vm0, %v2985_v0  ;;  %2453 = vrot.lane.b32.xlu0 %v2452_v41, %s2987_s5 }
  0x1f   : > { %239 = vst.msk [vmem:[#allocation2 + $0x130] sm:$0x3] %vm202_vm1, %v2985_v0  ;;  %242 = vst.msk [vmem:[#allocation2 + $0x148] sm:$0x3] %vm202_vm1, %v2985_v0 }
  0x20   : > { %240 = vst.msk [vmem:[#allocation2 + $0x138] sm:$0xff] %vm199_vm0, %v2985_v0  ;;  %241 = vst.msk [vmem:[#allocation2 + $0x140] sm:$0xff] %vm199_vm0, %v2985_v0 }
  0x21   : > { %243 = vst.msk [vmem:[#allocation2 + $0x150] sm:$0xff] %vm199_vm0, %v2985_v0  ;;  %244 = vst.msk [vmem:[#allocation2 + $0x158] sm:$0xff] %vm199_vm0, %v2985_v0 }
  0x22   : > { %245 = vst.msk [vmem:[#allocation2 + $0x160] sm:$0x3] %vm202_vm1, %v2985_v0  ;;  %248 = vst.msk [vmem:[#allocation2 + $0x178] sm:$0x3] %vm202_vm1, %v2985_v0 }
  0x23   : > { %246 = vst.msk [vmem:[#allocation2 + $0x168] sm:$0xff] %vm199_vm0, %v2985_v0  ;;  %247 = vst.msk [vmem:[#allocation2 + $0x170] sm:$0xff] %vm199_vm0, %v2985_v0 }
  0x24   : > { %249 = vst.msk [vmem:[#allocation2 + $0x180] sm:$0xff] %vm199_vm0, %v2985_v0  ;;  %250 = vst.msk [vmem:[#allocation2 + $0x188] sm:$0xff] %vm199_vm0, %v2985_v0 }
  0x25   : > { %251 = vst.msk [vmem:[#allocation2 + $0x190] sm:$0x3] %vm202_vm1, %v2985_v0  ;;  %254 = vst.msk [vmem:[#allocation2 + $0x1a8] sm:$0x3] %vm202_vm1, %v2985_v0 }
  0x26   : > { %252 = vst.msk [vmem:[#allocation2 + $0x198] sm:$0xff] %vm199_vm0, %v2985_v0  ;;  %253 = vst.msk [vmem:[#allocation2 + $0x1a0] sm:$0xff] %vm199_vm0, %v2985_v0 }
  0x27   : > { %290 = vst.msk [vmem:[#allocation2 + $0x31] sm:$0xff] %vm199_vm0, %v257_v5  ;;  %291 = vst.msk [vmem:[#allocation2 + $0x39] sm:$0xff] %vm199_vm0, %v258_v6 }
  0x28   : > { %288 = vst.msk [vmem:[#allocation2 + $0x19] sm:$0xff] %vm199_vm0, %v255_v7  ;;  %289 = vst.msk [vmem:[#allocation2 + $0x21] sm:$0xff] %vm199_vm0, %v256_v8 }
  0x29   : > { %292 = vst.msk [vmem:[#allocation2 + $0x49] sm:$0xff] %vm199_vm0, %v259_v9  ;;  %293 = vst.msk [vmem:[#allocation2 + $0x51] sm:$0xff] %vm199_vm0, %v260_v10 }
  0x2a   : > { %294 = vst.msk [vmem:[#allocation2 + $0x61] sm:$0xff] %vm199_vm0, %v261_v18  ;;  %295 = vst.msk [vmem:[#allocation2 + $0x69] sm:$0xff] %vm199_vm0, %v262_v19 }
  0x2b   : > { %296 = vst.msk [vmem:[#allocation2 + $0x79] sm:$0xff] %vm199_vm0, %v263_v22  ;;  %297 = vst.msk [vmem:[#allocation2 + $0x81] sm:$0xff] %vm199_vm0, %v264_v23 }
  0x2c   : > { %312 = vst.msk [vmem:[#allocation2 + $0x139] sm:$0xff] %vm199_vm0, %v279_v24  ;;  %313 = vst.msk [vmem:[#allocation2 + $0x141] sm:$0xff] %vm199_vm0, %v280_v27 }
  0x2d   : > { %310 = vst.msk [vmem:[#allocation2 + $0x121] sm:$0xff] %vm199_vm0, %v277_v28  ;;  %311 = vst.msk [vmem:[#allocation2 + $0x129] sm:$0xff] %vm199_vm0, %v278_v29 }
  0x2e   : > { %314 = vst.msk [vmem:[#allocation2 + $0x151] sm:$0xff] %vm199_vm0, %v281_v33  ;;  %315 = vst.msk [vmem:[#allocation2 + $0x159] sm:$0xff] %vm199_vm0, %v282_v34  ;;  %v3150_v39 = vld [vmem:[#allocation2 + $0x30] sm:$0xff]  ;;  %v3152_v40 = vld [vmem:[#allocation2 + $0x38] sm:$0xff] }
  0x2f   : > { %316 = vst.msk [vmem:[#allocation2 + $0x169] sm:$0xff] %vm199_vm0, %v283_v35  ;;  %v3154_v42 = vld [vmem:[#allocation2 + $0x40] sm:$0x3]  ;;  %317 = vst.msk [vmem:[#allocation2 + $0x171] sm:$0xff] %vm199_vm0, %v284_v36  ;;  %v3161_v43 = vpack.i.bf16 %v3152_v40, %v3150_v39  ;;  %v433_v44 = vrot.slane %v3150_v39, 1  ;;  %v434_v45 = vrot.slane %v3152_v40, 1 }
  0x30   : > { %318 = vst.msk [vmem:[#allocation2 + $0x181] sm:$0xff] %vm199_vm0, %v285_v37  ;;  %319 = vst.msk [vmem:[#allocation2 + $0x189] sm:$0xff] %vm199_vm0, %v286_v38  ;;  %v436_v46 = vrot.slane %v3154_v42, 1  ;;  %v3166_v47 = vld [vmem:[#allocation2 + $0x18] sm:$0xff]  ;;  %v3168_v48 = vld [vmem:[#allocation2 + $0x20] sm:$0xff] }
  0x31   : > { %v3170_v49 = vld [vmem:[#allocation2 + $0x48] sm:$0xff]  ;;  %v428_v51 = vrot.slane %v3166_v47, 1  ;;  %v429_v52 = vrot.slane %v3168_v48, 1  ;;  %v3174_v53 = vld [vmem:[#allocation2 + $0x50] sm:$0xff]  ;;  %2458 = vrot.lane.b32.xlu1 %v3161_v43, %s2987_s5  ;;  %v3180_v55 = vsel %vm422_vm2, %v433_v44, %v434_v45  ;;  %v3185_v58 = vld [vmem:[#allocation2 + $0x58] sm:$0x3] }
  0x32   : > { %v325_v50 = vld [vmem:[#allocation2 + $0x28] sm:$0x3]  ;;  %v438_v54 = vrot.slane %v3170_v49, 1  ;;  %v3183_v56 = vsel %vm422_vm2, %v434_v45, %v436_v46  ;;  %v439_v59 = vrot.slane %v3174_v53, 1  ;;  %v3188_v60 = vld [vmem:[#allocation2 + $0x60] sm:$0xff]  ;;  %v441_v0 = vrot.slane %v3185_v58, 1 }
  0x33   : > { %v431_v57 = vrot.slane %v325_v50, 1  ;;  %v3190_v61 = vld [vmem:[#allocation2 + $0x68] sm:$0xff]  ;;  %v3195_v62 = vpack.i.bf16 %v3183_v56, %v3180_v55  ;;  %v3198_v63 = vsel %vm422_vm2, %v428_v51, %v429_v52  ;;  %v3201_v1 = vld [vmem:[#allocation2 + $0x70] sm:$0x3]  ;;  %v443_v2 = vrot.slane %v3188_v60, 1  ;;  %v3204_v3 = vld [vmem:[#allocation2 + $0x78] sm:$0xff] }
  0x34   : > { %v3206_v4 = vld [vmem:[#allocation2 + $0x80] sm:$0xff]  ;;  %v3212_v6 = vsel %vm422_vm2, %v438_v54, %v439_v59  ;;  %v444_v7 = vrot.slane %v3190_v61, 1  ;;  %v446_v8 = vrot.slane %v3201_v1, 1  ;;  %v3216_v9 = vld [vmem:[#allocation2 + $0x88] sm:$0x3]  ;;  %v3221_v11 = vsel %vm422_vm2, %v439_v59, %v441_v0  ;;  %v3225_v14 = vld [vmem:[#allocation2 + $0x138] sm:$0xff] }
  0x35   : > { %v3209_v5 = vsel %vm422_vm2, %v429_v52, %v431_v57  ;;  %v448_v12 = vrot.slane %v3204_v3, 1  ;;  %v449_v13 = vrot.slane %v3206_v4, 1  ;;  %v3227_v15 = vld [vmem:[#allocation2 + $0x140] sm:$0xff]  ;;  %2468 = vrot.lane.b32.xlu1 %v3195_v62, %s2986_s30  ;;  %v3233_v16 = vpack.i.bf16 %v3221_v11, %v3212_v6  ;;  %v3242_v20 = vld [vmem:[#allocation2 + $0x148] sm:$0x3]  ;;  %v265_v38 = vld [vmem:[%s3103_s27 + $0x50] sm:$0xff] }
  0x36   : > { %v2462_v10 = vpack.i.bf16 %v3209_v5, %v3198_v63  ;;  %v3236_v17 = vsel %vm422_vm2, %v443_v2, %v444_v7  ;;  %v3239_v18 = vsel %vm422_vm2, %v444_v7, %v446_v8  ;;  %v451_v19 = vrot.slane %v3216_v9, 1  ;;  %v3254_v25 = vld [vmem:[#allocation2 + $0x120] sm:$0xff]  ;;  %v3261_v30 = vld [vmem:[#allocation2 + $0x128] sm:$0xff]  ;;  %v358_v31 = vld [vmem:[#allocation2 + $0x130] sm:$0x3]  ;;  %298 = vst.msk [vmem:[#allocation2 + $0x91] sm:$0xff] %vm199_vm0, %v265_v38 }
  0x37   : > { %4433 = vst [vmem:[#allocation3_spill] sm:$0xff] %v3236_v17  ;;  %v3247_v21 = vpack.i.bf16 %v3239_v18, %v3236_v17  ;;  %v3250_v22 = vsel %vm422_vm2, %v448_v12, %v449_v13  ;;  %v605_v23 = vrot.slane %v3166_v47, 2  ;;  %v606_v24 = vrot.slane %v3168_v48, 2  ;;  %v267_v51 = vld [vmem:[%s3103_s27 + $0x60] sm:$0xff]  ;;  %v268_v52 = vld [vmem:[%s3103_s27 + $0x68] sm:$0xff]  ;;  %v3289_v54 = vld [vmem:[#allocation2 + $0x150] sm:$0xff] }
  0x38   : > { %2463 = vrot.lane.b32.xlu0 %v2462_v10, %s2986_s30  ;;  %4434 = vst [vmem:[#allocation4_spill] sm:$0xff] %v3250_v22  ;;  %v3257_v26 = vsel %vm422_vm2, %v449_v13, %v451_v19  ;;  %v608_v27 = vrot.slane %v325_v50, 2  ;;  %v665_v28 = vrot.slane %v3225_v14, 2  ;;  %v666_v29 = vrot.slane %v3227_v15, 2  ;;  %v266_v50 = vld [vmem:[%s3103_s27 + $0x58] sm:$0xff]  ;;  %300 = vst.msk [vmem:[#allocation2 + $0xa9] sm:$0xff] %vm199_vm0, %v267_v51 }
  0x39   : > { %4435 = vst [vmem:[#allocation5_spill] sm:$0xff] %v3257_v26  ;;  %v607_v32 = vsel %vm599_vm3, %v605_v23, %v606_v24  ;;  %v668_v33 = vrot.slane %v3242_v20, 2  ;;  %2473 = vrot.lane.b32.xlu1 %v3233_v16, %s2986_s30  ;;  %v3269_v34 = vpack.i.bf16 %v3257_v26, %v3250_v22  ;;  %v483_v37 = vrot.slane %v3254_v25, 1  ;;  %v3291_v57 = vld [vmem:[#allocation2 + $0x158] sm:$0xff]  ;;  %299 = vst.msk [vmem:[#allocation2 + $0x99] sm:$0xff] %vm199_vm0, %v266_v50  ;;  %v2931_v59 = vld [vmem:[%s4386_s1 + $0x68] sm:$0xff]  }
  0x3a   : > { %v609_v35 = vsel %vm599_vm3, %v606_v24, %v608_v27  ;;  %v3273_v36 = vsel %vm599_vm3, %v665_v28, %v666_v29  ;;  %v484_v45 = vrot.slane %v3261_v30, 1  ;;  %v486_v46 = vrot.slane %v358_v31, 1  ;;  %301 = vst.msk [vmem:[#allocation2 + $0xb1] sm:$0xff] %vm199_vm0, %v268_v52  ;;  %v2932_v0 = vld [vmem:[%s4386_s1 + $0x28] sm:$0xff]   ;;  %v3302_v2 = vld [vmem:[#allocation2 + $0x160] sm:$0x3]  ;;  %2257 = vmatprep.subr.bf16.mxu0 %v2931_v59  ;;  %2421 = vmatprep.subr.bf16.mxu1 %v2931_v59 }
  0x3b   : > { %4436 = vst [vmem:[#allocation6_spill] sm:$0xff] %v3273_v36  ;;  %v3279_v41 = vpack.i.bf16 %v609_v35, %v607_v32  ;;  %v3282_v44 = vsel %vm599_vm3, %v666_v29, %v668_v33  ;;  %v2933_v7 = vld [vmem:[%s4386_s1 + $0x60] sm:$0xff]   ;;  %v660_v10 = vrot.slane %v3254_v25, 2  ;;  %v269_v12 = vld [vmem:[%s3103_s27 + $0x70] sm:$0xff]  ;;  %v661_v23 = vrot.slane %v3261_v30, 2  ;;  %2258 = vmatpush3.bf16.msra.mxu0 %v2932_v0  ;;  %v270_v27 = vld [vmem:[%s3103_s27 + $0x78] sm:$0xff]  ;;  %2429 = vmatpush3.bf16.msra.mxu1 %v2932_v0 }
  0x3c   : > { %2478 = vrot.lane.b32.xlu0 %v3247_v21, %s2986_s30  ;;  %4437 = vst [vmem:[#allocation7_spill] sm:$0xff] %v3282_v44  ;;  %v3311_v8 = vpack.i.bf16 %v3282_v44, %v3273_v36  ;;  %v3318_v13 = vsel %vm422_vm2, %v483_v37, %v484_v45  ;;  %v3321_v19 = vsel %vm422_vm2, %v484_v45, %v486_v46  ;;  %v663_v24 = vrot.slane %v358_v31, 2  ;;  %v2934_v28 = vld [vmem:[%s4386_s1 + $0x20] sm:$0xff]   ;;  %v2935_v29 = vld [vmem:[%s4386_s1 + $0x58] sm:$0xff]   ;;  %v2937_v50 = vld [vmem:[%s4386_s1 + $0x50] sm:$0xff]  }
  0x3d   : > { %2483 = vrot.lane.b32.xlu1 %v3269_v34, %s2986_s30  ;;  %4438 = vst [vmem:[#allocation8_spill] sm:$0xff] %v3318_v13  ;;  %4439 = vst [vmem:[#allocation9_spill] sm:$0xff] %v3321_v19  ;;  %2259 = vmatprep.subr.bf16.mxu0 %v2933_v7  ;;  %v493_v32 = vrot.slane %v3289_v54, 1  ;;  %v494_v31 = vrot.slane %v3291_v57, 1  ;;  %v3339_v33 = vpack.i.bf16 %v3321_v19, %v3318_v13  ;;  %v496_v35 = vrot.slane %v3302_v2, 1  ;;  %v2936_v46 = vld [vmem:[%s4386_s1 + $0x18] sm:$0xff]  }
  0x3e   : > { %302 = vst.msk [vmem:[#allocation2 + $0xc1] sm:$0xff] %vm199_vm0, %v269_v12  ;;  %303 = vst.msk [vmem:[#allocation2 + $0xc9] sm:$0xff] %vm199_vm0, %v270_v27  ;;  %2422 = vmatprep.subr.bf16.mxu1 %v2933_v7  ;;  %v2507_v37 = vpack.i.bf16 %v3168_v48, %v3166_v47  ;;  %v3347_v38 = vsel %vm599_vm3, %v660_v10, %v661_v23  ;;  %v3350_v45 = vsel %vm599_vm3, %v661_v23, %v663_v24  ;;  %v2938_v23 = vld [vmem:[%s4386_s1 + $0x10] sm:$0xff]   ;;  %v271_v24 = vld [vmem:[%s3103_s27 + $0x80] sm:$0xff] }
  0x3f   : > { %4440 = vst [vmem:[#allocation10_spill] sm:$0xff] %v3347_v38  ;;  %4441 = vst [vmem:[#allocation11_spill] sm:$0xff] %v3350_v45  ;;  %2260 = vmatpush3.bf16.msra.mxu0 %v2934_v28  ;;  %v3363_v47 = vsel %vm422_vm2, %v493_v32, %v494_v31  ;;  %2430 = vmatpush3.bf16.msra.mxu1 %v2934_v28  ;;  %v3369_v48 = vpack.i.bf16 %v3350_v45, %v3347_v38  ;;  %v610_v52 = vrot.slane %v3150_v39, 2  ;;  %v272_v27 = vld [vmem:[%s3103_s27 + $0x88] sm:$0xff] }
  0x40   : > { %2488 = vrot.lane.b32.xlu0 %v3279_v41, %s2986_s30  ;;  %2261 = vmatprep.subr.bf16.mxu0 %v2935_v29  ;;  %v3372_v51 = vsel %vm422_vm2, %v494_v31, %v496_v35  ;;  %v611_v59 = vrot.slane %v3152_v40, 2  ;;  %v613_v0 = vrot.slane %v3154_v42, 2  ;;  %v615_v7 = vrot.slane %v3170_v49, 2  ;;  %v2939_v42 = vld [vmem:[%s4386_s1 + $0x48] sm:$0xff]   ;;  %304 = vst.msk [vmem:[#allocation2 + $0xd9] sm:$0xff] %vm199_vm0, %v271_v24  ;;  %305 = vst.msk [vmem:[#allocation2 + $0xe1] sm:$0xff] %vm199_vm0, %v272_v27 }
  0x41   : > { %2493 = vrot.lane.b32.xlu1 %v3311_v8, %s2986_s30  ;;  %2423 = vmatprep.subr.bf16.mxu1 %v2935_v29  ;;  %v616_v10 = vrot.slane %v3174_v53, 2  ;;  %v618_v12 = vrot.slane %v3185_v58, 2  ;;  %v3399_v58 = vpack.i.bf16 %v3372_v51, %v3363_v47  ;;  %v2527_v28 = vpack.i.bf16 %v3227_v15, %v3225_v14  ;;  %v276_v24 = vld [vmem:[%s3103_s27 + $0xa8] sm:$0xff]  ;;  %v343_v19 = vld [vmem:[#allocation2 + $0xb8] sm:$0x3] }
  0x42   : > { %v3410_v32 = vsel %vm599_vm3, %v610_v52, %v611_v59  ;;  %v3413_v31 = vsel %vm599_vm3, %v611_v59, %v613_v0  ;;  %v670_v35 = vrot.slane %v3289_v54, 2  ;;  %v3423_v52 = vld [vmem:[#allocation2 + $0x188] sm:$0xff]  ;;  %v274_v59 = vld [vmem:[%s3103_s27 + $0x98] sm:$0xff]  ;;  %v488_v0 = vrot.slane %v3225_v14, 1  ;;  %309 = vst.msk [vmem:[#allocation2 + $0x111] sm:$0xff] %vm199_vm0, %v276_v24 }
  0x43   : > { %2262 = vmatpush3.bf16.msra.mxu0 %v2936_v46  ;;  %v3385_v39 = vsel %vm599_vm3, %v615_v7, %v616_v10  ;;  %v3388_v40 = vsel %vm599_vm3, %v616_v10, %v618_v12  ;;  %2431 = vmatpush3.bf16.msra.mxu1 %v2936_v46  ;;  %4444 = vst [vmem:[#allocation14_spill] sm:$0xff] %v3410_v32  ;;  %4445 = vst [vmem:[#allocation15_spill] sm:$0xff] %v3413_v31  ;;  %v673_v46 = vrot.slane %v3302_v2, 2  ;;  %v3418_v7 = vld [vmem:[#allocation2 + $0x180] sm:$0xff]  ;;  %v3438_v12 = vld [vmem:[#allocation2 + $0x190] sm:$0x3] }
  0x44   : > { %2498 = vrot.lane.b32.xlu0 %v3195_v62, %s2988_s18  ;;  %v3360_v62 = vpack.i.bf16 %v3291_v57, %v3289_v54  ;;  %2263 = vmatprep.subr.bf16.mxu0 %v2937_v50  ;;  %4442 = vst [vmem:[#allocation12_spill] sm:$0xff] %v3385_v39  ;;  %4443 = vst [vmem:[#allocation13_spill] sm:$0xff] %v3388_v40  ;;  %v2941_v54 = vld [vmem:[%s4386_s1 + $0x40] sm:$0xff]   ;;  %v3434_v2 = vpack.i.bf16 %v3413_v31, %v3410_v32  ;;  %v489_v10 = vrot.slane %v3227_v15, 1  ;;  %v341_v13 = vld [vmem:[#allocation2 + $0xa8] sm:$0xff] }
  0x45   : > { %2503 = vrot.lane.b32.xlu1 %v3339_v33, %s2986_s30  ;;  %2424 = vmatprep.subr.bf16.mxu1 %v2937_v50  ;;  %v2940_v50 = vld [vmem:[%s4386_s1 + $0x8] sm:$0xff]   ;;  %307 = vst.msk [vmem:[#allocation2 + $0xf9] sm:$0xff] %vm199_vm0, %v274_v59  ;;  %v2537_v27 = vpack.i.bf16 %v3174_v53, %v3170_v49  ;;  %v491_v29 = vrot.slane %v3242_v20, 1  ;;  %v912_v14 = vrot.slane %v3418_v7, 2  ;;  %v2942_v49 = vld [vmem:[%s4386_s1] sm:$0xff]   ;;  %v915_v53 = vrot.slane %v3438_v12, 2 }
  0x46   : > { %v366_v59 = vld [vmem:[#allocation2 + $0x170] sm:$0xff] }
  0x47   : > { %2264 = vmatpush3.bf16.msra.mxu0 %v2938_v23  ;;  %2432 = vmatpush3.bf16.msra.mxu1 %v2938_v23  ;;  %v275_v23 = vld [vmem:[%s3103_s27 + $0xa0] sm:$0xff] }
  0x48   : > { %2508 = vrot.lane.b32.xlu0 %v2507_v37, %s2988_s18  ;;  %v671_v37 = vrot.slane %v3291_v57, 2  ;;  %2265 = vmatprep.subr.bf16.mxu0 %v2939_v42  ;;  %v273_v57 = vld [vmem:[%s3103_s27 + $0x90] sm:$0xff]  ;;  %308 = vst.msk [vmem:[#allocation2 + $0x109] sm:$0xff] %vm199_vm0, %v275_v23  ;;  %v367_v23 = vld [vmem:[#allocation2 + $0x178] sm:$0x3] }
  0x49   : > { %2513 = vrot.lane.b32.xlu1 %v3360_v62, %s2987_s5  ;;  %2425 = vmatprep.subr.bf16.mxu1 %v2939_v42  ;;  %306 = vst.msk [vmem:[#allocation2 + $0xf1] sm:$0xff] %vm199_vm0, %v273_v57  ;;  %v913_v57 = vrot.slane %v3423_v52, 2 }
  0x4a   : > { %v3452_v15 = vsel %vm599_vm3, %v670_v35, %v671_v37  ;;  %v3455_v42 = vsel %vm599_vm3, %v671_v37, %v673_v46  ;;  %v3474_v37 = vsel %vm422_vm2, %v488_v0, %v489_v10  ;;  %v3477_v46 = vsel %vm422_vm2, %v489_v10, %v491_v29 }
  0x4b   : > { %4446 = vst [vmem:[#allocation16_spill] sm:$0xff] %v3452_v15  ;;  %4447 = vst [vmem:[#allocation17_spill] sm:$0xff] %v3455_v42  ;;  %2266 = vmatpush3.bf16.msra.mxu0 %v2940_v50  ;;  %2433 = vmatpush3.bf16.msra.mxu1 %v2940_v50  ;;  %v2547_v20 = vpack.i.bf16 %v3455_v42, %v3452_v15  ;;  %v3471_v35 = vsel %vm599_vm3, %v913_v57, %v915_v53  ;;  %v499_v29 = vrot.slane %v366_v59, 1  ;;  %v3588_v50 = vld [vmem:[%s4386_s1 + $0x88] sm:$0xff]   ;;  %v348_v42 = vld [vmem:[#allocation2 + $0xe0] sm:$0xff] }
  0x4c   : > { %2518 = vrot.lane.b32.xlu0 %v3369_v48, %s2987_s5  ;;  %2267 = vmatprep.subr.bf16.mxu0 %v2941_v54  ;;  %4449 = vst [vmem:[#allocation19_spill] sm:$0xff] %v3471_v35  ;;  %v3486_v0 = vpack.i.bf16 %v3477_v46, %v3474_v37  ;;  %v501_v10 = vrot.slane %v367_v23, 1  ;;  %v349_v15 = vld [vmem:[#allocation2 + $0xe8] sm:$0x3]  ;;  %v3763_v26 = vld [vmem:[#allocation2 + $0x100] sm:$0x3] }
  0x4d   : > { %2523 = vrot.lane.b32.xlu1 %v3399_v58, %s2988_s18  ;;  %2426 = vmatprep.subr.bf16.mxu1 %v2941_v54  ;;  %v365_v54 = vld [vmem:[#allocation2 + $0x168] sm:$0xff]  ;;  %v476_v17 = vrot.slane %v3763_v26, 1 }
  0x4e   : > { %v498_v24 = vrot.slane %v365_v54, 1  ;;  %v675_v53 = vrot.slane %v365_v54, 2 }
  0x4f   : > { %2268 = vmatpush3.bf16.msra.mxu0 %v2942_v49  ;;  %2434 = vmatpush3.bf16.msra.mxu1 %v2942_v49 }
  0x50   : > { %2528 = vrot.lane.b32.xlu0 %v2527_v28, %s2988_s18  ;;  %v3468_v28 = vsel %vm599_vm3, %v912_v14, %v913_v57  ;;  %v2567_v14 = vpack.i.bf16 %v366_v59, %v365_v54  ;;  %v3493_v57 = vsel %vm422_vm2, %v498_v24, %v499_v29  ;;  %v676_v24 = vrot.slane %v366_v59, 2  ;;  %2383 = vmatprep.subr.bf16.mxu1 %v3588_v50 }
  0x51   : > { %2533 = vrot.lane.b32.xlu1 %v3434_v2, %s2986_s30  ;;  %4448 = vst [vmem:[#allocation18_spill] sm:$0xff] %v3468_v28  ;;  %v876_v59 = vrot.slane %v3423_v52, 1 }
  0x54   : > { %2538 = vrot.lane.b32.xlu0 %v2537_v27, %s2987_s5 }
  0x55   : > { %2543 = vrot.lane.b32.xlu1 %v3279_v41, %s2987_s5  ;;  %v3496_v41 = vsel %vm422_vm2, %v499_v29, %v501_v10  ;;  %v678_v29 = vrot.slane %v367_v23, 2  ;;  %v3514_v10 = vsel %vm599_vm3, %v675_v53, %v676_v24  ;;  %v878_v23 = vrot.slane %v3438_v12, 1 }
  0x56   : > { %v2577_v49 = vpack.i.bf16 %v3496_v41, %v3493_v57  ;;  %4450 = vst [vmem:[#allocation20_spill] sm:$0xff] %v3514_v10  ;;  %v2622_v53 = vpack.i.bf16 %v3423_v52, %v3418_v7  ;;  %v623_v12 = vrot.slane %v3201_v1, 2  ;;  %v2647_v1 = vpack.i.bf16 %v3206_v4, %v3204_v3 }
  0x57   : > { %v2657_v52 = vpack.i.bf16 %v3471_v35, %v3468_v28 }
  0x58   : > { %2548 = vrot.lane.b32.xlu0 %v2547_v20, %s2986_s30 }
  0x59   : > { %2553 = vrot.lane.b32.xlu1 %v3233_v16, %s2988_s18  ;;  %v2587_v16 = vpack.i.bf16 %v3388_v40, %v3385_v39  ;;  %v471_v39 = vrot.slane %v349_v15, 1 }
  0x5c   : > { %2558 = vrot.lane.b32.xlu0 %v3486_v0, %s2986_s30 }
  0x5d   : > { %2563 = vrot.lane.b32.xlu1 %v3161_v43, %s2988_s18  ;;  %v2592_v43 = vpack.i.bf16 %v3190_v61, %v3188_v60 }
  0x60   : > { %2568 = vrot.lane.b32.xlu0 %v2567_v14, %s2987_s5 }
  0x61   : > { %2573 = vrot.lane.b32.xlu1 %v3311_v8, %s2987_s5  ;;  %v3517_v8 = vsel %vm599_vm3, %v676_v24, %v678_v29  ;;  %v620_v24 = vrot.slane %v3188_v60, 2  ;;  %v621_v29 = vrot.slane %v3190_v61, 2 }
  0x62   : > { %4451 = vst [vmem:[#allocation21_spill] sm:$0xff] %v3517_v8  ;;  %v2602_v54 = vpack.i.bf16 %v3517_v8, %v3514_v10  ;;  %v638_v8 = vrot.slane %v343_v19, 2  ;;  %v347_v10 = vld [vmem:[#allocation2 + $0xd8] sm:$0xff] }
  0x63   : > { %v3549_v60 = vsel %vm599_vm3, %v620_v24, %v621_v29 }
  0x64   : > { %2578 = vrot.lane.b32.xlu0 %v2577_v49, %s2988_s18  ;;  %4454 = vst [vmem:[#allocation24_spill] sm:$0xff] %v3549_v60 }
  0x65   : > { %2583 = vrot.lane.b32.xlu1 %v3360_v62, %s2988_s18  ;;  %v875_v62 = vrot.slane %v3418_v7, 1  ;;  %v3552_v7 = vsel %vm599_vm3, %v621_v29, %v623_v12  ;;  %v625_v12 = vrot.slane %v3204_v3, 2 }
  0x66   : > { %4455 = vst [vmem:[#allocation25_spill] sm:$0xff] %v3552_v7  ;;  %v2642_v61 = vpack.i.bf16 %v3552_v7, %v3549_v60 }
  0x68   : > { %2588 = vrot.lane.b32.xlu0 %v2587_v16, %s2986_s30 }
  0x69   : > { %2593 = vrot.lane.b32.xlu1 %v2592_v43, %s2987_s5 }
  0x6c   : > { %2598 = vrot.lane.b32.xlu0 %v3434_v2, %s2987_s5  ;;  %v3537_v2 = vsel %vm422_vm2, %v875_v62, %v876_v59  ;;  %v3568_v62 = vld [vmem:[#allocation2 + $0x1a8] sm:$0x3] }
  0x6d   : > { %2603 = vrot.lane.b32.xlu1 %v2602_v54, %s2986_s30  ;;  %4452 = vst [vmem:[#allocation22_spill] sm:$0xff] %v3537_v2 }
  0x70   : > { %2608 = vrot.lane.b32.xlu0 %v3247_v21, %s2988_s18  ;;  %v3540_v21 = vsel %vm422_vm2, %v876_v59, %v878_v23  ;;  %v1115_v23 = vrot.slane %v3568_v62, 1 }
  0x71   : > { %2613 = vrot.lane.b32.xlu1 %v3399_v58, %s2986_s30  ;;  %4453 = vst [vmem:[#allocation23_spill] sm:$0xff] %v3540_v21  ;;  %v2632_v58 = vpack.i.bf16 %v3540_v21, %v3537_v2 }
  0x74   : > { %2618 = vrot.lane.b32.xlu0 %v2537_v27, %s2988_s18  ;;  %v3564_v27 = vld [vmem:[#allocation2 + $0x198] sm:$0xff] }
  0x75   : > { %2623 = vrot.lane.b32.xlu1 %v2622_v53, %s2987_s5  ;;  %v1112_v59 = vrot.slane %v3564_v27, 1 }
  0x78   : > { %2628 = vrot.lane.b32.xlu0 %v2547_v20, %s2987_s5  ;;  %v3566_v20 = vld [vmem:[#allocation2 + $0x1a0] sm:$0xff] }
  0x79   : > { %2633 = vrot.lane.b32.xlu1 %v2632_v58, %s2988_s18  ;;  %v2677_v24 = vpack.i.bf16 %v3566_v20, %v3564_v27  ;;  %v626_v58 = vrot.slane %v3206_v4, 2 }
  0x7b   : > { %v3594_v3 = vsel %vm599_vm3, %v625_v12, %v626_v58 }
  0x7c   : > { %2638 = vrot.lane.b32.xlu0 %v2567_v14, %s2988_s18  ;;  %v1113_v14 = vrot.slane %v3566_v20, 1  ;;  %4456 = vst [vmem:[#allocation26_spill] sm:$0xff] %v3594_v3 }
  0x7d   : > { %2643 = vrot.lane.b32.xlu1 %v2642_v61, %s2986_s30 }
  0x7e   : > { %v1114_v29 = vsel %vm422_vm2, %v1112_v59, %v1113_v14 }
  0x80   : > { %2648 = vrot.lane.b32.xlu0 %v2647_v1, %s2987_s5 }
  0x81   : > { %2653 = vrot.lane.b32.xlu1 %v2587_v16, %s2987_s5  ;;  %v1116_v16 = vsel %vm422_vm2, %v1113_v14, %v1115_v23  ;;  %v339_v14 = vld [vmem:[#allocation2 + $0x98] sm:$0xff] }
  0x82   : > { %v454_v23 = vrot.slane %v339_v14, 1 }
  0x84   : > { %2658 = vrot.lane.b32.xlu0 %v2657_v52, %s2986_s30  ;;  %v628_v52 = vrot.slane %v3216_v9, 2  ;;  %v340_v9 = vld [vmem:[#allocation2 + $0xa0] sm:$0x3] }
  0x85   : > { %2663 = vrot.lane.b32.xlu1 %v3269_v34, %s2988_s18  ;;  %v2687_v34 = vpack.i.bf16 %v1116_v16, %v1114_v29 }
  0x86   : > { %v3597_v4 = vsel %vm599_vm3, %v626_v58, %v628_v52  ;;  %v631_v58 = vrot.slane %v339_v14, 2  ;;  %v633_v52 = vrot.slane %v340_v9, 2 }
  0x87   : > { %4457 = vst [vmem:[#allocation27_spill] sm:$0xff] %v3597_v4 }
  0x88   : > { %2668 = vrot.lane.b32.xlu0 %v2577_v49, %s2986_s30  ;;  %v338_v49 = vld [vmem:[#allocation2 + $0x90] sm:$0xff]  ;;  %v3619_v28 = vsel %vm599_vm3, %v631_v58, %v633_v52 }
  0x89   : > { %2673 = vrot.lane.b32.xlu1 %v2592_v43, %s2988_s18  ;;  %v453_v59 = vrot.slane %v338_v49, 1  ;;  %v2697_v43 = vpack.i.bf16 %v3597_v4, %v3594_v3  ;;  %v2702_v29 = vpack.i.bf16 %v339_v14, %v338_v49  ;;  %4461 = vst [vmem:[#allocation31_spill] sm:$0xff] %v3619_v28  ;;  %v461_v14 = vrot.slane %v343_v19, 1 }
  0x8a   : > { %v648_v19 = vrot.slane %v349_v15, 2 }
  0x8b   : > { %v3605_v16 = vsel %vm422_vm2, %v453_v59, %v454_v23 }
  0x8c   : > { %2678 = vrot.lane.b32.xlu0 %v2677_v24, %s2987_s5  ;;  %v456_v24 = vrot.slane %v340_v9, 1  ;;  %4458 = vst [vmem:[#allocation28_spill] sm:$0xff] %v3605_v16 }
  0x8d   : > { %2683 = vrot.lane.b32.xlu1 %v2602_v54, %s2987_s5  ;;  %v630_v54 = vrot.slane %v338_v49, 2 }
  0x8e   : > { %v3609_v12 = vsel %vm422_vm2, %v454_v23, %v456_v24  ;;  %v458_v23 = vrot.slane %v341_v13, 1 }
  0x8f   : > { %4459 = vst [vmem:[#allocation29_spill] sm:$0xff] %v3609_v12  ;;  %v3616_v59 = vsel %vm599_vm3, %v630_v54, %v631_v58  ;;  %v635_v54 = vrot.slane %v341_v13, 2 }
  0x90   : > { %2688 = vrot.lane.b32.xlu0 %v2687_v34, %s2988_s18  ;;  %v342_v34 = vld [vmem:[#allocation2 + $0xb0] sm:$0xff]  ;;  %4460 = vst [vmem:[#allocation30_spill] sm:$0xff] %v3616_v59  ;;  %v2722_v24 = vpack.i.bf16 %v3619_v28, %v3616_v59 }
  0x91   : > { %2693 = vrot.lane.b32.xlu1 %v2622_v53, %s2988_s18  ;;  %v2712_v53 = vpack.i.bf16 %v3609_v12, %v3605_v16  ;;  %v459_v49 = vrot.slane %v342_v34, 1  ;;  %v636_v35 = vrot.slane %v342_v34, 2 }
  0x93   : > { %v3630_v58 = vsel %vm422_vm2, %v458_v23, %v459_v49  ;;  %v3633_v52 = vsel %vm422_vm2, %v459_v49, %v461_v14  ;;  %v344_v23 = vld [vmem:[#allocation2 + $0xc0] sm:$0xff]  ;;  %v345_v49 = vld [vmem:[#allocation2 + $0xc8] sm:$0xff]  ;;  %v346_v14 = vld [vmem:[#allocation2 + $0xd0] sm:$0x3] }
  0x94   : > { %2698 = vrot.lane.b32.xlu0 %v2697_v43, %s2986_s30  ;;  %4462 = vst [vmem:[#allocation32_spill] sm:$0xff] %v3630_v58  ;;  %4463 = vst [vmem:[#allocation33_spill] sm:$0xff] %v3633_v52  ;;  %v3640_v9 = vpack.i.bf16 %v3633_v52, %v3630_v58  ;;  %v463_v36 = vrot.slane %v344_v23, 1  ;;  %v464_v45 = vrot.slane %v345_v49, 1  ;;  %v466_v38 = vrot.slane %v346_v14, 1 }
  0x95   : > { %2703 = vrot.lane.b32.xlu1 %v2702_v29, %s2987_s5  ;;  %v640_v52 = vrot.slane %v344_v23, 2  ;;  %v643_v59 = vrot.slane %v346_v14, 2 }
  0x96   : > { %v3677_v28 = vsel %vm422_vm2, %v463_v36, %v464_v45 }
  0x97   : > { %4466 = vst [vmem:[#allocation36_spill] sm:$0xff] %v3677_v28 }
  0x98   : > { %2708 = vrot.lane.b32.xlu0 %v2642_v61, %s2987_s5  ;;  %v3627_v61 = vpack.i.bf16 %v342_v34, %v341_v13  ;;  %v3646_v13 = vsel %vm599_vm3, %v636_v35, %v638_v8  ;;  %v3650_v34 = vpop.permute.xlu0 %2448  ;;  %v645_v8 = vrot.slane %v347_v10, 2 }
  0x99   : > { %2713 = vrot.lane.b32.xlu1 %v2712_v53, %s2988_s18  ;;  %4465 = vst [vmem:[#allocation35_spill] sm:$0xff] %v3646_v13 }
  0x9c   : > { %2718 = vrot.lane.b32.xlu0 %v2647_v1, %s2988_s18  ;;  %v3643_v1 = vsel %vm599_vm3, %v635_v54, %v636_v35  ;;  %v646_v54 = vrot.slane %v348_v42, 2  ;;  %v3661_v58 = vpop.permute.xlu0 %2453 }
  0x9d   : > { %2723 = vrot.lane.b32.xlu1 %v2722_v24, %s2986_s30  ;;  %4464 = vst [vmem:[#allocation34_spill] sm:$0xff] %v3643_v1  ;;  %v3657_v35 = vpack.i.bf16 %v3646_v13, %v3643_v1  ;;  %v641_v1 = vrot.slane %v345_v49, 2 }
  0x9e   : > { %v3669_v13 = vsel %vm599_vm3, %v645_v8, %v646_v54  ;;  %v3672_v3 = vsel %vm599_vm3, %v646_v54, %v648_v19  ;;  %v3689_v19 = vld [vmem:[#allocation2 + $0x110] sm:$0xff]  ;;  %v3691_v8 = vld [vmem:[#allocation2 + $0x118] sm:$0x3] }
  0x9f   : > { %v658_v14 = vrot.slane %v3691_v8, 2  ;;  %v3705_v54 = vsel %vm599_vm3, %v640_v52, %v641_v1  ;;  %v3708_v16 = vsel %vm599_vm3, %v641_v1, %v643_v59 }
  0xa0   : > { %2728 = vrot.lane.b32.xlu0 %v3627_v61, %s2987_s5  ;;  %4469 = vst [vmem:[#allocation39_spill] sm:$0xff] %v3705_v54  ;;  %4470 = vst [vmem:[#allocation40_spill] sm:$0xff] %v3708_v16  ;;  %v3717_v40 = vpack.i.bf16 %v3708_v16, %v3705_v54  ;;  %v3743_v54 = vld [vmem:[#allocation2 + $0xf0] sm:$0xff] }
  0xa1   : > { %2733 = vrot.lane.b32.xlu1 %v2697_v43, %s2987_s5  ;;  %v3664_v43 = vpack.i.bf16 %v345_v49, %v344_v23  ;;  %v3687_v49 = vld [vmem:[#allocation2 + $0x108] sm:$0xff] }
  0xa3   : > { %v3659_v44 = vpop.permute.xlu1 %2458 }
  0xa4   : > { %2738 = vrot.lane.b32.xlu0 %v3640_v9, %s2988_s18 }
  0xa5   : > { %2743 = vrot.lane.b32.xlu1 %v2702_v29, %s2988_s18  ;;  %v3680_v29 = vsel %vm422_vm2, %v464_v45, %v466_v38  ;;  %v655_v38 = vrot.slane %v3687_v49, 2  ;;  %v656_v45 = vrot.slane %v3689_v19, 2 }
  0xa6   : > { %4467 = vst [vmem:[#allocation37_spill] sm:$0xff] %v3680_v29  ;;  %v3697_v36 = vpack.i.bf16 %v3680_v29, %v3677_v28  ;;  %v468_v28 = vrot.slane %v347_v10, 1  ;;  %v469_v29 = vrot.slane %v348_v42, 1 }
  0xa7   : > { %v3674_v4 = vpop.permute.xlu1 %2468  ;;  %v3720_v52 = vsel %vm599_vm3, %v655_v38, %v656_v45  ;;  %v3723_v59 = vsel %vm599_vm3, %v656_v45, %v658_v14  ;;  %v2461_v14 = vunpack.i.h.bf16 %v3659_v44 }
  0xa8   : > { %2748 = vrot.lane.b32.xlu0 %v3657_v35, %s2986_s30  ;;  %v3732_v16 = vsel %vm422_vm2, %v468_v28, %v469_v29  ;;  %v3735_v38 = vsel %vm422_vm2, %v469_v29, %v471_v39  ;;  %v2450_v28 = vunpack.i.l.bf16 %v3650_v34 }
  0xa9   : > { %2753 = vrot.lane.b32.xlu1 %v2712_v53, %s2986_s30  ;;  %4473 = vst [vmem:[#allocation43_spill] sm:$0xff] %v3732_v16  ;;  %4474 = vst [vmem:[#allocation44_spill] sm:$0xff] %v3735_v38  ;;  %v3759_v45 = vpack.i.bf16 %v3735_v38, %v3732_v16  ;;  %v2945_v16 = vld [vmem:[#allocation2 + $0x8] sm:$0xff]  ;;  %v2946_v38 = vld [vmem:[#allocation2] sm:$0xff] }
  0xaa   : > { %v3684_v23 = vpop.permute.xlu0 %2463 }
  0xab   : > { %v3702_v53 = vpop.permute.xlu1 %2473 }
  0xac   : > { %2758 = vrot.lane.b32.xlu0 %v3664_v43, %s2987_s5  ;;  %4468 = vst [vmem:[#allocation38_spill] sm:$0xff] %v3702_v53 }
  0xad   : > { %2763 = vrot.lane.b32.xlu1 %v2722_v24, %s2987_s5  ;;  %v3741_v24 = vpack.i.bf16 %v348_v42, %v347_v10  ;;  %v2460_v42 = vunpack.i.l.bf16 %v3659_v44  ;;  %v2455_v44 = vunpack.i.l.bf16 %v3661_v58 }
  0xae   : > { %v3710_v12 = vpop.permute.xlu0 %2478 }
  0xaf   : > { %4471 = vst [vmem:[#allocation41_spill] sm:$0xff] %v3710_v12  ;;  %v3725_v1 = vpop.permute.xlu1 %2483  ;;  %v1250_v12 = vsel %vm199_vm0, %v2946_v38, %v2450_v28  ;;  %v650_v38 = vrot.slane %v3743_v54, 2 }
  0xb0   : > { %2768 = vrot.lane.b32.xlu0 %v3697_v36, %s2988_s18  ;;  %4472 = vst [vmem:[#allocation42_spill] sm:$0xff] %v3725_v1 }
  0xb1   : > { %2773 = vrot.lane.b32.xlu1 %v3627_v61, %s2988_s18  ;;  %v2451_v61 = vunpack.i.h.bf16 %v3650_v34 }
  0xb2   : > { %v2489_v15 = vpop.permute.xlu0 %2488 }
  0xb3   : > { %v2491_v7 = vunpack.i.h.bf16 %v2489_v15  ;;  %v2490_v60 = vunpack.i.l.bf16 %v2489_v15  ;;  %v3745_v15 = vld [vmem:[#allocation2 + $0xf8] sm:$0xff]  ;;  %v3749_v1 = vpop.permute.xlu1 %2493 }
  0xb4   : > { %2778 = vrot.lane.b32.xlu0 %v3717_v40, %s2986_s30 }
  0xb5   : > { %v1348_v39 = vsel %vm199_vm0, %v3198_v63, %v2490_v60  ;;  %v1349_v29 = vsel %vm199_vm0, %v3209_v5, %v2491_v7  ;;  %2783 = vrot.lane.b32.xlu1 %v3640_v9, %s2986_s30  ;;  %v473_v63 = vrot.slane %v3743_v54, 1  ;;  %v474_v5 = vrot.slane %v3745_v15, 1 }
  0xb6   : > { %v2499_v10 = vpop.permute.xlu0 %2498  ;;  %v2456_v60 = vunpack.i.h.bf16 %v3661_v58  ;;  %v1380_v7 = vsel %vm1282_vm4, %v1348_v39, %v2460_v42  ;;  %v1251_v9 = vsel %vm199_vm0, %v2945_v16, %v2451_v61  ;;  %v1216_v58 = vrot.slane %v3568_v62, 2 }
  0xb7   : > { %v2501_v22 = vunpack.i.h.bf16 %v2499_v10  ;;  %v2500_v34 = vunpack.i.l.bf16 %v2499_v10  ;;  %v1381_v10 = vsel %vm1282_vm4, %v1349_v29, %v2461_v14  ;;  %v2504_v31 = vpop.permute.xlu1 %2503  ;;  %v3783_v16 = vpack.i.bf16 %v3672_v3, %v3669_v13 }
  0xb8   : > { %2788 = vrot.lane.b32.xlu0 %v3741_v24, %s2987_s5  ;;  %v1283_v14 = vsel %vm1282_vm4, %v1250_v12, %v2455_v44  ;;  %v2506_v29 = vunpack.i.h.bf16 %v2504_v31 }
  0xb9   : > { %v1412_v32 = vsel %vm1315_vm5, %v1380_v7, %v2500_v34  ;;  %v1413_v2 = vsel %vm1315_vm5, %v1381_v10, %v2501_v22  ;;  %2793 = vrot.lane.b32.xlu1 %v3657_v35, %s2987_s5  ;;  %v1284_v22 = vsel %vm1282_vm4, %v1251_v9, %v2456_v60  ;;  %v2495_v35 = vunpack.i.l.bf16 %v3749_v1 }
  0xba   : > { %v2509_v21 = vpop.permute.xlu0 %2508  ;;  %v1445_v53 = vpack.c.bf16 %v1413_v2, %v1412_v32  ;;  %v3791_v32 = vsel %vm422_vm2, %v473_v63, %v474_v5  ;;  %v651_v2 = vrot.slane %v3745_v15, 2  ;;  %v2505_v34 = vunpack.i.l.bf16 %v2504_v31 }
  0xbb   : > { %v2511_v39 = vunpack.i.h.bf16 %v2509_v21  ;;  %v2510_v42 = vunpack.i.l.bf16 %v2509_v21  ;;  %v2496_v21 = vunpack.i.h.bf16 %v3749_v1  ;;  %v2514_v61 = vpop.permute.xlu1 %2513  ;;  %v3805_v1 = vpack.i.bf16 %v3745_v15, %v3743_v54 }
  0xbc   : > { %2798 = vrot.lane.b32.xlu0 %v3759_v45, %s2988_s18  ;;  %1716 = vmatprep.mubr.bf16.mxu0 %v1445_v53  ;;  %v3799_v53 = vsel %vm422_vm2, %v474_v5, %v476_v17  ;;  %v2516_v63 = vunpack.i.h.bf16 %v2514_v61  ;;  %v2515_v7 = vunpack.i.l.bf16 %v2514_v61  ;;  %v653_v31 = vrot.slane %v3763_v26, 2 }
  0xbd   : > { %v1316_v28 = vsel %vm1315_vm5, %v1283_v14, %v2510_v42  ;;  %v1317_v12 = vsel %vm1315_vm5, %v1284_v22, %v2511_v39  ;;  %2803 = vrot.lane.b32.xlu1 %v3664_v43, %s2988_s18  ;;  %v1372_v17 = vsel %vm199_vm0, %v3474_v37, %v2495_v35  ;;  %v1373_v5 = vsel %vm199_vm0, %v3477_v46, %v2496_v21 }
  0xbe   : > { %v2519_v60 = vpop.permute.xlu0 %2518  ;;  %v1444_v44 = vpack.c.bf16 %v1317_v12, %v1316_v28  ;;  %v3816_v43 = vpack.i.bf16 %v3799_v53, %v3791_v32  ;;  %v3819_v54 = vsel %vm599_vm3, %v650_v38, %v651_v2  ;;  %v1275_v15 = vsel %vm199_vm0, %v3261_v30, %v2506_v29 }
  0xbf   : > { %v2521_v10 = vunpack.i.h.bf16 %v2519_v60  ;;  %v2520_v9 = vunpack.i.l.bf16 %v2519_v60  ;;  %v2524_v39 = vpop.permute.xlu1 %2523  ;;  %v1274_v26 = vsel %vm199_vm0, %v3254_v25, %v2505_v34  ;;  %v1404_v46 = vsel %vm1282_vm4, %v1372_v17, %v2515_v7 }
  0xc0   : > { %2808 = vrot.lane.b32.xlu0 %v3783_v16, %s2986_s30  ;;  %1717 = vmatmul.mubr.bf16.vlgmr.msra.gmra.mxu0 %v1444_v44  ;;  %v2526_v42 = vunpack.i.h.bf16 %v2524_v39  ;;  %v2525_v14 = vunpack.i.l.bf16 %v2524_v39  ;;  %v1405_v21 = vsel %vm1282_vm4, %v1373_v5, %v2516_v63  ;;  %v3838_v34 = vsel %vm599_vm3, %v651_v2, %v653_v31  ;;  %v2944_v63 = vld [vmem:[%s4386_s1 + $0x80] sm:$0xff]  }
  0xc1   : > { %2813 = vrot.lane.b32.xlu1 %v3697_v36, %s2986_s30  ;;  %v1308_v38 = vsel %vm1282_vm4, %v1275_v15, %v2521_v10  ;;  %v1307_v61 = vsel %vm1282_vm4, %v1274_v26, %v2520_v9  ;;  %v3849_v2 = vpack.i.bf16 %v3838_v34, %v3819_v54  ;;  %v4475_v9 = vrot.slane %v3566_v20, 2 }
  0xc2   : > { %v2529_v22 = vpop.permute.xlu0 %2528  ;;  %v1436_v25 = vsel %vm1315_vm5, %v1404_v46, %v2525_v14  ;;  %v1437_v30 = vsel %vm1315_vm5, %v1405_v21, %v2526_v42  ;;  %v4476_v31 = vrot.slane %v3564_v27, 2  ;;  %v479_v5 = vrot.slane %v3689_v19, 1 }
  0xc3   : > { %v2531_v37 = vunpack.i.h.bf16 %v2529_v22  ;;  %v2530_v35 = vunpack.i.l.bf16 %v2529_v22  ;;  %v2534_v28 = vpop.permute.xlu1 %2533  ;;  %v1481_v12 = vpack.c.bf16 %v1437_v30, %v1436_v25  ;;  %v481_v15 = vrot.slane %v3691_v8, 1 }
  0xc4   : > { %2818 = vrot.lane.b32.xlu0 %v3805_v1, %s2987_s5  ;;  %v2536_v7 = vunpack.i.h.bf16 %v2534_v28  ;;  %v2535_v10 = vunpack.i.l.bf16 %v2534_v28  ;;  %v3856_v39 = vsel %vm599_vm3, %v4476_v31, %v4475_v9  ;;  %v4477_v26 = vmov %v4475_v9  ;;  %v2947_v28 = vld [vmem:[#allocation2 + $0x20] sm:$0xff] }
  0xc5   : > { %v1340_v29 = vsel %vm1315_vm5, %v1307_v61, %v2530_v35  ;;  %v1341_v36 = vsel %vm1315_vm5, %v1308_v38, %v2531_v37  ;;  %1812 = vmatprep.mubr.bf16.mxu1 %v1481_v12  ;;  %2823 = vrot.lane.b32.xlu1 %v3717_v40, %s2987_s5  ;;  %v478_v40 = vrot.slane %v3687_v49, 1  ;;  %v3867_v42 = vsel %vm599_vm3, %v4477_v26, %v1216_v58 }
  0xc6   : > { %v2539_v60 = vpop.permute.xlu0 %2538  ;;  %v1480_v44 = vpack.c.bf16 %v1341_v36, %v1340_v29  ;;  %v1491_v14 = vpack.c.bf16 %v3867_v42, %v3856_v39  ;;  %v1350_v62 = vsel %vm199_vm0, %v3180_v55, %v2535_v10  ;;  %v3881_v20 = vpack.i.bf16 %v3689_v19, %v3687_v49  ;;  %v2948_v29 = vld [vmem:[#allocation2 + $0x18] sm:$0xff] }
  0xc7   : > { %v2544_v17 = vpop.permute.xlu1 %2543  ;;  %v2541_v22 = vunpack.i.h.bf16 %v2539_v60  ;;  %v2540_v37 = vunpack.i.l.bf16 %v2539_v60  ;;  %v2466_v8 = vunpack.i.h.bf16 %v3684_v23  ;;  %v2465_v58 = vunpack.i.l.bf16 %v3684_v23 }
  0xc8   : > { %2828 = vrot.lane.b32.xlu0 %v3816_v43, %s2988_s18  ;;  %1813 = vmatmul.mubr.bf16.vlgmr.msra.gmra.mxu1 %v1480_v44  ;;  %v2546_v19 = vunpack.i.h.bf16 %v2544_v17  ;;  %v2545_v61 = vunpack.i.l.bf16 %v2544_v17 }
  0xc9   : > { %2384 = vmatpush3.bf16.msra.mxu1 %v3588_v50  ;;  %2833 = vrot.lane.b32.xlu1 %v3741_v24, %s2988_s18  ;;  %v1351_v50 = vsel %vm199_vm0, %v3183_v56, %v2536_v7  ;;  %v3886_v24 = vsel %vm422_vm2, %v478_v40, %v479_v5  ;;  %v3889_v56 = vsel %vm422_vm2, %v479_v5, %v481_v15 }
  0xca   : > { %v2549_v27 = vpop.permute.xlu0 %2548  ;;  %2385 = vmatprep.subr.bf16.mxu1 %v2944_v63  ;;  %v1383_v38 = vsel %vm1282_vm4, %v1351_v50, %v2541_v22  ;;  %v1382_v49 = vsel %vm1282_vm4, %v1350_v62, %v2540_v37  ;;  %v3901_v30 = vpack.i.bf16 %v3889_v56, %v3886_v24  ;;  %v1253_v12 = vsel %vm199_vm0, %v2947_v28, %v2466_v8 }
  0xcb   : > { %v2554_v35 = vpop.permute.xlu1 %2553  ;;  %v1252_v36 = vsel %vm199_vm0, %v2948_v29, %v2465_v58  ;;  %v1286_v17 = vsel %vm1282_vm4, %v1253_v12, %v2546_v19  ;;  %v3911_v40 = vpack.i.bf16 %v3723_v59, %v3720_v52  ;;  %v2952_v12 = vld [vmem:[#allocation2 + $0x138] sm:$0xff] }
  0xcc   : > { %2838 = vrot.lane.b32.xlu0 %v3849_v2, %s2986_s30  ;;  %v2556_v55 = vunpack.i.h.bf16 %v2554_v35  ;;  %v2555_v46 = vunpack.i.l.bf16 %v2554_v35  ;;  %v1285_v31 = vsel %vm1282_vm4, %v1252_v36, %v2545_v61  ;;  %v2950_v61 = vld [vmem:[#allocation2 + $0x128] sm:$0xff] }
  0xcd   : > { %2386 = vmatpush3.bf16.msra.mxu1 %v2944_v63  ;;  %2843 = vrot.lane.b32.xlu1 %v3759_v45, %s2986_s30  ;;  %v2551_v45 = vunpack.i.h.bf16 %v2549_v27  ;;  %v2550_v63 = vunpack.i.l.bf16 %v2549_v27 }
  0xce   : > { %v2559_v21 = vpop.permute.xlu0 %2558  ;;  %v1414_v23 = vsel %vm1315_vm5, %v1382_v49, %v2555_v46  ;;  %v1415_v25 = vsel %vm1315_vm5, %v1383_v38, %v2556_v55 }
  0xcf   : > { %v2564_v60 = vpop.permute.xlu1 %2563  ;;  %v1448_v44 = vpack.c.bf16 %v1415_v25, %v1414_v23  ;;  %v2561_v22 = vunpack.i.h.bf16 %v2559_v21  ;;  %v1374_v62 = vsel %vm199_vm0, %v3363_v47, %v2550_v63  ;;  %v2560_v8 = vunpack.i.l.bf16 %v2559_v21  ;;  %v2951_v21 = vld [vmem:[#allocation2 + $0x140] sm:$0xff] }
  0xd0   : > { %2848 = vrot.lane.b32.xlu0 %v3881_v20, %s2987_s5  ;;  %v2566_v7 = vunpack.i.h.bf16 %v2564_v60  ;;  %v2565_v10 = vunpack.i.l.bf16 %v2564_v60 }
  0xd1   : > { %2853 = vrot.lane.b32.xlu1 %v3783_v16, %s2987_s5  ;;  %1724 = vmatprep.mubr.bf16.mxu0 %v1448_v44  ;;  %v1375_v16 = vsel %vm199_vm0, %v3372_v51, %v2551_v45  ;;  %v2949_v51 = vld [vmem:[#allocation2 + $0x120] sm:$0xff]  ;;  %v1277_v23 = vsel %vm199_vm0, %v2951_v21, %v2561_v22  ;;  %v1276_v29 = vsel %vm199_vm0, %v2952_v12, %v2560_v8  ;;  %v2471_v8 = vunpack.i.h.bf16 %v3674_v4 }
  0xd2   : > { %v2569_v9 = vpop.permute.xlu0 %2568  ;;  %v1318_v26 = vsel %vm1315_vm5, %v1285_v31, %v2565_v10  ;;  %v1319_v27 = vsel %vm1315_vm5, %v1286_v17, %v2566_v7  ;;  %v3927_v47 = vpack.i.bf16 %v2950_v61, %v2949_v51  ;;  %v2953_v51 = vld [vmem:[#allocation2 + $0x38] sm:$0xff] }
  0xd3   : > { %v2571_v5 = vunpack.i.h.bf16 %v2569_v9  ;;  %v2570_v15 = vunpack.i.l.bf16 %v2569_v9  ;;  %v2574_v37 = vpop.permute.xlu1 %2573  ;;  %v1447_v50 = vpack.c.bf16 %v1319_v27, %v1318_v26  ;;  %v1255_v61 = vsel %vm199_vm0, %v2953_v51, %v2471_v8 }
  0xd4   : > { %2858 = vrot.lane.b32.xlu0 %v3901_v30, %s2988_s18  ;;  %v2576_v35 = vunpack.i.h.bf16 %v2574_v37  ;;  %v2575_v55 = vunpack.i.l.bf16 %v2574_v37 }
  0xd5   : > { %2863 = vrot.lane.b32.xlu1 %v3805_v1, %s2988_s18  ;;  %1725 = vmatmul.mubr.bf16.gmra.mxu0 %v1447_v50  ;;  %v1406_v49 = vsel %vm1282_vm4, %v1374_v62, %v2570_v15  ;;  %v1407_v19 = vsel %vm1282_vm4, %v1375_v16, %v2571_v5  ;;  %v2907_v62 = vpack.i.bf16 %v2951_v21, %v2952_v12 }
  0xd6   : > { %v2579_v58 = vpop.permute.xlu0 %2578  ;;  %v1309_v63 = vsel %vm1282_vm4, %v1276_v29, %v2575_v55  ;;  %v1310_v7 = vsel %vm1282_vm4, %v1277_v23, %v2576_v35 }
  0xd7   : > { %v2581_v46 = vunpack.i.h.bf16 %v2579_v58  ;;  %v2580_v38 = vunpack.i.l.bf16 %v2579_v58  ;;  %v2584_v25 = vpop.permute.xlu1 %2583  ;;  %v2470_v58 = vunpack.i.l.bf16 %v3674_v4 }
  0xd8   : > { %2868 = vrot.lane.b32.xlu0 %v3911_v40, %s2986_s30  ;;  %v2586_v36 = vunpack.i.h.bf16 %v2584_v25  ;;  %v2585_v60 = vunpack.i.l.bf16 %v2584_v25 }
  0xd9   : > { %v1438_v28 = vsel %vm1315_vm5, %v1406_v49, %v2580_v38  ;;  %v1439_v1 = vsel %vm1315_vm5, %v1407_v19, %v2581_v46  ;;  %2873 = vrot.lane.b32.xlu1 %v3816_v43, %s2986_s30 }
  0xda   : > { %v2589_v44 = vpop.permute.xlu0 %2588  ;;  %v1484_v45 = vpack.c.bf16 %v1439_v1, %v1438_v28  ;;  %v1342_v10 = vsel %vm1315_vm5, %v1309_v63, %v2585_v60  ;;  %v1343_v9 = vsel %vm1315_vm5, %v1310_v7, %v2586_v36 }
  0xdb   : > { %v2591_v31 = vunpack.i.h.bf16 %v2589_v44  ;;  %v2590_v17 = vunpack.i.l.bf16 %v2589_v44  ;;  %v2594_v5 = vpop.permute.xlu1 %2593  ;;  %v1483_v15 = vpack.c.bf16 %v1343_v9, %v1342_v10 }
  0xdc   : > { %2878 = vrot.lane.b32.xlu0 %v3927_v47, %s2987_s5  ;;  %1820 = vmatprep.mubr.bf16.mxu1 %v1484_v45  ;;  %v2596_v27 = vunpack.i.h.bf16 %v2594_v5  ;;  %v2595_v22 = vunpack.i.l.bf16 %v2594_v5 }
  0xdd   : > { %2883 = vrot.lane.b32.xlu1 %v3849_v2, %s2987_s5  ;;  %1821 = vmatmul.mubr.bf16.gmra.mxu1 %v1483_v15  ;;  %v1353_v43 = vsel %vm199_vm0, %v3221_v11, %v2591_v31  ;;  %v1352_v37 = vsel %vm199_vm0, %v3212_v6, %v2590_v17 }
  0xde   : > { %v2599_v26 = vpop.permute.xlu0 %2598  ;;  %v1385_v55 = vsel %vm1282_vm4, %v1353_v43, %v2596_v27 }
  0xdf   : > { %v2604_v50 = vpop.permute.xlu1 %2603  ;;  %v2601_v11 = vunpack.i.h.bf16 %v2599_v26  ;;  %v2600_v46 = vunpack.i.l.bf16 %v2599_v26  ;;  %v2955_v26 = vld [vmem:[#allocation2 + $0x158] sm:$0xff] }
  0xe0   : > { %2888 = vrot.lane.b32.xlu0 %v3339_v33, %s2988_s18  ;;  %v1384_v33 = vsel %vm1282_vm4, %v1352_v37, %v2595_v22  ;;  %v2606_v1 = vunpack.i.h.bf16 %v2604_v50  ;;  %v2605_v12 = vunpack.i.l.bf16 %v2604_v50  ;;  %v2956_v22 = vld [vmem:[#allocation2 + $0x150] sm:$0xff] }
  0xe1   : > { %2893 = vrot.lane.b32.xlu1 %v3881_v20, %s2988_s18  ;;  %v2954_v20 = vld [vmem:[#allocation2 + $0x30] sm:$0xff] }
  0xe2   : > { %v2609_v16 = vpop.permute.xlu0 %2608  ;;  %v1254_v21 = vsel %vm199_vm0, %v2954_v20, %v2470_v58  ;;  %v1377_v17 = vsel %vm199_vm0, %v3496_v41, %v2606_v1  ;;  %v1376_v5 = vsel %vm199_vm0, %v3493_v57, %v2605_v12  ;;  %v4478_v20 = vld [vmem:[#allocation3_spill] sm:$0xff] }
  0xe3   : > { %v2611_v2 = vunpack.i.h.bf16 %v2609_v16  ;;  %v2610_v35 = vunpack.i.l.bf16 %v2609_v16  ;;  %v2614_v6 = vpop.permute.xlu1 %2613  ;;  %v1287_v28 = vsel %vm1282_vm4, %v1254_v21, %v2600_v46 }
  0xe4   : > { %2898 = vrot.lane.b32.xlu0 %v3369_v48, %s2986_s30  ;;  %v1288_v48 = vsel %vm1282_vm4, %v1255_v61, %v2601_v11  ;;  %v2616_v44 = vunpack.i.h.bf16 %v2614_v6  ;;  %v2615_v45 = vunpack.i.l.bf16 %v2614_v6 }
  0xe5   : > { %v1416_v38 = vsel %vm1315_vm5, %v1384_v33, %v2610_v35  ;;  %v1417_v49 = vsel %vm1315_vm5, %v1385_v55, %v2611_v2  ;;  %2903 = vrot.lane.b32.xlu1 %v3901_v30, %s2986_s30 }
  0xe6   : > { %v2619_v4 = vpop.permute.xlu0 %2618  ;;  %v1451_v19 = vpack.c.bf16 %v1417_v49, %v1416_v38  ;;  %v1279_v27 = vsel %vm199_vm0, %v2955_v26, %v2616_v44  ;;  %v1278_v43 = vsel %vm199_vm0, %v2956_v22, %v2615_v45 }
  0xe7   : > { %v2621_v23 = vunpack.i.h.bf16 %v2619_v4  ;;  %v2620_v25 = vunpack.i.l.bf16 %v2619_v4  ;;  %v2624_v29 = vpop.permute.xlu1 %2623 }
  0xe8   : > { %2908 = vrot.lane.b32.xlu0 %v2907_v62, %s2987_s5  ;;  %1732 = vmatprep.mubr.bf16.mxu0 %v1451_v19  ;;  %v2626_v10 = vunpack.i.h.bf16 %v2624_v29  ;;  %v2625_v30 = vunpack.i.l.bf16 %v2624_v29 }
  0xe9   : > { %v1320_v36 = vsel %vm1315_vm5, %v1287_v28, %v2620_v25  ;;  %v1321_v60 = vsel %vm1315_vm5, %v1288_v48, %v2621_v23  ;;  %2913 = vrot.lane.b32.xlu1 %v3911_v40, %s2987_s5  ;;  %v4479_v23 = vld [vmem:[#allocation38_spill] sm:$0xff] }
  0xea   : > { %v2629_v63 = vpop.permute.xlu0 %2628  ;;  %v1450_v7 = vpack.c.bf16 %v1321_v60, %v1320_v36  ;;  %v1408_v16 = vsel %vm1282_vm4, %v1376_v5, %v2625_v30  ;;  %v2476_v25 = vunpack.i.h.bf16 %v4479_v23  ;;  %v2475_v48 = vunpack.i.l.bf16 %v4479_v23  ;;  %v2958_v30 = vld [vmem:[#allocation2 + $0x48] sm:$0xff] }
  0xeb   : > { %v2631_v9 = vunpack.i.h.bf16 %v2629_v63  ;;  %v2630_v31 = vunpack.i.l.bf16 %v2629_v63  ;;  %v2634_v15 = vpop.permute.xlu1 %2633 }
  0xec   : > { %2918 = vrot.lane.b32.xlu0 %v3486_v0, %s2988_s18  ;;  %1733 = vmatmul.mubr.bf16.gmra.mxu0 %v1450_v7  ;;  %v2636_v40 = vunpack.i.h.bf16 %v2634_v15  ;;  %v2635_v37 = vunpack.i.l.bf16 %v2634_v15  ;;  %v1409_v0 = vsel %vm1282_vm4, %v1377_v17, %v2626_v10  ;;  %v2957_v7 = vld [vmem:[#allocation2 + $0x50] sm:$0xff] }
  0xed   : > { %2923 = vrot.lane.b32.xlu1 %v3927_v47, %s2988_s18  ;;  %v1312_v57 = vsel %vm1282_vm4, %v1279_v27, %v2631_v9  ;;  %v1311_v41 = vsel %vm1282_vm4, %v1278_v43, %v2630_v31  ;;  %v1257_v10 = vsel %vm199_vm0, %v2957_v7, %v2476_v25  ;;  %v1256_v9 = vsel %vm199_vm0, %v2958_v30, %v2475_v48 }
  0xee   : > { %v2639_v50 = vpop.permute.xlu0 %2638  ;;  %v1440_v58 = vsel %vm1315_vm5, %v1408_v16, %v2635_v37  ;;  %v1441_v2 = vsel %vm1315_vm5, %v1409_v0, %v2636_v40 }
  0xef   : > { %v2641_v62 = vunpack.i.h.bf16 %v2639_v50  ;;  %v2640_v8 = vunpack.i.l.bf16 %v2639_v50  ;;  %v2644_v35 = vpop.permute.xlu1 %2643  ;;  %v1487_v33 = vpack.c.bf16 %v1441_v2, %v1440_v58  ;;  %v4481_v2 = vld [vmem:[#allocation22_spill] sm:$0xff] }
  0xf0   : > { %v2646_v38 = vunpack.i.h.bf16 %v2644_v35  ;;  %v2645_v49 = vunpack.i.l.bf16 %v2644_v35 }
  0xf1   : > { %v1344_v55 = vsel %vm1315_vm5, %v1311_v41, %v2640_v8  ;;  %v1345_v11 = vsel %vm1315_vm5, %v1312_v57, %v2641_v62  ;;  %1828 = vmatprep.mubr.bf16.mxu1 %v1487_v33  ;;  %v4480_v41 = vld [vmem:[#allocation23_spill] sm:$0xff] }
  0xf2   : > { %v2649_v46 = vpop.permute.xlu0 %2648  ;;  %v1486_v6 = vpack.c.bf16 %v1345_v11, %v1344_v55  ;;  %v1355_v61 = vsel %vm199_vm0, %v3239_v18, %v2646_v38  ;;  %v1354_v21 = vsel %vm199_vm0, %v4478_v20, %v2645_v49 }
  0xf3   : > { %v2654_v47 = vpop.permute.xlu1 %2653  ;;  %v2651_v19 = vunpack.i.h.bf16 %v2649_v46  ;;  %v2650_v51 = vunpack.i.l.bf16 %v2649_v46 }
  0xf4   : > { %1829 = vmatmul.mubr.bf16.gmra.mxu1 %v1486_v6  ;;  %v2656_v44 = vunpack.i.h.bf16 %v2654_v47  ;;  %v2655_v45 = vunpack.i.l.bf16 %v2654_v47 }
  0xf5   : > { %v1387_v36 = vsel %vm1282_vm4, %v1355_v61, %v2651_v19  ;;  %v1386_v60 = vsel %vm1282_vm4, %v1354_v21, %v2650_v51  ;;  %v2960_v21 = vld [vmem:[#allocation2 + $0x168] sm:$0xff] }
  0xf6   : > { %v2659_v4 = vpop.permute.xlu0 %2658  ;;  %v1290_v43 = vsel %vm1282_vm4, %v1257_v10, %v2656_v44  ;;  %v1289_v40 = vsel %vm1282_vm4, %v1256_v9, %v2655_v45  ;;  %v4484_v9 = vld [vmem:[#allocation41_spill] sm:$0xff] }
  0xf7   : > { %v2664_v28 = vpop.permute.xlu1 %2663  ;;  %v2661_v5 = vunpack.i.h.bf16 %v2659_v4  ;;  %v2660_v15 = vunpack.i.l.bf16 %v2659_v4  ;;  %v2959_v4 = vld [vmem:[#allocation2 + $0x170] sm:$0xff] }
  0xf8   : > { %v2666_v1 = vunpack.i.h.bf16 %v2664_v28  ;;  %v2665_v12 = vunpack.i.l.bf16 %v2664_v28 }
  0xf9   : > { %v1379_v58 = vsel %vm199_vm0, %v4480_v41, %v2661_v5  ;;  %v1378_v35 = vsel %vm199_vm0, %v4481_v2, %v2660_v15 }
  0xfa   : > { %v2669_v29 = vpop.permute.xlu0 %2668  ;;  %v1418_v63 = vsel %vm1315_vm5, %v1386_v60, %v2665_v12  ;;  %v1419_v18 = vsel %vm1315_vm5, %v1387_v36, %v2666_v1  ;;  %v4482_v36 = vld [vmem:[#allocation14_spill] sm:$0xff]  ;;  %v4483_v60 = vld [vmem:[#allocation15_spill] sm:$0xff] }
  0xfb   : > { %v2674_v31 = vpop.permute.xlu1 %2673  ;;  %v1454_v17 = vpack.c.bf16 %v1419_v18, %v1418_v63  ;;  %v2671_v62 = vunpack.i.h.bf16 %v2669_v29  ;;  %v2670_v33 = vunpack.i.l.bf16 %v2669_v29  ;;  %v1446_v44 = vpack.c.bf16 %v4483_v60, %v4482_v36 }
  0xfc   : > { %v2676_v26 = vunpack.i.h.bf16 %v2674_v31  ;;  %v2675_v27 = vunpack.i.l.bf16 %v2674_v31  ;;  %v2481_v31 = vunpack.i.h.bf16 %v4484_v9 }
  0xfd   : > { %1740 = vmatprep.mubr.bf16.mxu0 %v1454_v17  ;;  %v1281_v19 = vsel %vm199_vm0, %v2959_v4, %v2671_v62  ;;  %v1280_v23 = vsel %vm199_vm0, %v2960_v21, %v2670_v33  ;;  %v2480_v17 = vunpack.i.l.bf16 %v4484_v9  ;;  %v4488_v62 = vld [vmem:[#allocation25_spill] sm:$0xff] }
  0xfe   : > { %v2679_v22 = vpop.permute.xlu0 %2678  ;;  %v1322_v16 = vsel %vm1315_vm5, %v1289_v40, %v2675_v27  ;;  %v1323_v0 = vsel %vm1315_vm5, %v1290_v43, %v2676_v26  ;;  %v4485_v27 = vld [vmem:[#allocation5_spill] sm:$0xff]  ;;  %v4486_v43 = vld [vmem:[#allocation4_spill] sm:$0xff] }
  0xff   : > { %v2681_v37 = vunpack.i.h.bf16 %v2679_v22  ;;  %v2680_v50 = vunpack.i.l.bf16 %v2679_v22  ;;  %v2684_v8 = vpop.permute.xlu1 %2683  ;;  %v1453_v57 = vpack.c.bf16 %v1323_v0, %v1322_v16  ;;  %v4487_v0 = vld [vmem:[#allocation24_spill] sm:$0xff] }
 0x100   : > { %v2686_v11 = vunpack.i.h.bf16 %v2684_v8  ;;  %v2685_v46 = vunpack.i.l.bf16 %v2684_v8  ;;  %v1452_v8 = vpack.c.bf16 %v4488_v62, %v4487_v0 }
 0x101   : > { %1741 = vmatmul.mubr.bf16.gmra.mxu0 %v1453_v57  ;;  %v1410_v49 = vsel %vm1282_vm4, %v1378_v35, %v2680_v50  ;;  %v1411_v47 = vsel %vm1282_vm4, %v1379_v58, %v2681_v37  ;;  %v2961_v57 = vld [vmem:[#allocation2 + $0x68] sm:$0xff]  ;;  %v2962_v58 = vld [vmem:[#allocation2 + $0x60] sm:$0xff] }
 0x102   : > { %v2689_v55 = vpop.permute.xlu0 %2688  ;;  %v1313_v12 = vsel %vm1282_vm4, %v1280_v23, %v2685_v46  ;;  %v1314_v29 = vsel %vm1282_vm4, %v1281_v19, %v2686_v11  ;;  %v1259_v41 = vsel %vm199_vm0, %v2961_v57, %v2481_v31  ;;  %v1258_v2 = vsel %vm199_vm0, %v2962_v58, %v2480_v17  ;;  %v2964_v57 = vld [vmem:[#allocation2 + $0x78] sm:$0xff] }
 0x103   : > { %v2691_v6 = vunpack.i.h.bf16 %v2689_v55  ;;  %v2690_v38 = vunpack.i.l.bf16 %v2689_v55  ;;  %v2694_v51 = vpop.permute.xlu1 %2693 }
 0x104   : > { %v2696_v25 = vunpack.i.h.bf16 %v2694_v51  ;;  %v2695_v48 = vunpack.i.l.bf16 %v2694_v51 }
 0x105   : > { %v1442_v61 = vsel %vm1315_vm5, %v1410_v49, %v2690_v38  ;;  %v1443_v20 = vsel %vm1315_vm5, %v1411_v47, %v2691_v6 }
 0x106   : > { %v2699_v28 = vpop.permute.xlu0 %2698  ;;  %v1490_v1 = vpack.c.bf16 %v1443_v20, %v1442_v61  ;;  %v1346_v18 = vsel %vm1315_vm5, %v1313_v12, %v2695_v48  ;;  %v1347_v7 = vsel %vm1315_vm5, %v1314_v29, %v2696_v25  ;;  %v4490_v12 = vld [vmem:[#allocation12_spill] sm:$0xff] }
 0x107   : > { %v2701_v45 = vunpack.i.h.bf16 %v2699_v28  ;;  %v2700_v63 = vunpack.i.l.bf16 %v2699_v28  ;;  %v2704_v10 = vpop.permute.xlu1 %2703  ;;  %v1489_v30 = vpack.c.bf16 %v1347_v7, %v1346_v18  ;;  %v4494_v7 = vld [vmem:[#allocation28_spill] sm:$0xff] }
 0x108   : > { %1836 = vmatprep.mubr.bf16.mxu1 %v1490_v1  ;;  %v2706_v15 = vunpack.i.h.bf16 %v2704_v10  ;;  %v2705_v26 = vunpack.i.l.bf16 %v2704_v10  ;;  %v4489_v1 = vld [vmem:[#allocation13_spill] sm:$0xff] }
 0x109   : > { %1837 = vmatmul.mubr.bf16.gmra.mxu1 %v1489_v30  ;;  %v1357_v22 = vsel %vm199_vm0, %v4485_v27, %v2701_v45  ;;  %v1356_v40 = vsel %vm199_vm0, %v4486_v43, %v2700_v63  ;;  %v4491_v29 = vpack.c.bf16 %v4489_v1, %v4490_v12  ;;  %v4493_v63 = vld [vmem:[#allocation29_spill] sm:$0xff]  ;;  %v4495_v43 = vld [vmem:[#allocation30_spill] sm:$0xff] }
 0x10a   : > { %v2709_v5 = vpop.permute.xlu0 %2708  ;;  %2387 = vmatprep.mubr.msk.bf16.mxu1 %vm199_vm0, %v1446_v44  ;;  %v1388_v11 = vsel %vm1282_vm4, %v1356_v40, %v2705_v26  ;;  %v1389_v46 = vsel %vm1282_vm4, %v1357_v22, %v2706_v15  ;;  %v4492_v44 = vld [vmem:[#allocation42_spill] sm:$0xff]  ;;  %v4496_v40 = vld [vmem:[#allocation31_spill] sm:$0xff]  ;;  %v4502_v1 = vld [vmem:[#allocation33_spill] sm:$0xff] }
 0x10b   : > { %v2711_v37 = vunpack.i.h.bf16 %v2709_v5  ;;  %v2710_v50 = vunpack.i.l.bf16 %v2709_v5  ;;  %v2714_v16 = vpop.permute.xlu1 %2713  ;;  %v2486_v45 = vunpack.i.h.bf16 %v4492_v44  ;;  %v2485_v9 = vunpack.i.l.bf16 %v4492_v44 }
 0x10c   : > { %v2716_v35 = vunpack.i.h.bf16 %v2714_v16  ;;  %v2715_v33 = vunpack.i.l.bf16 %v2714_v16 }
 0x10d   : > { %v1291_v49 = vsel %vm1282_vm4, %v1258_v2, %v2710_v50  ;;  %v1292_v47 = vsel %vm1282_vm4, %v1259_v41, %v2711_v37  ;;  %v1458_v37 = vpack.c.bf16 %v4496_v40, %v4495_v43  ;;  %v2963_v50 = vld [vmem:[#allocation2 + $0x80] sm:$0xff]  ;;  %v1260_v41 = vsel %vm199_vm0, %v2964_v57, %v2485_v9  ;;  %v4504_v9 = vld [vmem:[#allocation35_spill] sm:$0xff] }
 0x10e   : > { %v2719_v55 = vpop.permute.xlu0 %2718  ;;  %v1420_v4 = vsel %vm1315_vm5, %v1388_v11, %v2715_v33  ;;  %v1421_v19 = vsel %vm1315_vm5, %v1389_v46, %v2716_v35  ;;  %v1261_v16 = vsel %vm199_vm0, %v2963_v50, %v2486_v45  ;;  %v4497_v46 = vld [vmem:[#allocation27_spill] sm:$0xff] }
 0x10f   : > { %v2721_v6 = vunpack.i.h.bf16 %v2719_v55  ;;  %v2720_v38 = vunpack.i.l.bf16 %v2719_v55  ;;  %v2724_v51 = vpop.permute.xlu1 %2723  ;;  %v1457_v61 = vpack.c.bf16 %v1421_v19, %v1420_v4 }
 0x110   : > { %v2726_v23 = vunpack.i.h.bf16 %v2724_v51  ;;  %v2725_v25 = vunpack.i.l.bf16 %v2724_v51 }
 0x111   : > { %v1324_v20 = vsel %vm1315_vm5, %v1291_v49, %v2720_v38  ;;  %v1325_v21 = vsel %vm1315_vm5, %v1292_v47, %v2721_v6  ;;  %1748 = vmatprep.mubr.bf16.mxu0 %v1457_v61  ;;  %2388 = vmatmul.mubr.msk.bf16.vlgmr.msra.gmra.mxu1 %vm199_vm0, %v4491_v29  ;;  %v4498_v6 = vld [vmem:[#allocation26_spill] sm:$0xff]  ;;  %v4503_v29 = vld [vmem:[#allocation32_spill] sm:$0xff] }
 0x112   : > { %v2729_v48 = vpop.permute.xlu0 %2728  ;;  %v1456_v28 = vpack.c.bf16 %v1325_v21, %v1324_v20  ;;  %2391 = vmatprep.mubr.msk.bf16.mxu1 %vm199_vm0, %v1452_v8  ;;  %v1359_v18 = vsel %vm199_vm0, %v4493_v63, %v2726_v23  ;;  %v1358_v10 = vsel %vm199_vm0, %v4494_v7, %v2725_v25  ;;  %v4499_v38 = vpack.c.bf16 %v4497_v46, %v4498_v6  ;;  %v4500_v25 = vld [vmem:[#allocation39_spill] sm:$0xff] }
 0x113   : > { %v2731_v36 = vunpack.i.h.bf16 %v2729_v48  ;;  %v2730_v60 = vunpack.i.l.bf16 %v2729_v48  ;;  %v2734_v30 = vpop.permute.xlu1 %2733  ;;  %v4501_v48 = vld [vmem:[#allocation40_spill] sm:$0xff] }
 0x114   : > { %1749 = vmatmul.mubr.bf16.gmra.mxu0 %v1456_v28  ;;  %v2736_v17 = vunpack.i.h.bf16 %v2734_v30  ;;  %v2735_v5 = vunpack.i.l.bf16 %v2734_v30  ;;  %v1464_v28 = vpack.c.bf16 %v4501_v48, %v4500_v25 }
 0x115   : > { %v1391_v27 = vsel %vm1282_vm4, %v1359_v18, %v2731_v36  ;;  %v1390_v22 = vsel %vm1282_vm4, %v1358_v10, %v2730_v60 }
 0x116   : > { %v2739_v31 = vpop.permute.xlu0 %2738  ;;  %v1294_v55 = vsel %vm1282_vm4, %v1261_v16, %v2736_v17  ;;  %v1293_v11 = vsel %vm1282_vm4, %v1260_v41, %v2735_v5 }
 0x117   : > { %v2741_v15 = vunpack.i.h.bf16 %v2739_v31  ;;  %v2740_v26 = vunpack.i.l.bf16 %v2739_v31  ;;  %v2744_v0 = vpop.permute.xlu1 %2743  ;;  %v4505_v31 = vld [vmem:[#allocation34_spill] sm:$0xff] }
 0x118   : > { %v2746_v58 = vunpack.i.h.bf16 %v2744_v0  ;;  %v2745_v2 = vunpack.i.l.bf16 %v2744_v0  ;;  %v4506_v17 = vpack.c.bf16 %v4504_v9, %v4505_v31 }
 0x119   : > { %v1422_v62 = vsel %vm1315_vm5, %v1390_v22, %v2740_v26  ;;  %v1423_v8 = vsel %vm1315_vm5, %v1391_v27, %v2741_v15  ;;  %2392 = vmatmul.mubr.msk.bf16.gmra.mxu1 %vm199_vm0, %v4499_v38  ;;  %v2965_v26 = vld [vmem:[#allocation2 + $0x98] sm:$0xff]  ;;  %v4507_v38 = vpack.c.bf16 %v3672_v3, %v3669_v13 }
 0x11a   : > { %v2749_v35 = vpop.permute.xlu0 %2748  ;;  %v1460_v33 = vpack.c.bf16 %v1423_v8, %v1422_v62  ;;  %v1326_v49 = vsel %vm1315_vm5, %v1293_v11, %v2745_v2  ;;  %v1327_v47 = vsel %vm1315_vm5, %v1294_v55, %v2746_v58  ;;  %2395 = vmatprep.mubr.msk.bf16.mxu1 %vm199_vm0, %v1458_v37  ;;  %v2966_v37 = vld [vmem:[#allocation2 + $0x90] sm:$0xff] }
 0x11b   : > { %v2751_v4 = vunpack.i.h.bf16 %v2749_v35  ;;  %v2750_v19 = vunpack.i.l.bf16 %v2749_v35  ;;  %v2754_v51 = vpop.permute.xlu1 %2753  ;;  %v1459_v61 = vpack.c.bf16 %v1327_v47, %v1326_v49  ;;  %v1470_v35 = vpack.c.bf16 %v3838_v34, %v3819_v54 }
 0x11c   : > { %1756 = vmatprep.mubr.bf16.mxu0 %v1460_v33  ;;  %v2756_v60 = vunpack.i.h.bf16 %v2754_v51  ;;  %v2755_v45 = vunpack.i.l.bf16 %v2754_v51  ;;  %v4509_v51 = vld [vmem:[#allocation36_spill] sm:$0xff] }
 0x11d   : > { %1757 = vmatmul.mubr.bf16.gmra.mxu0 %v1459_v61  ;;  %v1361_v12 = vsel %vm199_vm0, %v4502_v1, %v2751_v4  ;;  %v1360_v36 = vsel %vm199_vm0, %v4503_v29, %v2750_v19  ;;  %v4508_v4 = vld [vmem:[#allocation37_spill] sm:$0xff]  ;;  %v4510_v1 = vld [vmem:[#allocation10_spill] sm:$0xff] }
 0x11e   : > { %v2759_v20 = vpop.permute.xlu0 %2758  ;;  %v1263_v27 = vsel %vm199_vm0, %v2965_v26, %v2756_v60  ;;  %v1262_v50 = vsel %vm199_vm0, %v2966_v37, %v2755_v45 }
 0x11f   : > { %v2761_v21 = vunpack.i.h.bf16 %v2759_v20  ;;  %v2760_v23 = vunpack.i.l.bf16 %v2759_v20  ;;  %v2764_v44 = vpop.permute.xlu1 %2763 }
 0x120   : > { %v2766_v18 = vunpack.i.h.bf16 %v2764_v44  ;;  %v2765_v7 = vunpack.i.l.bf16 %v2764_v44 }
 0x121   : > { %2396 = vmatmul.mubr.msk.bf16.gmra.mxu1 %vm199_vm0, %v4506_v17  ;;  %v1392_v5 = vsel %vm1282_vm4, %v1360_v36, %v2760_v23  ;;  %v1393_v15 = vsel %vm1282_vm4, %v1361_v12, %v2761_v21  ;;  %v4511_v12 = vld [vmem:[#allocation11_spill] sm:$0xff] }
 0x122   : > { %v2769_v63 = vpop.permute.xlu0 %2768  ;;  %2399 = vmatprep.mubr.msk.bf16.mxu1 %vm199_vm0, %v1464_v28  ;;  %v1295_v57 = vsel %vm1282_vm4, %v1262_v50, %v2765_v7  ;;  %v1296_v41 = vsel %vm1282_vm4, %v1263_v27, %v2766_v18  ;;  %v1476_v29 = vpack.c.bf16 %v4511_v12, %v4510_v1  ;;  %v2967_v36 = vld [vmem:[#allocation2 + $0xb0] sm:$0xff]  ;;  %v2968_v18 = vld [vmem:[#allocation2 + $0xa8] sm:$0xff] }
 0x123   : > { %v2771_v10 = vunpack.i.h.bf16 %v2769_v63  ;;  %v2770_v30 = vunpack.i.l.bf16 %v2769_v63  ;;  %v2774_v22 = vpop.permute.xlu1 %2773 }
 0x124   : > { %v2776_v16 = vunpack.i.h.bf16 %v2774_v22  ;;  %v2775_v0 = vunpack.i.l.bf16 %v2774_v22 }
 0x125   : > { %v1424_v43 = vsel %vm1315_vm5, %v1392_v5, %v2770_v30  ;;  %v1425_v40 = vsel %vm1315_vm5, %v1393_v15, %v2771_v10  ;;  %v4512_v15 = vpack.c.bf16 %v3723_v59, %v3720_v52  ;;  %v4515_v59 = vld [vmem:[#allocation16_spill] sm:$0xff] }
 0x126   : > { %v2779_v62 = vpop.permute.xlu0 %2778  ;;  %v1463_v8 = vpack.c.bf16 %v1425_v40, %v1424_v43  ;;  %v1328_v58 = vsel %vm1315_vm5, %v1295_v57, %v2775_v0  ;;  %v1329_v2 = vsel %vm1315_vm5, %v1296_v41, %v2776_v16  ;;  %v4513_v16 = vld [vmem:[#allocation6_spill] sm:$0xff]  ;;  %v4514_v0 = vld [vmem:[#allocation7_spill] sm:$0xff]  ;;  %v4516_v57 = vld [vmem:[#allocation17_spill] sm:$0xff] }
 0x127   : > { %v2781_v33 = vunpack.i.h.bf16 %v2779_v62  ;;  %v2780_v55 = vunpack.i.l.bf16 %v2779_v62  ;;  %v2784_v11 = vpop.permute.xlu1 %2783  ;;  %v1462_v46 = vpack.c.bf16 %v1329_v2, %v1328_v58  ;;  %v1479_v62 = vpack.c.bf16 %v4514_v0, %v4513_v16  ;;  %v4517_v58 = vld [vmem:[#allocation44_spill] sm:$0xff] }
 0x128   : > { %1764 = vmatprep.mubr.bf16.mxu0 %v1463_v8  ;;  %v2786_v34 = vunpack.i.h.bf16 %v2784_v11  ;;  %v2785_v20 = vunpack.i.l.bf16 %v2784_v11  ;;  %v1482_v41 = vpack.c.bf16 %v4516_v57, %v4515_v59  ;;  %v2971_v59 = vld [vmem:[#allocation2 + $0xe0] sm:$0xff] }
 0x129   : > { %1765 = vmatmul.mubr.bf16.gmra.mxu0 %v1462_v46  ;;  %2400 = vmatmul.mubr.msk.bf16.gmra.mxu1 %vm199_vm0, %v4507_v38  ;;  %v1363_v19 = vsel %vm199_vm0, %v4508_v4, %v2781_v33  ;;  %v1362_v54 = vsel %vm199_vm0, %v4509_v51, %v2780_v55 }
 0x12a   : > { %v2789_v6 = vpop.permute.xlu0 %2788  ;;  %2403 = vmatprep.mubr.msk.bf16.mxu1 %vm199_vm0, %v1470_v35  ;;  %v1265_v60 = vsel %vm199_vm0, %v2967_v36, %v2786_v34  ;;  %v1264_v7 = vsel %vm199_vm0, %v2968_v18, %v2785_v20  ;;  %v4518_v35 = vld [vmem:[#allocation43_spill] sm:$0xff]  ;;  %v4520_v36 = vld [vmem:[#allocation21_spill] sm:$0xff] }
 0x12b   : > { %v2791_v49 = vunpack.i.h.bf16 %v2789_v6  ;;  %v2790_v47 = vunpack.i.l.bf16 %v2789_v6  ;;  %v2794_v61 = vpop.permute.xlu1 %2793 }
 0x12c   : > { %v2796_v23 = vunpack.i.h.bf16 %v2794_v61  ;;  %v2795_v25 = vunpack.i.l.bf16 %v2794_v61 }
 0x12d   : > { %v1394_v13 = vsel %vm1282_vm4, %v1362_v54, %v2790_v47  ;;  %v1395_v28 = vsel %vm1282_vm4, %v1363_v19, %v2791_v49  ;;  %v2969_v54 = vld [vmem:[#allocation2 + $0xc8] sm:$0xff] }
 0x12e   : > { %v2799_v21 = vpop.permute.xlu0 %2798  ;;  %v1297_v17 = vsel %vm1282_vm4, %v1264_v7, %v2795_v25  ;;  %v1298_v5 = vsel %vm1282_vm4, %v1265_v60, %v2796_v23  ;;  %v2970_v23 = vld [vmem:[#allocation2 + $0xc0] sm:$0xff] }
 0x12f   : > { %v2801_v48 = vunpack.i.h.bf16 %v2799_v21  ;;  %v2800_v3 = vunpack.i.l.bf16 %v2799_v21  ;;  %v2804_v44 = vpop.permute.xlu1 %2803 }
 0x130   : > { %v2806_v10 = vunpack.i.h.bf16 %v2804_v44  ;;  %v2805_v30 = vunpack.i.l.bf16 %v2804_v44 }
 0x131   : > { %v1426_v45 = vsel %vm1315_vm5, %v1394_v13, %v2800_v3  ;;  %v1427_v63 = vsel %vm1315_vm5, %v1395_v28, %v2801_v48  ;;  %2404 = vmatmul.mubr.msk.bf16.gmra.mxu1 %vm199_vm0, %v4512_v15 }
 0x132   : > { %v2809_v9 = vpop.permute.xlu0 %2808  ;;  %v1466_v31 = vpack.c.bf16 %v1427_v63, %v1426_v45  ;;  %v1330_v26 = vsel %vm1315_vm5, %v1297_v17, %v2805_v30  ;;  %v1331_v27 = vsel %vm1315_vm5, %v1298_v5, %v2806_v10  ;;  %2407 = vmatprep.mubr.msk.bf16.mxu1 %vm199_vm0, %v1476_v29  ;;  %v4519_v29 = vld [vmem:[#allocation20_spill] sm:$0xff]  ;;  %v4521_v17 = vld [vmem:[#allocation19_spill] sm:$0xff]  ;;  %v4522_v5 = vld [vmem:[#allocation18_spill] sm:$0xff] }
 0x133   : > { %v2811_v22 = vunpack.i.h.bf16 %v2809_v9  ;;  %v2810_v43 = vunpack.i.l.bf16 %v2809_v9  ;;  %v2814_v40 = vpop.permute.xlu1 %2813  ;;  %v1465_v37 = vpack.c.bf16 %v1331_v27, %v1330_v26  ;;  %v1485_v60 = vpack.c.bf16 %v4520_v36, %v4519_v29 }
 0x134   : > { %1772 = vmatprep.mubr.bf16.mxu0 %v1466_v31  ;;  %v2816_v55 = vunpack.i.h.bf16 %v2814_v40  ;;  %v2815_v46 = vunpack.i.l.bf16 %v2814_v40  ;;  %v4523_v15 = vpack.c.bf16 %v4521_v17, %v4522_v5 }
 0x135   : > { %1773 = vmatmul.mubr.bf16.gmra.mxu0 %v1465_v37  ;;  %v1365_v2 = vsel %vm199_vm0, %v4517_v58, %v2811_v22  ;;  %v1364_v33 = vsel %vm199_vm0, %v4518_v35, %v2810_v43  ;;  %v2972_v58 = vld [vmem:[#allocation2 + $0xd8] sm:$0xff] }
 0x136   : > { %v2819_v50 = vpop.permute.xlu0 %2818  ;;  %v1267_v34 = vsel %vm199_vm0, %v2969_v54, %v2816_v55  ;;  %v1266_v25 = vsel %vm199_vm0, %v2970_v23, %v2815_v46 }
 0x137   : > { %v2821_v8 = vunpack.i.h.bf16 %v2819_v50  ;;  %v2820_v52 = vunpack.i.l.bf16 %v2819_v50  ;;  %v2824_v11 = vpop.permute.xlu1 %2823 }
 0x138   : > { %v2826_v38 = vunpack.i.h.bf16 %v2824_v11  ;;  %v2825_v49 = vunpack.i.l.bf16 %v2824_v11 }
 0x139   : > { %2408 = vmatmul.mubr.msk.bf16.gmra.mxu1 %vm199_vm0, %v1479_v62  ;;  %v1396_v19 = vsel %vm1282_vm4, %v1364_v33, %v2820_v52  ;;  %v1397_v51 = vsel %vm1282_vm4, %v1365_v2, %v2821_v8 }
 0x13a   : > { %v2829_v6 = vpop.permute.xlu0 %2828  ;;  %2411 = vmatprep.mubr.msk.bf16.mxu1 %vm199_vm0, %v1482_v41  ;;  %v1299_v1 = vsel %vm1282_vm4, %v1266_v25, %v2825_v49  ;;  %v1300_v12 = vsel %vm1282_vm4, %v1267_v34, %v2826_v38 }
 0x13b   : > { %v2831_v47 = vunpack.i.h.bf16 %v2829_v6  ;;  %v2830_v4 = vunpack.i.l.bf16 %v2829_v6  ;;  %v2834_v61 = vpop.permute.xlu1 %2833 }
 0x13c   : > { %v2836_v48 = vunpack.i.h.bf16 %v2834_v61  ;;  %v2835_v3 = vunpack.i.l.bf16 %v2834_v61 }
 0x13d   : > { %v1428_v20 = vsel %vm1315_vm5, %v1396_v19, %v2830_v4  ;;  %v1429_v21 = vsel %vm1315_vm5, %v1397_v51, %v2831_v47 }
 0x13e   : > { %v2839_v13 = vpop.permute.xlu0 %2838  ;;  %v1469_v28 = vpack.c.bf16 %v1429_v21, %v1428_v20  ;;  %v1332_v44 = vsel %vm1315_vm5, %v1299_v1, %v2835_v3  ;;  %v1333_v45 = vsel %vm1315_vm5, %v1300_v12, %v2836_v48  ;;  %v2973_v12 = vld [vmem:[#allocation2 + $0xf8] sm:$0xff] }
 0x13f   : > { %v2841_v63 = vunpack.i.h.bf16 %v2839_v13  ;;  %v2840_v18 = vunpack.i.l.bf16 %v2839_v13  ;;  %v2844_v7 = vpop.permute.xlu1 %2843  ;;  %v1468_v10 = vpack.c.bf16 %v1333_v45, %v1332_v44 }
 0x140   : > { %1780 = vmatprep.mubr.bf16.mxu0 %v1469_v28  ;;  %v2846_v22 = vunpack.i.h.bf16 %v2844_v7  ;;  %v2845_v40 = vunpack.i.l.bf16 %v2844_v7 }
 0x141   : > { %1781 = vmatmul.mubr.bf16.gmra.mxu0 %v1468_v10  ;;  %2412 = vmatmul.mubr.msk.bf16.gmra.mxu1 %vm199_vm0, %v1485_v60  ;;  %v1367_v26 = vsel %vm199_vm0, %v3799_v53, %v2841_v63  ;;  %v1366_v27 = vsel %vm199_vm0, %v3791_v32, %v2840_v18  ;;  %v2974_v60 = vld [vmem:[#allocation2 + $0xf0] sm:$0xff] }
 0x142   : > { %v2849_v30 = vpop.permute.xlu0 %2848  ;;  %2415 = vmatprep.mubr.msk.bf16.mxu1 %vm199_vm0, %v4523_v15  ;;  %v1269_v57 = vsel %vm199_vm0, %v2971_v59, %v2846_v22  ;;  %v1268_v2 = vsel %vm199_vm0, %v2972_v58, %v2845_v40  ;;  %v4524_v40 = vld [vmem:[#allocation9_spill] sm:$0xff] }
 0x143   : > { %v2851_v9 = vunpack.i.h.bf16 %v2849_v30  ;;  %v2850_v31 = vunpack.i.l.bf16 %v2849_v30  ;;  %v2854_v43 = vpop.permute.xlu1 %2853 }
 0x144   : > { %v2856_v50 = vunpack.i.h.bf16 %v2854_v43  ;;  %v2855_v16 = vunpack.i.l.bf16 %v2854_v43 }
 0x145   : > { %v1398_v8 = vsel %vm1282_vm4, %v1366_v27, %v2850_v31  ;;  %v1399_v52 = vsel %vm1282_vm4, %v1367_v26, %v2851_v9 }
 0x146   : > { %v2859_v37 = vpop.permute.xlu0 %2858  ;;  %v1301_v46 = vsel %vm1282_vm4, %v1268_v2, %v2855_v16  ;;  %v1302_v6 = vsel %vm1282_vm4, %v1269_v57, %v2856_v50  ;;  %v4525_v50 = vld [vmem:[#allocation8_spill] sm:$0xff]  ;;  %v2975_v2 = vld [vmem:[#allocation2 + $0x110] sm:$0xff] }
 0x147   : > { %v2861_v0 = vunpack.i.h.bf16 %v2859_v37  ;;  %v2860_v62 = vunpack.i.l.bf16 %v2859_v37  ;;  %v2864_v41 = vpop.permute.xlu1 %2863 }
 0x148   : > { %v2866_v35 = vunpack.i.h.bf16 %v2864_v41  ;;  %v2865_v33 = vunpack.i.l.bf16 %v2864_v41 }
 0x149   : > { %v1430_v53 = vsel %vm1315_vm5, %v1398_v8, %v2860_v62  ;;  %v1431_v32 = vsel %vm1315_vm5, %v1399_v52, %v2861_v0  ;;  %2416 = vmatmul.mubr.msk.bf16.gmra.mxu1 %vm199_vm0, %v1491_v14 }
 0x14a   : > { %v2869_v55 = vpop.permute.xlu0 %2868  ;;  %v1472_v11 = vpack.c.bf16 %v1431_v32, %v1430_v53  ;;  %v1334_v38 = vsel %vm1315_vm5, %v1301_v46, %v2865_v33  ;;  %v1335_v49 = vsel %vm1315_vm5, %v1302_v6, %v2866_v35  ;;  %v2976_v46 = vld [vmem:[#allocation2 + $0x108] sm:$0xff] }
 0x14b   : > { %v2871_v47 = vunpack.i.h.bf16 %v2869_v55  ;;  %v2870_v4 = vunpack.i.l.bf16 %v2869_v55  ;;  %v2874_v19 = vpop.permute.xlu1 %2873  ;;  %v1471_v51 = vpack.c.bf16 %v1335_v49, %v1334_v38 }
 0x14c   : > { %1788 = vmatprep.mubr.bf16.mxu0 %v1472_v11  ;;  %v2876_v42 = vunpack.i.h.bf16 %v2874_v19  ;;  %v2875_v21 = vunpack.i.l.bf16 %v2874_v19 }
 0x14d   : > { %1789 = vmatmul.mubr.bf16.gmra.mxu0 %v1471_v51  ;;  %v1369_v20 = vsel %vm199_vm0, %v3889_v56, %v2871_v47  ;;  %v1368_v39 = vsel %vm199_vm0, %v3886_v24, %v2870_v4 }
 0x14e   : > { %v2879_v54 = vpop.permute.xlu0 %2878  ;;  %v1271_v29 = vsel %vm199_vm0, %v2973_v12, %v2876_v42  ;;  %v1270_v44 = vsel %vm199_vm0, %v2974_v60, %v2875_v21 }
 0x14f   : > { %v2881_v34 = vunpack.i.h.bf16 %v2879_v54  ;;  %v2880_v61 = vunpack.i.l.bf16 %v2879_v54  ;;  %v2884_v14 = vpop.permute.xlu1 %2883 }
 0x150   : > { %v2886_v25 = vunpack.i.h.bf16 %v2884_v14  ;;  %v2885_v48 = vunpack.i.l.bf16 %v2884_v14 }
 0x151   : > { %v1400_v28 = vsel %vm1282_vm4, %v1368_v39, %v2880_v61  ;;  %v1401_v1 = vsel %vm1282_vm4, %v1369_v20, %v2881_v34 }
 0x152   : > { %v2889_v23 = vpop.permute.xlu0 %2888  ;;  %v1303_v10 = vsel %vm1282_vm4, %v1270_v44, %v2885_v48  ;;  %v1304_v30 = vsel %vm1282_vm4, %v1271_v29, %v2886_v25 }
 0x153   : > { %v2891_v3 = vunpack.i.h.bf16 %v2889_v23  ;;  %v2890_v13 = vunpack.i.l.bf16 %v2889_v23  ;;  %v2894_v36 = vpop.permute.xlu1 %2893 }
 0x154   : > { %v2896_v45 = vunpack.i.h.bf16 %v2894_v36  ;;  %v2895_v63 = vunpack.i.l.bf16 %v2894_v36 }
 0x155   : > { %v1432_v56 = vsel %vm1315_vm5, %v1400_v28, %v2890_v13  ;;  %v1433_v24 = vsel %vm1315_vm5, %v1401_v1, %v2891_v3 }
 0x156   : > { %v2899_v18 = vpop.permute.xlu0 %2898  ;;  %v1475_v7 = vpack.c.bf16 %v1433_v24, %v1432_v56  ;;  %v1336_v9 = vsel %vm1315_vm5, %v1303_v10, %v2895_v63  ;;  %v1337_v31 = vsel %vm1315_vm5, %v1304_v30, %v2896_v45 }
 0x157   : > { %v2901_v17 = vunpack.i.h.bf16 %v2899_v18  ;;  %v2900_v5 = vunpack.i.l.bf16 %v2899_v18  ;;  %v2904_v15 = vpop.permute.xlu1 %2903  ;;  %v1474_v26 = vpack.c.bf16 %v1337_v31, %v1336_v9 }
 0x158   : > { %1796 = vmatprep.mubr.bf16.mxu0 %v1475_v7  ;;  %v2906_v0 = vunpack.i.h.bf16 %v2904_v15  ;;  %v2905_v8 = vunpack.i.l.bf16 %v2904_v15 }
 0x159   : > { %1797 = vmatmul.mubr.bf16.gmra.mxu0 %v1474_v26  ;;  %v1371_v37 = vsel %vm199_vm0, %v4524_v40, %v2901_v17  ;;  %v1370_v16 = vsel %vm199_vm0, %v4525_v50, %v2900_v5 }
 0x15a   : > { %v2909_v27 = vpop.permute.xlu0 %2908  ;;  %v1273_v35 = vsel %vm199_vm0, %v2975_v2, %v2906_v0  ;;  %v1272_v6 = vsel %vm199_vm0, %v2976_v46, %v2905_v8 }
 0x15b   : > { %v2911_v22 = vunpack.i.h.bf16 %v2909_v27  ;;  %v2910_v43 = vunpack.i.l.bf16 %v2909_v27  ;;  %v2914_v62 = vpop.permute.xlu1 %2913 }
 0x15c   : > { %v2916_v59 = vunpack.i.h.bf16 %v2914_v62  ;;  %v2915_v57 = vunpack.i.l.bf16 %v2914_v62  ;;  %v4212_v62 = vld [vmem:[%s4387_s2] ss:$0 sm:$0xff] }
 0x15d   : > { %v1402_v32 = vsel %vm1282_vm4, %v1370_v16, %v2910_v43  ;;  %v1403_v58 = vsel %vm1282_vm4, %v1371_v37, %v2911_v22 }
 0x15e   : > { %v2919_v52 = vpop.permute.xlu0 %2918  ;;  %v1305_v4 = vsel %vm1282_vm4, %v1272_v6, %v2915_v57  ;;  %v1306_v19 = vsel %vm1282_vm4, %v1273_v35, %v2916_v59  ;;  %v4217_v57 = vld [vmem:[%s4388_s3] ss:$0 sm:$0xff] }
 0x15f   : > { %v2921_v41 = vunpack.i.h.bf16 %v2919_v52  ;;  %v2920_v53 = vunpack.i.l.bf16 %v2919_v52  ;;  %v2924_v33 = vpop.permute.xlu1 %2923 }
 0x160   : > { %v2926_v38 = vunpack.i.h.bf16 %v2924_v33  ;;  %v2925_v49 = vunpack.i.l.bf16 %v2924_v33 }
 0x161   : > { %v1434_v55 = vsel %vm1315_vm5, %v1402_v32, %v2920_v53  ;;  %v1435_v11 = vsel %vm1315_vm5, %v1403_v58, %v2921_v41 }
 0x162   : > { %v1478_v47 = vpack.c.bf16 %v1435_v11, %v1434_v55  ;;  %v1338_v51 = vsel %vm1315_vm5, %v1305_v4, %v2925_v49  ;;  %v1339_v54 = vsel %vm1315_vm5, %v1306_v19, %v2926_v38 }
 0x163   : > { %v1477_v34 = vpack.c.bf16 %v1339_v54, %v1338_v51 }
 0x164   : > { %1804 = vmatprep.mubr.bf16.mxu0 %v1478_v47 }
 0x165   : > { %1805 = vmatmul.mubr.bf16.gmra.mxu0 %v1477_v34 }
 0x180   : > { %v2269_v23 = vpop.f32.mrf.mxu0 }
 0x182   : > { %v2270_v48 = vpop.f32.mrf.mxu0 }
 0x183   : > { %v2271_v8 = vadd.f32 %v2270_v48, %v2269_v23 }
 0x184   : > { %v2272_v1 = vpop.f32.mrf.mxu0 }
 0x186   : > { %v2273_v36 = vpop.f32.mrf.mxu0 }
 0x187   : > { %v2274_v33 = vadd.f32 %v2273_v36, %v2272_v1 }
 0x188   : > { %v2341_v61 = vpop.f32.mrf.mxu1 }
 0x18a   : > { %v2342_v20 = vpop.f32.mrf.mxu1 }
 0x18b   : > { %v4189_v39 = vadd.f32 %v2342_v20, %v2341_v61 }
 0x18c   : > { %v2344_v42 = vpop.f32.mrf.mxu1 }
 0x18e   : > { %v2345_v14 = vpop.f32.mrf.mxu1 }
 0x18f   : > { %v4191_v21 = vadd.f32 %v2345_v14, %v2344_v42 }
 0x195   : > { %v2275_v56 = vpop.f32.mrf.mxu0 }
 0x197   : > { %v2276_v24 = vpop.f32.mrf.mxu0 }
 0x198   : > { %v2277_v50 = vadd.f32 %v2276_v24, %v2275_v56 }
 0x199   : > { %v2278_v60 = vpop.f32.mrf.mxu0 }
 0x19b   : > { %v2279_v45 = vpop.f32.mrf.mxu0 }
 0x19c   : > { %v2280_v53 = vadd.f32 %v2279_v45, %v2278_v60 }
 0x19d   : > { %v2347_v25 = vpop.f32.mrf.mxu1 }
 0x19f   : > { %v2348_v3 = vpop.f32.mrf.mxu1 }
 0x1a0   : > { %v4193_v13 = vadd.f32 %v2348_v3, %v2347_v25 }
 0x1a1   : > { %v2350_v28 = vpop.f32.mrf.mxu1 }
 0x1a3   : > { %v2351_v12 = vpop.f32.mrf.mxu1 }
 0x1a4   : > { %v4195_v29 = vadd.f32 %v2351_v12, %v2350_v28 }
 0x1ac   : > { %v2281_v7 = vpop.f32.mrf.mxu0 }
 0x1ae   : > { %v2282_v31 = vpop.f32.mrf.mxu0 }
 0x1af   : > { %v2283_v54 = vadd.f32 %v2282_v31, %v2281_v7 }
 0x1b0   : > { %v2284_v17 = vpop.f32.mrf.mxu0 }
 0x1b2   : > { %v2285_v5 = vpop.f32.mrf.mxu0 }
 0x1b4   : > { %v2353_v44 = vpop.f32.mrf.mxu1 }
 0x1b6   : > { %v2354_v63 = vpop.f32.mrf.mxu1 }
 0x1b7   : > { %v4197_v18 = vadd.f32 %v2354_v63, %v2353_v44  ;;  %v2286_v63 = vadd.f32 %v2285_v5, %v2284_v17 }
 0x1b8   : > { %v2356_v10 = vpop.f32.mrf.mxu1 }
 0x1ba   : > { %v2357_v30 = vpop.f32.mrf.mxu1 }
 0x1bb   : > { %v4199_v9 = vadd.f32 %v2357_v30, %v2356_v10 }
 0x1c1   : > { %v2287_v15 = vpop.f32.mrf.mxu0 }
 0x1c3   : > { %v2288_v26 = vpop.f32.mrf.mxu0 }
 0x1c4   : > { %v2289_v6 = vadd.f32 %v2288_v26, %v2287_v15 }
 0x1c5   : > { %v2290_v43 = vpop.f32.mrf.mxu0 }
 0x1c7   : > { %v2291_v16 = vpop.f32.mrf.mxu0 }
 0x1c8   : > { %v2292_v23 = vadd.f32 %v2291_v16, %v2290_v43 }
 0x1c9   : > { %v4201_v27 = vpop.f32.mrf.mxu1 }
 0x1cb   : > { %v4203_v22 = vpop.f32.mrf.mxu1 }
 0x1cd   : > { %v4205_v40 = vpop.f32.mrf.mxu1 }
 0x1cf   : > { %v4207_v37 = vpop.f32.mrf.mxu1 }
 0x1d1   : > { %v2389_v0 = vpop.f32.mrf.mxu1 }
 0x1d2   : > { %v1888_v52 = vadd.f32 %v2389_v0, %v2277_v50 }
 0x1d3   : > { %v1879_v41 = vpop.f32.mrf.mxu1 }
 0x1d4   : > { %v2293_v59 = vpop.f32.mrf.mxu0  ;;  %v2015_v32 = vmul.f32 %v4212_v62, %v1888_v52  ;;  %v1880_v58 = vadd.f32 %v2271_v8, %v1879_v41 }
 0x1d5   : > { %v2390_v35 = vpop.f32.mrf.mxu1 }
 0x1d6   : > { %v2294_v2 = vpop.f32.mrf.mxu0  ;;  %v2054_v55 = vadd.f32 %v4217_v57, %v2015_v32  ;;  %v2013_v11 = vmul.f32 %v4212_v62, %v1880_v58  ;;  %v1891_v46 = vadd.f32 %v2390_v35, %v2280_v53 }
 0x1d7   : > { %v1882_v49 = vpop.f32.mrf.mxu1  ;;  %v2295_v0 = vadd.f32 %v2294_v2, %v2293_v59 }
 0x1d8   : > { %v2296_v38 = vpop.f32.mrf.mxu0  ;;  %v2086_v47 = vmax.f32 %v2054_v55, 0.0  ;;  %v2052_v4 = vadd.f32 %v4217_v57, %v2013_v11  ;;  %v2016_v19 = vmul.f32 %v4212_v62, %v1891_v46  ;;  %v1883_v51 = vadd.f32 %v2274_v33, %v1882_v49 }
 0x1d9   : > { %v2393_v34 = vpop.f32.mrf.mxu1 }
 0x1da   : > { %2119 = vst.msk [vmem:[%s4227_s20 + $0x10] sm:$0xff] %vm2116_vm6, %v2086_v47  ;;  %v2084_v61 = vmax.f32 %v2052_v4, 0.0  ;;  %v2055_v20 = vadd.f32 %v4217_v57, %v2016_v19  ;;  %v2014_v42 = vmul.f32 %v4212_v62, %v1883_v51  ;;  %v1904_v14 = vadd.f32 %v2393_v34, %v2289_v6  ;;  %v2297_v25 = vpop.f32.mrf.mxu0 }
 0x1db   : > { %v1895_v48 = vpop.f32.mrf.mxu1  ;;  %v2298_v55 = vadd.f32 %v2297_v25, %v2296_v38 }
 0x1dc   : > { %2117 = vst.msk [vmem:[%s4227_s20] sm:$0xff] %vm2116_vm6, %v2084_v61  ;;  %v2087_v3 = vmax.f32 %v2055_v20, 0.0  ;;  %v2053_v28 = vadd.f32 %v4217_v57, %v2014_v42  ;;  %v2019_v1 = vmul.f32 %v4212_v62, %v1904_v14  ;;  %v1896_v12 = vadd.f32 %v2283_v54, %v1895_v48 }
 0x1dd   : > { %v2299_v36 = vpop.f32.mrf.mxu0  ;;  %v2394_v56 = vpop.f32.mrf.mxu1 }
 0x1de   : > { %2120 = vst.msk [vmem:[%s4227_s20 + $0x18] sm:$0xff] %vm2116_vm6, %v2087_v3  ;;  %v2085_v24 = vmax.f32 %v2053_v28, 0.0  ;;  %v2058_v60 = vadd.f32 %v4217_v57, %v2019_v1  ;;  %v2017_v44 = vmul.f32 %v4212_v62, %v1896_v12  ;;  %v1907_v45 = vadd.f32 %v2394_v56, %v2292_v23 }
 0x1df   : > { %v2300_v7 = vpop.f32.mrf.mxu0  ;;  %v1898_v10 = vpop.f32.mrf.mxu1 }
 0x1e0   : > { %2118 = vst.msk [vmem:[%s4227_s20 + $0x8] sm:$0xff] %vm2116_vm6, %v2085_v24  ;;  %v2090_v30 = vmax.f32 %v2058_v60, 0.0  ;;  %v2056_v31 = vadd.f32 %v4217_v57, %v2017_v44  ;;  %v2020_v15 = vmul.f32 %v4212_v62, %v1907_v45  ;;  %v2301_v26 = vadd.f32 %v2300_v7, %v2299_v36 }
 0x1e1   : > { %v1899_v43 = vadd.f32 %v2286_v63, %v1898_v10  ;;  %v2302_v50 = vpop.f32.mrf.mxu0  ;;  %v2397_v16 = vpop.f32.mrf.mxu1 }
 0x1e2   : > { %2123 = vst.msk [vmem:[%s4227_s20 + $0x30] sm:$0xff] %vm2116_vm6, %v2090_v30  ;;  %v2088_v8 = vmax.f32 %v2056_v31, 0.0  ;;  %v2059_v17 = vadd.f32 %v4217_v57, %v2020_v15  ;;  %v1920_v5 = vadd.f32 %v2397_v16, %v2301_v26 }
 0x1e3   : > { %v2018_v52 = vmul.f32 %v4212_v62, %v1899_v43  ;;  %v2303_v41 = vpop.f32.mrf.mxu0  ;;  %v1911_v53 = vpop.f32.mrf.mxu1 }
 0x1e4   : > { %2121 = vst.msk [vmem:[%s4227_s20 + $0x20] sm:$0xff] %vm2116_vm6, %v2088_v8  ;;  %v2091_v32 = vmax.f32 %v2059_v17, 0.0  ;;  %v2023_v58 = vmul.f32 %v4212_v62, %v1920_v5  ;;  %v2304_v35 = vadd.f32 %v2303_v41, %v2302_v50  ;;  %v1912_v33 = vadd.f32 %v2295_v0, %v1911_v53 }
 0x1e5   : > { %v2057_v59 = vadd.f32 %v4217_v57, %v2018_v52  ;;  %v2398_v2 = vpop.f32.mrf.mxu1 }
 0x1e6   : > { %2124 = vst.msk [vmem:[%s4227_s20 + $0x38] sm:$0xff] %vm2116_vm6, %v2091_v32  ;;  %v2062_v11 = vadd.f32 %v4217_v57, %v2023_v58  ;;  %v2021_v46 = vmul.f32 %v4212_v62, %v1912_v33  ;;  %v1923_v6 = vadd.f32 %v2398_v2, %v2304_v35 }
 0x1e7   : > { %v2089_v49 = vmax.f32 %v2057_v59, 0.0  ;;  %v1914_v47 = vpop.f32.mrf.mxu1 }
 0x1e8   : > { %v2094_v4 = vmax.f32 %v2062_v11, 0.0  ;;  %v2060_v19 = vadd.f32 %v4217_v57, %v2021_v46  ;;  %v2024_v51 = vmul.f32 %v4212_v62, %v1923_v6  ;;  %v1915_v54 = vadd.f32 %v2298_v55, %v1914_v47 }
 0x1e9   : > { %2122 = vst.msk [vmem:[%s4227_s20 + $0x28] sm:$0xff] %vm2116_vm6, %v2089_v49  ;;  %v2305_v38 = vpop.f32.mrf.mxu0  ;;  %v2401_v34 = vpop.f32.mrf.mxu1 }
 0x1ea   : > { %2127 = vst.msk [vmem:[%s4227_s20 + $0x50] sm:$0xff] %vm2116_vm6, %v2094_v4  ;;  %v2092_v61 = vmax.f32 %v2060_v19, 0.0  ;;  %v2063_v20 = vadd.f32 %v4217_v57, %v2024_v51  ;;  %v2022_v42 = vmul.f32 %v4212_v62, %v1915_v54 }
 0x1eb   : > { %v2306_v14 = vpop.f32.mrf.mxu0  ;;  %v1927_v23 = vpop.f32.mrf.mxu1 }
 0x1ec   : > { %2125 = vst.msk [vmem:[%s4227_s20 + $0x40] sm:$0xff] %vm2116_vm6, %v2092_v61  ;;  %v2095_v25 = vmax.f32 %v2063_v20, 0.0  ;;  %v2061_v48 = vadd.f32 %v4217_v57, %v2022_v42  ;;  %v2307_v3 = vadd.f32 %v2306_v14, %v2305_v38 }
 0x1ed   : > { %v2308_v28 = vpop.f32.mrf.mxu0  ;;  %v2402_v1 = vpop.f32.mrf.mxu1 }
 0x1ee   : > { %2128 = vst.msk [vmem:[%s4227_s20 + $0x58] sm:$0xff] %vm2116_vm6, %v2095_v25  ;;  %v2093_v12 = vmax.f32 %v2061_v48, 0.0  ;;  %v1928_v36 = vadd.f32 %v2307_v3, %v1927_v23  ;;  %v2361_v25 = vadd.f32 %v4203_v22, %v4201_v27 }
 0x1ef   : > { %v2309_v56 = vpop.f32.mrf.mxu0  ;;  %v1930_v24 = vpop.f32.mrf.mxu1 }
 0x1f0   : > { %2126 = vst.msk [vmem:[%s4227_s20 + $0x48] sm:$0xff] %vm2116_vm6, %v2093_v12  ;;  %v2025_v60 = vmul.f32 %v4212_v62, %v1928_v36  ;;  %v2310_v44 = vadd.f32 %v2309_v56, %v2308_v28 }
 0x1f1   : > { %v4275_v45 = vpop.f32.mrf.mxu1 }
 0x1f2   : > { %v2064_v63 = vadd.f32 %v4217_v57, %v2025_v60  ;;  %v1931_v7 = vadd.f32 %v2310_v44, %v1930_v24  ;;  %v2364_v44 = vadd.f32 %v4207_v37, %v4205_v40 }
 0x1f3   : > { %v1943_v10 = vpop.f32.mrf.mxu1 }
 0x1f4   : > { %v2096_v30 = vmax.f32 %v2064_v63, 0.0  ;;  %v2026_v31 = vmul.f32 %v4212_v62, %v1931_v7 }
 0x1f5   : > { %v2311_v15 = vpop.f32.mrf.mxu0  ;;  %v4279_v26 = vpop.f32.mrf.mxu1 }
 0x1f6   : > { %2129 = vst.msk [vmem:[%s4227_s20 + $0x60] sm:$0xff] %vm2116_vm6, %v2096_v30  ;;  %v2065_v43 = vadd.f32 %v4217_v57, %v2026_v31 }
 0x1f7   : > { %v2312_v50 = vpop.f32.mrf.mxu0  ;;  %v1946_v16 = vpop.f32.mrf.mxu1 }
 0x1f8   : > { %v2097_v0 = vmax.f32 %v2065_v43, 0.0  ;;  %v2313_v8 = vadd.f32 %v2312_v50, %v2311_v15 }
 0x1f9   : > { %v2314_v17 = vpop.f32.mrf.mxu0  ;;  %v4284_v5 = vpop.f32.mrf.mxu1 }
 0x1fa   : > { %2130 = vst.msk [vmem:[%s4227_s20 + $0x68] sm:$0xff] %vm2116_vm6, %v2097_v0  ;;  %v1936_v52 = vadd.f32 %v2401_v34, %v2313_v8 }
 0x1fb   : > { %v2315_v41 = vpop.f32.mrf.mxu0  ;;  %v4288_v53 = vpop.f32.mrf.mxu1 }
 0x1fc   : > { %v2027_v32 = vmul.f32 %v4212_v62, %v1936_v52  ;;  %v2316_v58 = vadd.f32 %v2315_v41, %v2314_v17 }
 0x1fd   : > { %v4291_v35 = vpop.f32.mrf.mxu1 }
 0x1fe   : > { %v2066_v33 = vadd.f32 %v4217_v57, %v2027_v32  ;;  %v1939_v59 = vadd.f32 %v2402_v1, %v2316_v58 }
 0x1ff   : > { %v4294_v2 = vpop.f32.mrf.mxu1 }
 0x200   : > { %v2098_v55 = vmax.f32 %v2066_v33, 0.0  ;;  %v2028_v11 = vmul.f32 %v4212_v62, %v1939_v59 }
 0x201   : > { %v2317_v46 = vpop.f32.mrf.mxu0  ;;  %v2413_v6 = vpop.f32.mrf.mxu1 }
 0x202   : > { %2131 = vst.msk [vmem:[%s4227_s20 + $0x70] sm:$0xff] %vm2116_vm6, %v2098_v55  ;;  %v2067_v49 = vadd.f32 %v4217_v57, %v2028_v11  ;;  %v1984_v47 = vadd.f32 %v2413_v6, %v4193_v13 }
 0x203   : > { %v2318_v4 = vpop.f32.mrf.mxu0  ;;  %v1975_v19 = vpop.f32.mrf.mxu1 }
 0x204   : > { %v2099_v51 = vmax.f32 %v2067_v49, 0.0  ;;  %v2039_v54 = vmul.f32 %v4212_v62, %v1984_v47  ;;  %v2319_v38 = vadd.f32 %v2318_v4, %v2317_v46  ;;  %v1976_v34 = vadd.f32 %v4189_v39, %v1975_v19 }
 0x205   : > { %v2320_v61 = vpop.f32.mrf.mxu0  ;;  %v2414_v20 = vpop.f32.mrf.mxu1 }
 0x206   : > { %2132 = vst.msk [vmem:[%s4227_s20 + $0x78] sm:$0xff] %vm2116_vm6, %v2099_v51  ;;  %v2078_v42 = vadd.f32 %v4217_v57, %v2039_v54  ;;  %v1944_v14 = vadd.f32 %v2319_v38, %v1943_v10  ;;  %v2037_v23 = vmul.f32 %v4212_v62, %v1976_v34  ;;  %v1987_v13 = vadd.f32 %v2414_v20, %v4195_v29 }
 0x207   : > { %v2321_v48 = vpop.f32.mrf.mxu0  ;;  %v1978_v3 = vpop.f32.mrf.mxu1 }
 0x208   : > { %v2110_v28 = vmax.f32 %v2078_v42, 0.0  ;;  %v2029_v39 = vmul.f32 %v4212_v62, %v1944_v14  ;;  %v2076_v1 = vadd.f32 %v4217_v57, %v2037_v23  ;;  %v2040_v12 = vmul.f32 %v4212_v62, %v1987_v13 }
 0x209   : > { %v2322_v36 = vadd.f32 %v2321_v48, %v2320_v61  ;;  %v1979_v56 = vadd.f32 %v4191_v21, %v1978_v3  ;;  %v2417_v24 = vpop.f32.mrf.mxu1 }
 0x20a   : > { %2143 = vst.msk [vmem:[%s4227_s20 + $0xd0] sm:$0xff] %vm2116_vm6, %v2110_v28  ;;  %v2068_v29 = vadd.f32 %v4217_v57, %v2029_v39  ;;  %v2108_v60 = vmax.f32 %v2076_v1, 0.0  ;;  %v2079_v27 = vadd.f32 %v4217_v57, %v2040_v12  ;;  %v2000_v22 = vadd.f32 %v2417_v24, %v2361_v25 }
 0x20b   : > { %v1947_v63 = vadd.f32 %v2322_v36, %v1946_v16  ;;  %v2038_v7 = vmul.f32 %v4212_v62, %v1979_v56  ;;  %v1991_v10 = vpop.f32.mrf.mxu1 }
 0x20c   : > { %v2100_v30 = vmax.f32 %v2068_v29, 0.0  ;;  %2141 = vst.msk [vmem:[%s4227_s20 + $0xc0] sm:$0xff] %vm2116_vm6, %v2108_v60  ;;  %v2111_v21 = vmax.f32 %v2079_v27, 0.0  ;;  %v2043_v31 = vmul.f32 %v4212_v62, %v2000_v22  ;;  %v1992_v15 = vadd.f32 %v4197_v18, %v1991_v10 }
 0x20d   : > { %v2030_v43 = vmul.f32 %v4212_v62, %v1947_v63  ;;  %v2077_v50 = vadd.f32 %v4217_v57, %v2038_v7  ;;  %v2323_v0 = vpop.f32.mrf.mxu0  ;;  %v2418_v8 = vpop.f32.mrf.mxu1 }
 0x20e   : > { %2133 = vst.msk [vmem:[%s4227_s20 + $0x80] sm:$0xff] %vm2116_vm6, %v2100_v30  ;;  %2144 = vst.msk [vmem:[%s4227_s20 + $0xd8] sm:$0xff] %vm2116_vm6, %v2111_v21  ;;  %v2082_v40 = vadd.f32 %v4217_v57, %v2043_v31  ;;  %v2041_v37 = vmul.f32 %v4212_v62, %v1992_v15  ;;  %v2003_v16 = vadd.f32 %v2418_v8, %v2364_v44 }
 0x20f   : > { %v2069_v17 = vadd.f32 %v4217_v57, %v2030_v43  ;;  %v2109_v18 = vmax.f32 %v2077_v50, 0.0  ;;  %v2324_v52 = vpop.f32.mrf.mxu0  ;;  %v1994_v41 = vpop.f32.mrf.mxu1 }
 0x210   : > { %v2114_v32 = vmax.f32 %v2082_v40, 0.0  ;;  %v2080_v58 = vadd.f32 %v4217_v57, %v2041_v37  ;;  %v2044_v33 = vmul.f32 %v4212_v62, %v2003_v16  ;;  %v2325_v59 = vadd.f32 %v2324_v52, %v2323_v0 }
 0x211   : > { %v2101_v55 = vmax.f32 %v2069_v17, 0.0  ;;  %2142 = vst.msk [vmem:[%s4227_s20 + $0xc8] sm:$0xff] %vm2116_vm6, %v2109_v18  ;;  %v1995_v11 = vadd.f32 %v4199_v9, %v1994_v41  ;;  %v2326_v46 = vpop.f32.mrf.mxu0 }
 0x212   : > { %2147 = vst.msk [vmem:[%s4227_s20 + $0xf0] sm:$0xff] %vm2116_vm6, %v2114_v32  ;;  %v2112_v6 = vmax.f32 %v2080_v58, 0.0  ;;  %v2083_v49 = vadd.f32 %v4217_v57, %v2044_v33  ;;  %v1952_v47 = vadd.f32 %v4275_v45, %v2325_v59 }
 0x213   : > { %2134 = vst.msk [vmem:[%s4227_s20 + $0x88] sm:$0xff] %vm2116_vm6, %v2101_v55  ;;  %v2042_v4 = vmul.f32 %v4212_v62, %v1995_v11  ;;  %v2327_v19 = vpop.f32.mrf.mxu0 }
 0x214   : > { %2145 = vst.msk [vmem:[%s4227_s20 + $0xe0] sm:$0xff] %vm2116_vm6, %v2112_v6  ;;  %v2115_v51 = vmax.f32 %v2083_v49, 0.0  ;;  %v2031_v9 = vmul.f32 %v4212_v62, %v1952_v47  ;;  %v2328_v54 = vadd.f32 %v2327_v19, %v2326_v46 }
 0x215   : > { %v2081_v38 = vadd.f32 %v4217_v57, %v2042_v4 }
 0x216   : > { %2148 = vst.msk [vmem:[%s4227_s20 + $0xf8] sm:$0xff] %vm2116_vm6, %v2115_v51  ;;  %v2070_v34 = vadd.f32 %v4217_v57, %v2031_v9  ;;  %v1955_v45 = vadd.f32 %v4279_v26, %v2328_v54 }
 0x217   : > { %v2113_v61 = vmax.f32 %v2081_v38, 0.0 }
 0x218   : > { %v2102_v20 = vmax.f32 %v2070_v34, 0.0  ;;  %v2032_v42 = vmul.f32 %v4212_v62, %v1955_v45 }
 0x219   : > { %2146 = vst.msk [vmem:[%s4227_s20 + $0xe8] sm:$0xff] %vm2116_vm6, %v2113_v61  ;;  %v2329_v14 = vpop.f32.mrf.mxu0 }
 0x21a   : > { %2135 = vst.msk [vmem:[%s4227_s20 + $0x90] sm:$0xff] %vm2116_vm6, %v2102_v20  ;;  %v2071_v23 = vadd.f32 %v4217_v57, %v2032_v42 }
 0x21b   : > { %v2330_v13 = vpop.f32.mrf.mxu0 }
 0x21c   : > { %v2103_v25 = vmax.f32 %v2071_v23, 0.0  ;;  %v2331_v48 = vadd.f32 %v2330_v13, %v2329_v14 }
 0x21d   : > { %v2332_v3 = vpop.f32.mrf.mxu0 }
 0x21e   : > { %2136 = vst.msk [vmem:[%s4227_s20 + $0x98] sm:$0xff] %vm2116_vm6, %v2103_v25  ;;  %v1960_v26 = vadd.f32 %v2331_v48, %v4288_v53 }
 0x21f   : > { %v2333_v28 = vpop.f32.mrf.mxu0 }
 0x220   : > { %v2033_v39 = vmul.f32 %v4212_v62, %v1960_v26  ;;  %v2334_v1 = vadd.f32 %v2333_v28, %v2332_v3 }
 0x222   : > { %v2072_v12 = vadd.f32 %v4217_v57, %v2033_v39  ;;  %v1963_v36 = vadd.f32 %v2334_v1, %v4294_v2 }
 0x224   : > { %v2104_v56 = vmax.f32 %v2072_v12, 0.0  ;;  %v2034_v24 = vmul.f32 %v4212_v62, %v1963_v36 }
 0x225   : > { %v2335_v29 = vpop.f32.mrf.mxu0 }
 0x226   : > { %2137 = vst.msk [vmem:[%s4227_s20 + $0xa0] sm:$0xff] %vm2116_vm6, %v2104_v56  ;;  %v2073_v60 = vadd.f32 %v4217_v57, %v2034_v24 }
 0x227   : > { %v2336_v27 = vpop.f32.mrf.mxu0 }
 0x228   : > { %v2105_v53 = vmax.f32 %v2073_v60, 0.0  ;;  %v2337_v22 = vadd.f32 %v2336_v27, %v2335_v29 }
 0x229   : > { %v2338_v44 = vpop.f32.mrf.mxu0 }
 0x22a   : > { %2138 = vst.msk [vmem:[%s4227_s20 + $0xa8] sm:$0xff] %vm2116_vm6, %v2105_v53  ;;  %v1968_v63 = vadd.f32 %v4284_v5, %v2337_v22 }
 0x22b   : > { %v2339_v7 = vpop.f32.mrf.mxu0 }
 0x22c   : > { %v2035_v2 = vmul.f32 %v4212_v62, %v1968_v63  ;;  %v2340_v10 = vadd.f32 %v2339_v7, %v2338_v44 }
 0x22e   : > { %v2074_v30 = vadd.f32 %v4217_v57, %v2035_v2  ;;  %v1971_v21 = vadd.f32 %v4291_v35, %v2340_v10 }
 0x230   : > { %v2106_v31 = vmax.f32 %v2074_v30, 0.0  ;;  %v2036_v15 = vmul.f32 %v4212_v62, %v1971_v21 }
 0x232   : > { %2139 = vst.msk [vmem:[%s4227_s20 + $0xb0] sm:$0xff] %vm2116_vm6, %v2106_v31  ;;  %v2075_v43 = vadd.f32 %v4217_v57, %v2036_v15 }
 0x234   : > { %v2107_v50 = vmax.f32 %v2075_v43, 0.0 }
 0x236   : > { %2140 = vst.msk [vmem:[%s4227_s20 + $0xb8] sm:$0xff] %vm2116_vm6, %v2107_v50 }
 0x237 PF: > { %s14_s15 = sadd.s32 1, %s2983_s15  }
 0x238   : > { %p11_p4 = scmp.ge.s32.totalorder %s14_s15, 4  }
 0x23a   :  { %13 = sbr.rel (!%p11_p4) target bundleno = 1 (0x1), region = 67 }

// kernel: db_head_forward.12
= control target key start
LH: loop header
LB: loop body
LE: loop exit
PB: predicated region body
PF: predicated region fallthrough
CT: control target
= control target key end

     0   :  { %s893_s15 = smov 0   ;;  %s1049_s0 = inlined_call_operand.vmem [shape: f32[2,2,2,32], index: 0, kind: input, shape index: {}]   ;;  %s1050_s1 = inlined_call_operand.vmem [shape: bf16[288,8], index: 1, kind: input, shape index: {}]   ;;  %s1051_s2 = inlined_call_operand.vmem [shape: f32[1,8], index: 2, kind: input, shape index: {}]   ;;  %s1052_s3 = inlined_call_operand.vmem [shape: f32[1,8], index: 3, kind: input, shape index: {}]   ;;  %s1053_s4 = inlined_call_operand.vmem [shape: f32[2,16,2,64], index: 4, kind: output, shape index: {}]  }
   0x1 LB: > { %s741_s16 = sadd.s32 4294967295, %s854_s15   ;;  %p745_p0 = scmp.ge.s32.totalorder %s854_s15, 1  ;;  %s854_s15 = sphi %s893_s15, %s14_s15  }
   0x2   : > { %p162_p1 = scmp.lt.s32.totalorder %s854_s15, 3 }
   0x4   : > { %p163_p2 = pnand %p745_p0, %p162_p1 }
   0x5   : > { %p188_p3 = scmp.lt.s32.totalorder (!%p163_p2), %s741_s16, 1  ;;  %s858_s5 = smov (!%p163_p2), 64  }
   0x6   : > { %166 = sbr.rel (%p163_p2) target bundleno = 528 (0x210), region = 36  ;;  %s859_s8 = smov (!%p163_p2), 32  }
   0x7   : > { %s860_s17 = smov (!%p163_p2), 96   ;;  %s863_s18 = smov (!%p163_p2), 16  }
   0x8   : > { %s864_s19 = smov (!%p163_p2), 24   ;;  %s865_s20 = smov (!%p163_p2), 40  }
   0x9   : > { %s866_s21 = smov (!%p163_p2), 48   ;;  %s867_s22 = smov (!%p163_p2), 56  }
   0xb   : > { %vm199_vm0 = vcmask 257024   ;;  %v856_v0 = vmov 0.0   ;;  %v830_v1 = vld [vmem:[%s1050_s1 + $0x78] sm:$0xff]   ;;  %v287_v2 = vlaneseq  ;;  %s1055_s16 = smov (!%p188_p3, %s741_s16), 1  ;;  %v832_v4 = vld [vmem:[%s1050_s1 + $0x70] sm:$0xff]   ;;  %vm207_vm1 = vcmask 254976  }
   0xc   : > { %203 = vst.msk [vmem:[#allocation2 + $0xc] sm:$0xf] %vm199_vm0, %v856_v0  ;;  %200 = vst.msk [vmem:[#allocation2] sm:$0xf] %vm199_vm0, %v856_v0  ;;  %802 = vmatprep.subr.bf16.mxu1 %v856_v0  ;;  %v831_v3 = vld [vmem:[%s1050_s1 + $0x38] sm:$0xff]   ;;  %777 = vmatprep.subr.bf16.mxu0 %v830_v1  ;;  %s775_s23 = sshll.u32 %s1055_s16, 2 }
   0xd   : > { %201 = vst.msk [vmem:[#allocation2 + $0x4] sm:$0xf] %vm199_vm0, %v856_v0  ;;  %202 = vst.msk [vmem:[#allocation2 + $0x8] sm:$0xf] %vm199_vm0, %v856_v0  ;;  %v857_v5 = vmov 1983009808   ;;  %778 = vmatpush3.bf16.msra.mxu0 %v831_v3  ;;  %s192_s28 = scalar_lea.vmem %s1049_s0, %s775_s23 }
   0xe   : > { %v285_v6 = vunpack.c.l.s4 %v857_v5  ;;  %v833_v7 = vld [vmem:[%s1050_s1 + $0x30] sm:$0xff]   ;;  %779 = vmatprep.subr.bf16.mxu0 %v832_v4  ;;  %v288_v8 = vshrl.u32 %v287_v2, 7  ;;  %v205_v9 = vld [vmem:[%s192_s28 + $0x2] sm:$0x3]  ;;  %v204_v10 = vld [vmem:[%s192_s28] sm:$0x3] }
   0xf   : > { %v834_v11 = vld [vmem:[%s1050_s1 + $0x68] sm:$0xff]   ;;  %209 = vst.msk [vmem:[#allocation2 + $0x9] sm:$0x3] %vm207_vm1, %v205_v9  ;;  %208 = vst.msk [vmem:[#allocation2 + $0x5] sm:$0x3] %vm207_vm1, %v204_v10  ;;  %v836_v19 = vld [vmem:[%s1050_s1 + $0x60] sm:$0xff]  }
  0x10   : > { %v286_v13 = vunpack.c.0.s8 %v285_v6  ;;  %v835_v16 = vld [vmem:[%s1050_s1 + $0x28] sm:$0xff]   ;;  %v837_v20 = vld [vmem:[%s1050_s1 + $0x20] sm:$0xff]   ;;  %v838_v24 = vld [vmem:[%s1050_s1 + $0x58] sm:$0xff]   ;;  %vm861_vm2 = vmmov 0   ;;  %vm264_vm3 = vcmask 261120   ;;  %vm267_vm4 = vcmask 523264  }
  0x11   : > { %780 = vmatpush3.bf16.msra.mxu0 %v833_v7  ;;  %v839_v28 = vld [vmem:[%s1050_s1 + $0x18] sm:$0xff]   ;;  %v840_v30 = vld [vmem:[%s1050_s1 + $0x50] sm:$0xff]   ;;  %v842_v33 = vld [vmem:[%s1050_s1 + $0x88] sm:$0xff]   ;;  %806 = vmatprep.mubr.msk.bf16.mxu1 %vm861_vm2, %v856_v0  ;;  %vm270_vm5 = vcmask 785408   ;;  %vm649_vm6 = vcmask 64512   ;;  %vm652_vm7 = vcmask 130048  }
  0x12   : > { %781 = vmatprep.subr.bf16.mxu0 %v834_v11  ;;  %v946_v21 = vsub.s32 %v286_v13, %v288_v8  ;;  %v841_v32 = vld [vmem:[%s1050_s1 + $0x10] sm:$0xff]   ;;  %v843_v34 = vld [vmem:[%s1050_s1 + $0x48] sm:$0xff]   ;;  %803 = vmatpush3.bf16.msra.mxu1 %v842_v33  ;;  %v845_v37 = vld [vmem:[%s1050_s1 + $0x80] sm:$0xff]   ;;  %vm655_vm8 = vcmask 195584   ;;  %vm660_vm9 = vcmask 326656   ;;  %vm663_vm10 = vcmask 392192  }
  0x13   : > { %v927_v12 = vld [vmem:[#allocation2 + $0xc] sm:$0xf]  ;;  %v929_v14 = vld [vmem:[#allocation2] sm:$0xf]  ;;  %804 = vmatprep.subr.bf16.mxu1 %v856_v0  ;;  %vm666_vm11 = vcmask 457728   ;;  %vm669_vm12 = vcmask 517120  }
  0x14   : > { %252 = vrot.lane.b32.xlu1 %v927_v12, %s858_s5  ;;  %v216_v15 = vrot.slane %v929_v14, 1  ;;  %v263_v17 = vrot.slane %v927_v12, 2  ;;  %v224_v18 = vrot.slane %v929_v14, 2  ;;  %v844_v38 = vld [vmem:[%s1050_s1 + $0x8] sm:$0xff]   ;;  %v846_v39 = vld [vmem:[%s1050_s1 + $0x40] sm:$0xff]   ;;  %v256_v42 = vrot.slane %v927_v12, 1 }
  0x15   : > { %782 = vmatpush3.bf16.msra.mxu0 %v835_v16  ;;  %v847_v43 = vld [vmem:[%s1050_s1] sm:$0xff]  }
  0x16   : > { %218 = vrot.lane.b32.xlu0 %v216_v15, %s859_s8  ;;  %783 = vmatprep.subr.bf16.mxu0 %v836_v19  ;;  %v949_v22 = vld [vmem:[#allocation2 + $0x8] sm:$0xf]  ;;  %v211_v23 = vld [vmem:[#allocation2 + $0x4] sm:$0xf]  ;;  %v313_v25 = vrot.slane %v263_v17, %v946_v21 }
  0x17   : > { %v225_v26 = vrot.slane %v211_v23, 2  ;;  %v242_v27 = vrot.slane %v949_v22, 2  ;;  %v217_v35 = vrot.slane %v211_v23, 1  ;;  %v239_v40 = vrot.slane %v949_v22, 1  ;;  %805 = vmatpush3.bf16.msra.mxu1 %v845_v37 }
  0x18   : > { %235 = vrot.lane.b32.xlu1 %v949_v22, %s860_s17 }
  0x19   : > { %784 = vmatpush3.bf16.msra.mxu0 %v837_v20  ;;  %v297_v29 = vrot.slane %v242_v27, %v946_v21  ;;  %v771_v20 = vld [vmem:[%s1051_s2] ss:$0 sm:$0xff] }
  0x1a   : > { %226 = vrot.lane.b32.xlu0 %v224_v18, %s858_s5  ;;  %785 = vmatprep.subr.bf16.mxu0 %v838_v24  ;;  %v772_v24 = vld [vmem:[%s1052_s3] ss:$0 sm:$0xff] }
  0x1b   : > { %v751_v31 = vcombine.low %v297_v29, %v313_v25 }
  0x1c   : > { %243 = vrot.lane.b32.xlu1 %v225_v26, %s859_s8 }
  0x1d   : > { %786 = vmatpush3.bf16.msra.mxu0 %v839_v28  ;;  %v330_v36 = vrot.slane %v751_v31, %v946_v21 }
  0x1e   : > { %250 = vrot.lane.b32.xlu0 %v949_v22, %s858_s5  ;;  %787 = vmatprep.subr.bf16.mxu0 %v840_v30 }
  0x1f   : > { %v337_v41 = vpack.c.bf16 %v330_v36, %v330_v36 }
  0x20   : > { %245 = vrot.lane.b32.xlu1 %v242_v27, %s859_s8 }
  0x21   : > { %788 = vmatpush3.bf16.msra.mxu0 %v841_v32  ;;  %807 = vmatmul.mubr.msk.bf16.vlgmr.msra.gmra.mxu1 %vm264_vm3, %v337_v41 }
  0x22   : > { %233 = vrot.lane.b32.xlu0 %v211_v23, %s860_s17  ;;  %789 = vmatprep.subr.bf16.mxu0 %v843_v34 }
  0x24   : > { %228 = vrot.lane.b32.xlu1 %v225_v26, %s858_s5 }
  0x25   : > { %790 = vmatpush3.bf16.msra.mxu0 %v844_v38 }
  0x26   : > { %220 = vrot.lane.b32.xlu0 %v217_v35, %s859_s8  ;;  %791 = vmatprep.subr.bf16.mxu0 %v846_v39 }
  0x28   : > { %259 = vrot.lane.b32.xlu1 %v256_v42, %s860_s17 }
  0x29   : > { %792 = vmatpush3.bf16.msra.mxu0 %v847_v43 }
  0x2a   : > { %257 = vrot.lane.b32.xlu0 %v239_v40, %s860_s17  ;;  %s862_s17 = smov 8  }
  0x86   : > { %v253_v44 = vpop.permute.xlu1 %252 }
  0x88   : > { %v219_v45 = vpop.permute.xlu0 %218 }
  0x89   : > { %v265_v57 = vsel %vm264_vm3, %v929_v14, %v219_v45 }
  0x8a   : > { %v236_v47 = vpop.permute.xlu1 %235 }
  0x8c   : > { %v227_v46 = vpop.permute.xlu0 %226 }
  0x8d   : > { %v268_v59 = vsel %vm267_vm4, %v265_v57, %v227_v46 }
  0x8e   : > { %v244_v49 = vpop.permute.xlu1 %243 }
  0x8f   : > { %v273_v53 = vsel %vm264_vm3, %v217_v35, %v244_v49 }
  0x90   : > { %v251_v48 = vpop.permute.xlu0 %250 }
  0x91   : > { %v275_v61 = vsel %vm267_vm4, %v273_v53, %v251_v48 }
  0x92   : > { %v246_v51 = vpop.permute.xlu1 %245 }
  0x93   : > { %v274_v56 = vsel %vm264_vm3, %v239_v40, %v246_v51 }
  0x94   : > { %v234_v50 = vpop.permute.xlu0 %233  ;;  %v276_v63 = vsel %vm267_vm4, %v274_v56, %v253_v44 }
  0x95   : > { %v271_v62 = vsel %vm270_vm5, %v268_v59, %v234_v50 }
  0x96   : > { %v229_v54 = vpop.permute.xlu1 %228 }
  0x98   : > { %v221_v52 = vpop.permute.xlu0 %220 }
  0x99   : > { %v266_v55 = vsel %vm264_vm3, %v211_v23, %v221_v52 }
  0x9a   : > { %v269_v58 = vsel %vm267_vm4, %v266_v55, %v229_v54  ;;  %v260_v0 = vpop.permute.xlu1 %259 }
  0x9b   : > { %v272_v2 = vsel %vm270_vm5, %v269_v58, %v236_v47  ;;  %v278_v3 = vsel %vm270_vm5, %v276_v63, %v260_v0 }
  0x9c   : > { %v258_v60 = vpop.permute.xlu0 %257  ;;  %v299_v5 = vcombine.low %v272_v2, %v278_v3 }
  0x9d   : > { %v277_v1 = vsel %vm270_vm5, %v275_v61, %v258_v60 }
  0x9e   : > { %v283_v4 = vcombine.low %v271_v62, %v277_v1  ;;  %v306_v7 = vrot.slane %v299_v5, %v946_v21 }
  0xa0   : > { %v290_v6 = vrot.slane %v283_v4, %v946_v21 }
  0xa2   : > { %v750_v8 = vcombine.low %v290_v6, %v306_v7 }
  0xa4   : > { %v323_v9 = vrot.slane %v750_v8, %v946_v21 }
  0xa6   : > { %v331_v10 = vcombine.high %v323_v9, %v323_v9  ;;  %v335_v12 = vpack.c.bf16 %v323_v9, %v323_v9 }
  0xa8   : > { %v336_v11 = vpack.c.bf16 %v331_v10, %v331_v10 }
  0xaa   : > { %517 = vmatprep.mubr.bf16.mxu0 %v336_v11 }
  0xab   : > { %518 = vmatmul.mubr.bf16.vlgmr.msra.gmra.mxu0 %v335_v12 }
  0xe1   : > { %v559_v13 = vpop.f32.mrf.mxu1 }
  0xe3   : > { %v808_v14 = vpop.f32.mrf.mxu1 }
  0xe5   : > { %v562_v15 = vpop.f32.mrf.mxu1 }
  0xe7   : > { %v809_v16 = vpop.f32.mrf.mxu1 }
 0x16b   : > { %v793_v17 = vpop.f32.mrf.mxu0 }
 0x16d   : > { %v794_v18 = vpop.f32.mrf.mxu0 }
 0x16e   : > { %v795_v19 = vadd.f32 %v794_v18, %v793_v17 }
 0x16f   : > { %v796_v22 = vpop.f32.mrf.mxu0 }
 0x170   : > { %v560_v23 = vadd.f32 %v795_v19, %v559_v13 }
 0x171   : > { %v797_v25 = vpop.f32.mrf.mxu0 }
 0x172   : > { %v572_v26 = vmul.f32 %v771_v20, %v560_v23 }
 0x174   : > { %v580_v27 = vadd.f32 %v772_v24, %v572_v26 }
 0x176   : > { %v581_v28 = vmax.f32 %v580_v27, 0.0 }
 0x178   : > { %v589_v29 = vrot.slane %v581_v28, %v946_v21 }
 0x17a   : > { %v590_v30 = vcombine.high %v589_v29, %v589_v29  ;;  %v599_v31 = vrot.slane %v589_v29, %v946_v21 }
 0x17c   : > { %v606_v32 = vrot.slane %v590_v30, %v946_v21  ;;  %607 = vrot.lane.b32.xlu0 %v599_v31, %s862_s17 }
 0x17e   : > { %609 = vrot.lane.b32.xlu1 %v606_v32, %s862_s17 }
 0x180   : > { %613 = vrot.lane.b32.xlu0 %v599_v31, %s863_s18 }
 0x182   : > { %615 = vrot.lane.b32.xlu1 %v606_v32, %s863_s18 }
 0x184   : > { %619 = vrot.lane.b32.xlu0 %v599_v31, %s864_s19 }
 0x186   : > { %621 = vrot.lane.b32.xlu1 %v606_v32, %s864_s19 }
 0x188   : > { %625 = vrot.lane.b32.xlu0 %v599_v31, %s859_s8 }
 0x18a   : > { %627 = vrot.lane.b32.xlu1 %v606_v32, %s859_s8  ;;  %s776_s8 = sshll.u32 %s1055_s16, 5 }
 0x18b   : > { %s197_s25 = scalar_lea.vmem %s1053_s4, %s776_s8 }
 0x18c   : > { %631 = vrot.lane.b32.xlu0 %v599_v31, %s865_s20 }
 0x18e   : > { %633 = vrot.lane.b32.xlu1 %v606_v32, %s865_s20 }
 0x190   : > { %637 = vrot.lane.b32.xlu0 %v599_v31, %s866_s21 }
 0x192   : > { %639 = vrot.lane.b32.xlu1 %v606_v32, %s866_s21 }
 0x194   : > { %643 = vrot.lane.b32.xlu0 %v599_v31, %s867_s22 }
 0x196   : > { %645 = vrot.lane.b32.xlu1 %v606_v32, %s867_s22 }
 0x1ee   : > { %v608_v21 = vpop.permute.xlu0 %607 }
 0x1ef   : > { %v650_v42 = vsel %vm649_vm6, %v589_v29, %v608_v21 }
 0x1f0   : > { %v610_v33 = vpop.permute.xlu1 %609 }
 0x1f1   : > { %v651_v45 = vsel %vm649_vm6, %v590_v30, %v610_v33 }
 0x1f2   : > { %v614_v34 = vpop.permute.xlu0 %613 }
 0x1f3   : > { %v653_v43 = vsel %vm652_vm7, %v650_v42, %v614_v34 }
 0x1f4   : > { %v616_v35 = vpop.permute.xlu1 %615 }
 0x1f5   : > { %v654_v47 = vsel %vm652_vm7, %v651_v45, %v616_v35 }
 0x1f6   : > { %v620_v36 = vpop.permute.xlu0 %619 }
 0x1f7   : > { %v656_v46 = vsel %vm655_vm8, %v653_v43, %v620_v36 }
 0x1f8   : > { %v622_v37 = vpop.permute.xlu1 %621 }
 0x1f9   : > { %v657_v50 = vsel %vm655_vm8, %v654_v47, %v622_v37 }
 0x1fa   : > { %v626_v38 = vpop.permute.xlu0 %625 }
 0x1fb   : > { %v658_v48 = vsel %vm264_vm3, %v656_v46, %v626_v38 }
 0x1fc   : > { %v628_v39 = vpop.permute.xlu1 %627 }
 0x1fd   : > { %v659_v52 = vsel %vm264_vm3, %v657_v50, %v628_v39 }
 0x1fe   : > { %v632_v40 = vpop.permute.xlu0 %631 }
 0x1ff   : > { %v661_v51 = vsel %vm660_vm9, %v658_v48, %v632_v40 }
 0x200   : > { %v634_v41 = vpop.permute.xlu1 %633 }
 0x201   : > { %v662_v55 = vsel %vm660_vm9, %v659_v52, %v634_v41 }
 0x202   : > { %v638_v44 = vpop.permute.xlu0 %637 }
 0x203   : > { %v664_v53 = vsel %vm663_vm10, %v661_v51, %v638_v44 }
 0x204   : > { %v640_v49 = vpop.permute.xlu1 %639 }
 0x205   : > { %v665_v57 = vsel %vm663_vm10, %v662_v55, %v640_v49 }
 0x206   : > { %v644_v54 = vpop.permute.xlu0 %643 }
 0x207   : > { %v667_v56 = vsel %vm666_vm11, %v664_v53, %v644_v54 }
 0x208   : > { %670 = vst.msk [vmem:[%s197_s25] sm:$0x3] %vm669_vm12, %v667_v56  ;;  %671 = vst.msk [vmem:[%s197_s25 + $0x2] sm:$0x3] %vm669_vm12, %v667_v56  ;;  %v646_v58 = vpop.permute.xlu1 %645 }
 0x209   : > { %672 = vst.msk [vmem:[%s197_s25 + $0x4] sm:$0x3] %vm669_vm12, %v667_v56  ;;  %673 = vst.msk [vmem:[%s197_s25 + $0x6] sm:$0x3] %vm669_vm12, %v667_v56  ;;  %v668_v59 = vsel %vm666_vm11, %v665_v57, %v646_v58 }
 0x20a   : > { %674 = vst.msk [vmem:[%s197_s25 + $0x8] sm:$0x3] %vm669_vm12, %v667_v56  ;;  %675 = vst.msk [vmem:[%s197_s25 + $0xa] sm:$0x3] %vm669_vm12, %v667_v56 }
 0x20b   : > { %676 = vst.msk [vmem:[%s197_s25 + $0xc] sm:$0x3] %vm669_vm12, %v667_v56  ;;  %677 = vst.msk [vmem:[%s197_s25 + $0xe] sm:$0x3] %vm669_vm12, %v667_v56 }
 0x20c   : > { %678 = vst.msk [vmem:[%s197_s25 + $0x10] sm:$0x3] %vm669_vm12, %v668_v59  ;;  %679 = vst.msk [vmem:[%s197_s25 + $0x12] sm:$0x3] %vm669_vm12, %v668_v59 }
 0x20d   : > { %680 = vst.msk [vmem:[%s197_s25 + $0x14] sm:$0x3] %vm669_vm12, %v668_v59  ;;  %681 = vst.msk [vmem:[%s197_s25 + $0x16] sm:$0x3] %vm669_vm12, %v668_v59 }
 0x20e   : > { %682 = vst.msk [vmem:[%s197_s25 + $0x18] sm:$0x3] %vm669_vm12, %v668_v59  ;;  %683 = vst.msk [vmem:[%s197_s25 + $0x1a] sm:$0x3] %vm669_vm12, %v668_v59 }
 0x20f   : > { %684 = vst.msk [vmem:[%s197_s25 + $0x1c] sm:$0x3] %vm669_vm12, %v668_v59  ;;  %685 = vst.msk [vmem:[%s197_s25 + $0x1e] sm:$0x3] %vm669_vm12, %v668_v59 }
 0x210 PF: > { %s14_s15 = sadd.s32 1, %s854_s15  }
 0x211   : > { %p11_p4 = scmp.ge.s32.totalorder %s14_s15, 4  }
 0x213   :  { %13 = sbr.rel (!%p11_p4) target bundleno = 1 (0x1), region = 67 }

</bundles_post_ra>
